<compile_context>
chip_gen: v7x
topology: tpu7x:2x2x1
jax: 0.10.0
libtpu: 0.0.40
codegen_flags: <defaults>
</compile_context>

<pallas_src>
import functools

import numpy as np
import jax
import jax.numpy as jnp
from jax import lax
from jax.experimental import pallas as pl
from jax.experimental.pallas import tpu as pltpu


LANE = 128


def _pad8(c):
    return ((c + 7) // 8) * 8


def _pad_lane(n):
    return max(LANE, ((n + LANE - 1) // LANE) * LANE)


# -----------------------------------------------------------------------------
# Fused PriorNet forward kernel
# -----------------------------------------------------------------------------
def priornet_fused_kernel(*refs, e_real, leaky, layer_cfg):
    """Whole PriorNet forward in one kernel.

    refs layout:
      refs[0] a_ref : (E_pad, 4*E_pad)    bf16  taps [G1+G3, G2+G4, G1-G3, G2-G4]^T
                                                concatenated along lanes (identity
                                                tap handled via the activation)
      refs[1] x_ref : (C0_pad, E_pad)     bf16  input edge features, channels-first
      refs[2] s_ref : (2, E_pad, V_pad)   bf16  build_v scatter-average (transposed)
      refs[3] v0_ref: (3, V_pad)          f32   init_verts^T (lane padded)
      refs[4 : 4+2L]: per-layer (w, b): w (5, Cout_pad, Cin_pad) bf16,
                                        b (Cout_pad, 1) f32
      refs[-1] o_ref: (3, V_pad)          f32   estimated vertices^T
    """
    n_layers = len(layer_cfg)
    a_ref, x_ref, s_ref, v0_ref = refs[0], refs[1], refs[2], refs[3]
    wb_refs = refs[4:4 + 2 * n_layers]
    o_ref = refs[4 + 2 * n_layers]

    e_pad = a_ref.shape[0]
    inv_e = 1.0 / float(e_real)
    # Mask of real (non padded) edge lanes; padded lanes must not pollute the
    # per-channel InstanceNorm statistics.  Hoisted out of the layer loop
    # (broadcasts are not CSE'd).
    lane_mask = (
        lax.broadcasted_iota(jnp.int32, (1, e_pad), 1) < e_real
    ).astype(jnp.float32)

    def instance_norm(t):  # InstanceNorm2d(affine=False), biased var, eps=1e-5
        tm = t * lane_mask
        mean = jnp.sum(tm, axis=1, keepdims=True) * inv_e
        diff = (t - mean) * lane_mask
        var = jnp.sum(diff * diff, axis=1, keepdims=True) * inv_e
        # Returning diff (already lane-masked) zeroes padded lanes for free.
        return diff * lax.rsqrt(var + 1e-5)

    a_bf = a_ref[...]          # (E_pad, 4*E_pad) bf16, loaded into VMEM regs once
    h = x_ref[...]             # (C_pad, E_pad) bf16 activation, resident in VMEM
    h_f32 = None               # f32 copy of the last layer's output (for build_v)

    for l, (relu, n_norm) in enumerate(layer_cfg):
        w_ref = wb_refs[2 * l]           # (5, Cout_pad, Cin_pad) bf16
        b = wb_refs[2 * l + 1][...]      # (Cout_pad, 1) f32

        # Neighbor-selection matmul for the 4 sum/diff taps (bf16 in, f32 acc):
        #   big[c, j*E_pad + e] = sum_e' h[c, e'] * A_j[e, e']
        big = jnp.dot(h, a_bf, preferred_element_type=jnp.float32)  # (Cin_pad, 4*E_pad)

        # (1,5)-conv as an accumulation of 5 per-tap MXU matmuls.
        # Tap 0 is the identity tap -> use the resident bf16 activation directly.
        out = jnp.dot(w_ref[0], h, preferred_element_type=jnp.float32)
        for j in range(4):
            tap = big[:, j * e_pad:(j + 1) * e_pad]   # 128-aligned lane view
            if j >= 2:                                # |f1-f3|, |f2-f4| taps
                tap = jnp.abs(tap)
            out = out + jnp.dot(w_ref[j + 1], tap.astype(jnp.bfloat16),
                                preferred_element_type=jnp.float32)
        out = out + b

        if relu:  # F.leaky_relu(x, leaky)
            out = jnp.where(out > 0, out, leaky * out)
        for _ in range(n_norm):
            out = instance_norm(out)

        h_f32 = out
        h = out.astype(jnp.bfloat16)     # keep the resident activation bf16

    # build_v: vs[d, v] = sum_e h[d, e]*S0[e, v] + h[3+d, e]*S1[e, v] + v0[d, v]
    h03 = h_f32[0:3, :].astype(jnp.bfloat16)
    h36 = h_f32[3:6, :].astype(jnp.bfloat16)
    vs = (jnp.dot(h03, s_ref[0], preferred_element_type=jnp.float32)
          + jnp.dot(h36, s_ref[1], preferred_element_type=jnp.float32)
          + v0_ref[...])
    o_ref[...] = vs


# -----------------------------------------------------------------------------
# pallas_call wrapper: the whole PriorNet forward
# -----------------------------------------------------------------------------
def priornet_forward(x, params, a_cat, s_t, v0_t, *, n_edges, n_verts, leaky=0.0):
    # x: (1, in_ch=6, E)  (PyTorch N,C,E) -> kernel layout (C_pad, E_pad) bf16
    # TODO(synk): mesh.deep_copy() is pure bookkeeping (no tensor compute); skipped.
    e_pad = a_cat.shape[0]
    v_pad = s_t.shape[-1]
    in_ch = x.shape[1]
    c0p = _pad8(in_ch)

    h0 = jnp.zeros((c0p, e_pad), jnp.bfloat16).at[:in_ch, :n_edges].set(
        x[0].astype(jnp.bfloat16))

    flat_wb = []
    for w, b in params:
        flat_wb.extend([w, b])

    # (relu, number-of-InstanceNorms) per MeshConv layer:
    # enc(6->32), enc(32->64), dec up(64->32), dec conv1(32->32),
    # final up(32->6), final conv1(6->6) + encoder_decoder final IN, last_conv(6->6)
    layer_cfg = ((True, 1), (True, 1), (False, 0), (True, 1),
                 (False, 0), (True, 2), (False, 0))
    assert len(layer_cfg) == len(params)

    kernel = functools.partial(
        priornet_fused_kernel,
        e_real=int(n_edges), leaky=float(leaky), layer_cfg=layer_cfg,
    )

    args = [a_cat, h0, s_t, v0_t] + flat_wb

    # Single-buffered, whole-array VMEM residency (no grid -> nothing to pipeline).
    vmem_spec = pl.BlockSpec(memory_space=pltpu.MemorySpace.VMEM)
    in_specs = [vmem_spec for _ in args]

    # Scoped-VMEM budget sized to the resident footprint + matmul temporaries,
    # clamped so it fits all generations (v7x physical VMEM is 64 MiB).
    def _nbytes(a):
        return int(np.prod(a.shape)) * jnp.dtype(a.dtype).itemsize
    max_c = max(max(w.shape[1], w.shape[2]) for w, _ in params)
    resident = sum(_nbytes(a) for a in args) + 3 * v_pad * 4
    temps = max_c * 4 * e_pad * (4 + 2)          # selection result f32 + bf16 views
    temps += 2 * max_c * e_pad * (4 + 2)         # activation / conv output
    vmem_limit = int(min(max(2 * (resident + temps), 32 << 20), 56 << 20))

    out = pl.pallas_call(
        kernel,
        out_shape=jax.ShapeDtypeStruct((3, v_pad), jnp.float32),
        in_specs=in_specs,
        out_specs=vmem_spec,
        compiler_params=pltpu.CompilerParams(vmem_limit_bytes=vmem_limit),
    )(*args)

    est = out[:, :n_verts].T          # (V, 3)
    return est[None]                  # (1, V, 3)


# -----------------------------------------------------------------------------
# Mesh connectivity (host-side glue) — MeshCNN gemm taps + build_v scatter matrix
# -----------------------------------------------------------------------------
def make_mesh(faces, n_vertices):
    edge2key, edges, face_edges = {}, [], []
    for f in faces:
        fe = []
        for i in range(3):
            a, b = f[i], f[(i + 1) % 3]
            key = (min(a, b), max(a, b))
            if key not in edge2key:
                edge2key[key] = len(edges)
                edges.append(key)
            fe.append(edge2key[key])
        face_edges.append(fe)
    E = len(edges)
    e_pad = _pad_lane(E)
    v_pad = _pad_lane(n_vertices)

    gemm = -np.ones((E, 4), dtype=np.int64)
    cnt = np.zeros(E, dtype=np.int64)
    for fe in face_edges:
        for i in range(3):
            e = fe[i]
            gemm[e, 2 * cnt[e]] = fe[(i + 1) % 3]
            gemm[e, 2 * cnt[e] + 1] = fe[(i + 2) % 3]
            cnt[e] += 1

    # one-hot neighbor selection matrices (zero padded rows/cols for e >= E)
    G = np.zeros((5, e_pad, e_pad), dtype=np.float32)
    G[0, :E, :E] = np.eye(E, dtype=np.float32)
    for j in range(1, 5):
        for e in range(E):
            n = gemm[e, j - 1]
            if n >= 0:
                G[j, e, n] = 1.0
    # Identity tap dropped (handled with the resident activation in-kernel).
    taps = [G[1] + G[3], G[2] + G[4], G[1] - G[3], G[2] - G[4]]
    # a_cat[e', j*E_pad + e] = A_j[e, e']   (small integers -> exact in bf16)
    a_cat = np.concatenate([t.T for t in taps], axis=1).astype(np.float32)

    # build_v scatter-average (transposed): S_T[k, e, v] = 1/deg(v)
    edges_np = np.array(edges, dtype=np.int64)
    deg = np.zeros(n_vertices, dtype=np.float32)
    for e in range(E):
        for k in range(2):
            deg[edges_np[e, k]] += 1.0
    s_t = np.zeros((2, e_pad, v_pad), dtype=np.float32)
    for e in range(E):
        for k in range(2):
            v = edges_np[e, k]
            s_t[k, e, v] = 1.0 / max(deg[v], 1.0)
    return E, e_pad, v_pad, a_cat, s_t


# -----------------------------------------------------------------------------
# Parameter init (deterministic; matches init_weights(..., 'normal', 0.002),
# Conv2d biases zeroed by reset_params, tiny-uniform last_conv init), packed
# into the (5, Cout_pad, Cin_pad) bf16 layout used by the fused kernel.
# -----------------------------------------------------------------------------
def _pack_weight(raw, c_in, c_out):
    # raw: (5, c_in, c_out) with raw[j, c, o] == torch Conv2d.weight[o, c, 0, j]
    cin_p, cout_p = _pad8(c_in), _pad8(c_out)
    w = jnp.zeros((5, cout_p, cin_p), jnp.float32)
    for j in range(5):
        w = w.at[j, :c_out, :c_in].set(raw[j].T)
    return w.astype(jnp.bfloat16)


def init_params(key, layer_dims, init_weights_size=0.002, eps=1e-8):
    params = []
    keys = jax.random.split(key, len(layer_dims) + 2)
    for i, (c_in, c_out) in enumerate(layer_dims):
        raw = init_weights_size * jax.random.normal(
            keys[i], (5, c_in, c_out), dtype=jnp.float32)
        params.append((_pack_weight(raw, c_in, c_out),
                       jnp.zeros((_pad8(c_out), 1), jnp.float32)))
    # last_conv MeshConv(6, 6): uniform(-eps, eps) for weight AND bias
    lraw = jax.random.uniform(keys[-2], (5, 6, 6), minval=-eps, maxval=eps,
                              dtype=jnp.float32)
    lbraw = jax.random.uniform(keys[-1], (6,), minval=-eps, maxval=eps,
                               dtype=jnp.float32)
    lb = jnp.zeros((_pad8(6), 1), jnp.float32).at[:6, 0].set(lbraw)
    params.append((_pack_weight(lraw, 6, 6), lb))
    return params


# -----------------------------------------------------------------------------
if __name__ == "__main__":
    # Small octahedron mesh: V=6 vertices, 8 faces, E=12 edges.
    faces = [
        (0, 1, 2), (0, 2, 3), (0, 3, 4), (0, 4, 1),
        (5, 2, 1), (5, 3, 2), (5, 4, 3), (5, 1, 4),
    ]
    V = 6
    E, E_pad, V_pad, A_cat_np, S_T_np = make_mesh(faces, V)

    verts = np.array(
        [[0, 0, 1], [1, 0, 0], [0, 1, 0], [-1, 0, 0], [0, -1, 0], [0, 0, -1]],
        dtype=np.float32,
    )

    key = jax.random.PRNGKey(0)
    k_x, k_p = jax.random.split(key)

    in_ch = 6
    x = jax.random.normal(k_x, (1, in_ch, E), dtype=jnp.float32)  # (B=1, C=6, E=12)

    # MeshConv layer dims: enc(6->32, 32->64), dec(64->32, 32->32, 32->6, 6->6)
    layer_dims = [(6, 32), (32, 64), (64, 32), (32, 32), (32, 6), (6, 6)]
    params = init_params(k_p, layer_dims)

    a_cat = jnp.asarray(A_cat_np, dtype=jnp.bfloat16)   # exact: small integers
    s_t = jnp.asarray(S_T_np, dtype=jnp.bfloat16)
    v0_t = jnp.zeros((3, V_pad), jnp.float32).at[:, :V].set(jnp.asarray(verts).T)

    est_verts = priornet_forward(
        x, params, a_cat, s_t, v0_t, n_edges=E, n_verts=V, leaky=0.0)
    est_verts = jax.block_until_ready(est_verts)

    assert est_verts.shape == (1, V, 3)
    assert bool(jnp.all(jnp.isfinite(est_verts)))
    print("KERNEL_OK")
</pallas_src>

<mosaic_0001>
module attributes {stable_mosaic.version = 11 : i64} {
  func.func @priornet_fused_kernel(%arg0: memref<128x512xbf16, #tpu.memory_space<vmem>>, %arg1: memref<8x128xbf16, #tpu.memory_space<vmem>>, %arg2: memref<2x128x128xbf16, #tpu.memory_space<vmem>>, %arg3: memref<3x128xf32, #tpu.memory_space<vmem>>, %arg4: memref<5x32x8xbf16, #tpu.memory_space<vmem>>, %arg5: memref<32x1xf32, #tpu.memory_space<vmem>>, %arg6: memref<5x64x32xbf16, #tpu.memory_space<vmem>>, %arg7: memref<64x1xf32, #tpu.memory_space<vmem>>, %arg8: memref<5x32x64xbf16, #tpu.memory_space<vmem>>, %arg9: memref<32x1xf32, #tpu.memory_space<vmem>>, %arg10: memref<5x32x32xbf16, #tpu.memory_space<vmem>>, %arg11: memref<32x1xf32, #tpu.memory_space<vmem>>, %arg12: memref<5x8x32xbf16, #tpu.memory_space<vmem>>, %arg13: memref<8x1xf32, #tpu.memory_space<vmem>>, %arg14: memref<5x8x8xbf16, #tpu.memory_space<vmem>>, %arg15: memref<8x1xf32, #tpu.memory_space<vmem>>, %arg16: memref<5x8x8xbf16, #tpu.memory_space<vmem>>, %arg17: memref<8x1xf32, #tpu.memory_space<vmem>>, %arg18: memref<3x128xf32, #tpu.memory_space<vmem>>) attributes {dimension_semantics = [], scalar_prefetch = 0 : i64, scratch_operands = 0 : i64, tpu.core_type = #tpu.core_type<tc>} {
    %0 = tpu.iota {dimensions = array<i32: 1>} : vector<1x128xi32>
    %c12_i32 = arith.constant 12 : i32
    %1 = vector.broadcast %c12_i32 : i32 to vector<1x128xi32>
    %2 = arith.cmpi slt, %0, %1 : vector<1x128xi32>
    %3 = arith.extui %2 : vector<1x128xi1> to vector<1x128xi32>
    %4 = arith.sitofp %3 : vector<1x128xi32> to vector<1x128xf32>
    %c0 = arith.constant 0 : index
    %c0_0 = arith.constant 0 : index
    %5 = vector.load %arg0[%c0, %c0_0] : memref<128x512xbf16, #tpu.memory_space<vmem>>, vector<128x512xbf16>
    %c0_1 = arith.constant 0 : index
    %c0_2 = arith.constant 0 : index
    %6 = vector.load %arg1[%c0_1, %c0_2] : memref<8x128xbf16, #tpu.memory_space<vmem>>, vector<8x128xbf16>
    %c0_3 = arith.constant 0 : index
    %c0_4 = arith.constant 0 : index
    %7 = vector.load %arg5[%c0_3, %c0_4] : memref<32x1xf32, #tpu.memory_space<vmem>>, vector<32x1xf32>
    %cst = arith.constant dense<0.000000e+00> : vector<8x512xf32>
    %8 = tpu.matmul %6, %5, %cst {dimension_numbers = #tpu.dot_dimension_numbers<[1], [0], [0], [1], [0, 0, 1, 1], [], []>} : vector<8x128xbf16>, vector<128x512xbf16>, vector<8x512xf32> -> vector<8x512xf32>
    %c0_5 = arith.constant 0 : index
    %c0_6 = arith.constant 0 : index
    %c0_7 = arith.constant 0 : index
    %9 = vector.load %arg4[%c0_5, %c0_6, %c0_7] : memref<5x32x8xbf16, #tpu.memory_space<vmem>>, vector<1x32x8xbf16>
    %10 = vector.shape_cast %9 : vector<1x32x8xbf16> to vector<32x8xbf16>
    %cst_8 = arith.constant dense<0.000000e+00> : vector<32x128xf32>
    %11 = tpu.matmul %10, %6, %cst_8 {dimension_numbers = #tpu.dot_dimension_numbers<[1], [0], [0], [1], [0, 0, 1, 1], [], []>} : vector<32x8xbf16>, vector<8x128xbf16>, vector<32x128xf32> -> vector<32x128xf32>
    %12 = vector.extract_strided_slice %8 {offsets = [0, 0], sizes = [8, 128], strides = [1, 1]} : vector<8x512xf32> to vector<8x128xf32>
    %c1 = arith.constant 1 : index
    %c0_9 = arith.constant 0 : index
    %c0_10 = arith.constant 0 : index
    %13 = vector.load %arg4[%c1, %c0_9, %c0_10] : memref<5x32x8xbf16, #tpu.memory_space<vmem>>, vector<1x32x8xbf16>
    %14 = vector.shape_cast %13 : vector<1x32x8xbf16> to vector<32x8xbf16>
    %15 = arith.truncf %12 : vector<8x128xf32> to vector<8x128xbf16>
    %cst_11 = arith.constant dense<0.000000e+00> : vector<32x128xf32>
    %16 = tpu.matmul %14, %15, %cst_11 {dimension_numbers = #tpu.dot_dimension_numbers<[1], [0], [0], [1], [0, 0, 1, 1], [], []>} : vector<32x8xbf16>, vector<8x128xbf16>, vector<32x128xf32> -> vector<32x128xf32>
    %17 = arith.addf %11, %16 : vector<32x128xf32>
    %18 = vector.extract_strided_slice %8 {offsets = [0, 128], sizes = [8, 128], strides = [1, 1]} : vector<8x512xf32> to vector<8x128xf32>
    %c2 = arith.constant 2 : index
    %c0_12 = arith.constant 0 : index
    %c0_13 = arith.constant 0 : index
    %19 = vector.load %arg4[%c2, %c0_12, %c0_13] : memref<5x32x8xbf16, #tpu.memory_space<vmem>>, vector<1x32x8xbf16>
    %20 = vector.shape_cast %19 : vector<1x32x8xbf16> to vector<32x8xbf16>
    %21 = arith.truncf %18 : vector<8x128xf32> to vector<8x128xbf16>
    %cst_14 = arith.constant dense<0.000000e+00> : vector<32x128xf32>
    %22 = tpu.matmul %20, %21, %cst_14 {dimension_numbers = #tpu.dot_dimension_numbers<[1], [0], [0], [1], [0, 0, 1, 1], [], []>} : vector<32x8xbf16>, vector<8x128xbf16>, vector<32x128xf32> -> vector<32x128xf32>
    %23 = arith.addf %17, %22 : vector<32x128xf32>
    %24 = vector.extract_strided_slice %8 {offsets = [0, 256], sizes = [8, 128], strides = [1, 1]} : vector<8x512xf32> to vector<8x128xf32>
    %25 = math.absf %24 : vector<8x128xf32>
    %c3 = arith.constant 3 : index
    %c0_15 = arith.constant 0 : index
    %c0_16 = arith.constant 0 : index
    %26 = vector.load %arg4[%c3, %c0_15, %c0_16] : memref<5x32x8xbf16, #tpu.memory_space<vmem>>, vector<1x32x8xbf16>
    %27 = vector.shape_cast %26 : vector<1x32x8xbf16> to vector<32x8xbf16>
    %28 = arith.truncf %25 : vector<8x128xf32> to vector<8x128xbf16>
    %cst_17 = arith.constant dense<0.000000e+00> : vector<32x128xf32>
    %29 = tpu.matmul %27, %28, %cst_17 {dimension_numbers = #tpu.dot_dimension_numbers<[1], [0], [0], [1], [0, 0, 1, 1], [], []>} : vector<32x8xbf16>, vector<8x128xbf16>, vector<32x128xf32> -> vector<32x128xf32>
    %30 = arith.addf %23, %29 : vector<32x128xf32>
    %31 = vector.extract_strided_slice %8 {offsets = [0, 384], sizes = [8, 128], strides = [1, 1]} : vector<8x512xf32> to vector<8x128xf32>
    %32 = math.absf %31 : vector<8x128xf32>
    %c4 = arith.constant 4 : index
    %c0_18 = arith.constant 0 : index
    %c0_19 = arith.constant 0 : index
    %33 = vector.load %arg4[%c4, %c0_18, %c0_19] : memref<5x32x8xbf16, #tpu.memory_space<vmem>>, vector<1x32x8xbf16>
    %34 = vector.shape_cast %33 : vector<1x32x8xbf16> to vector<32x8xbf16>
    %35 = arith.truncf %32 : vector<8x128xf32> to vector<8x128xbf16>
    %cst_20 = arith.constant dense<0.000000e+00> : vector<32x128xf32>
    %36 = tpu.matmul %34, %35, %cst_20 {dimension_numbers = #tpu.dot_dimension_numbers<[1], [0], [0], [1], [0, 0, 1, 1], [], []>} : vector<32x8xbf16>, vector<8x128xbf16>, vector<32x128xf32> -> vector<32x128xf32>
    %37 = arith.addf %30, %36 : vector<32x128xf32>
    %38 = vector.broadcast %7 : vector<32x1xf32> to vector<32x128xf32>
    %39 = arith.addf %37, %38 : vector<32x128xf32>
    %cst_21 = arith.constant 0.000000e+00 : f32
    %40 = vector.broadcast %cst_21 : f32 to vector<32x128xf32>
    %41 = arith.cmpf ogt, %39, %40 : vector<32x128xf32>
    %cst_22 = arith.constant 0.000000e+00 : f32
    %42 = vector.broadcast %cst_22 : f32 to vector<32x128xf32>
    %43 = arith.mulf %42, %39 : vector<32x128xf32>
    %44 = arith.select %41, %39, %43 : vector<32x128xi1>, vector<32x128xf32>
    %45 = vector.broadcast %4 : vector<1x128xf32> to vector<32x128xf32>
    %46 = arith.mulf %44, %45 : vector<32x128xf32>
    %cst_23 = arith.constant dense<0.000000e+00> : vector<32xf32>
    %47 = vector.multi_reduction <add>, %46, %cst_23 [1] : vector<32x128xf32> to vector<32xf32>
    %48 = vector.shape_cast %47 : vector<32xf32> to vector<32x1xf32>
    %cst_24 = arith.constant 0.0833333358 : f32
    %49 = vector.broadcast %cst_24 : f32 to vector<32x1xf32>
    %50 = arith.mulf %48, %49 : vector<32x1xf32>
    %51 = vector.broadcast %50 : vector<32x1xf32> to vector<32x128xf32>
    %52 = arith.subf %44, %51 : vector<32x128xf32>
    %53 = vector.broadcast %4 : vector<1x128xf32> to vector<32x128xf32>
    %54 = arith.mulf %52, %53 : vector<32x128xf32>
    %55 = arith.mulf %54, %54 : vector<32x128xf32>
    %cst_25 = arith.constant dense<0.000000e+00> : vector<32xf32>
    %56 = vector.multi_reduction <add>, %55, %cst_25 [1] : vector<32x128xf32> to vector<32xf32>
    %57 = vector.shape_cast %56 : vector<32xf32> to vector<32x1xf32>
    %cst_26 = arith.constant 0.0833333358 : f32
    %58 = vector.broadcast %cst_26 : f32 to vector<32x1xf32>
    %59 = arith.mulf %57, %58 : vector<32x1xf32>
    %cst_27 = arith.constant 9.99999974E-6 : f32
    %60 = vector.broadcast %cst_27 : f32 to vector<32x1xf32>
    %61 = arith.addf %59, %60 : vector<32x1xf32>
    %62 = math.rsqrt %61 : vector<32x1xf32>
    %63 = vector.broadcast %62 : vector<32x1xf32> to vector<32x128xf32>
    %64 = arith.mulf %54, %63 : vector<32x128xf32>
    %65 = arith.truncf %64 : vector<32x128xf32> to vector<32x128xbf16>
    %c0_28 = arith.constant 0 : index
    %c0_29 = arith.constant 0 : index
    %66 = vector.load %arg7[%c0_28, %c0_29] : memref<64x1xf32, #tpu.memory_space<vmem>>, vector<64x1xf32>
    %cst_30 = arith.constant dense<0.000000e+00> : vector<32x512xf32>
    %67 = tpu.matmul %65, %5, %cst_30 {dimension_numbers = #tpu.dot_dimension_numbers<[1], [0], [0], [1], [0, 0, 1, 1], [], []>} : vector<32x128xbf16>, vector<128x512xbf16>, vector<32x512xf32> -> vector<32x512xf32>
    %c0_31 = arith.constant 0 : index
    %c0_32 = arith.constant 0 : index
    %c0_33 = arith.constant 0 : index
    %68 = vector.load %arg6[%c0_31, %c0_32, %c0_33] : memref<5x64x32xbf16, #tpu.memory_space<vmem>>, vector<1x64x32xbf16>
    %69 = vector.shape_cast %68 : vector<1x64x32xbf16> to vector<64x32xbf16>
    %cst_34 = arith.constant dense<0.000000e+00> : vector<64x128xf32>
    %70 = tpu.matmul %69, %65, %cst_34 {dimension_numbers = #tpu.dot_dimension_numbers<[1], [0], [0], [1], [0, 0, 1, 1], [], []>} : vector<64x32xbf16>, vector<32x128xbf16>, vector<64x128xf32> -> vector<64x128xf32>
    %71 = vector.extract_strided_slice %67 {offsets = [0, 0], sizes = [32, 128], strides = [1, 1]} : vector<32x512xf32> to vector<32x128xf32>
    %c1_35 = arith.constant 1 : index
    %c0_36 = arith.constant 0 : index
    %c0_37 = arith.constant 0 : index
    %72 = vector.load %arg6[%c1_35, %c0_36, %c0_37] : memref<5x64x32xbf16, #tpu.memory_space<vmem>>, vector<1x64x32xbf16>
    %73 = vector.shape_cast %72 : vector<1x64x32xbf16> to vector<64x32xbf16>
    %74 = arith.truncf %71 : vector<32x128xf32> to vector<32x128xbf16>
    %cst_38 = arith.constant dense<0.000000e+00> : vector<64x128xf32>
    %75 = tpu.matmul %73, %74, %cst_38 {dimension_numbers = #tpu.dot_dimension_numbers<[1], [0], [0], [1], [0, 0, 1, 1], [], []>} : vector<64x32xbf16>, vector<32x128xbf16>, vector<64x128xf32> -> vector<64x128xf32>
    %76 = arith.addf %70, %75 : vector<64x128xf32>
    %77 = vector.extract_strided_slice %67 {offsets = [0, 128], sizes = [32, 128], strides = [1, 1]} : vector<32x512xf32> to vector<32x128xf32>
    %c2_39 = arith.constant 2 : index
    %c0_40 = arith.constant 0 : index
    %c0_41 = arith.constant 0 : index
    %78 = vector.load %arg6[%c2_39, %c0_40, %c0_41] : memref<5x64x32xbf16, #tpu.memory_space<vmem>>, vector<1x64x32xbf16>
    %79 = vector.shape_cast %78 : vector<1x64x32xbf16> to vector<64x32xbf16>
    %80 = arith.truncf %77 : vector<32x128xf32> to vector<32x128xbf16>
    %cst_42 = arith.constant dense<0.000000e+00> : vector<64x128xf32>
    %81 = tpu.matmul %79, %80, %cst_42 {dimension_numbers = #tpu.dot_dimension_numbers<[1], [0], [0], [1], [0, 0, 1, 1], [], []>} : vector<64x32xbf16>, vector<32x128xbf16>, vector<64x128xf32> -> vector<64x128xf32>
    %82 = arith.addf %76, %81 : vector<64x128xf32>
    %83 = vector.extract_strided_slice %67 {offsets = [0, 256], sizes = [32, 128], strides = [1, 1]} : vector<32x512xf32> to vector<32x128xf32>
    %84 = math.absf %83 : vector<32x128xf32>
    %c3_43 = arith.constant 3 : index
    %c0_44 = arith.constant 0 : index
    %c0_45 = arith.constant 0 : index
    %85 = vector.load %arg6[%c3_43, %c0_44, %c0_45] : memref<5x64x32xbf16, #tpu.memory_space<vmem>>, vector<1x64x32xbf16>
    %86 = vector.shape_cast %85 : vector<1x64x32xbf16> to vector<64x32xbf16>
    %87 = arith.truncf %84 : vector<32x128xf32> to vector<32x128xbf16>
    %cst_46 = arith.constant dense<0.000000e+00> : vector<64x128xf32>
    %88 = tpu.matmul %86, %87, %cst_46 {dimension_numbers = #tpu.dot_dimension_numbers<[1], [0], [0], [1], [0, 0, 1, 1], [], []>} : vector<64x32xbf16>, vector<32x128xbf16>, vector<64x128xf32> -> vector<64x128xf32>
    %89 = arith.addf %82, %88 : vector<64x128xf32>
    %90 = vector.extract_strided_slice %67 {offsets = [0, 384], sizes = [32, 128], strides = [1, 1]} : vector<32x512xf32> to vector<32x128xf32>
    %91 = math.absf %90 : vector<32x128xf32>
    %c4_47 = arith.constant 4 : index
    %c0_48 = arith.constant 0 : index
    %c0_49 = arith.constant 0 : index
    %92 = vector.load %arg6[%c4_47, %c0_48, %c0_49] : memref<5x64x32xbf16, #tpu.memory_space<vmem>>, vector<1x64x32xbf16>
    %93 = vector.shape_cast %92 : vector<1x64x32xbf16> to vector<64x32xbf16>
    %94 = arith.truncf %91 : vector<32x128xf32> to vector<32x128xbf16>
    %cst_50 = arith.constant dense<0.000000e+00> : vector<64x128xf32>
    %95 = tpu.matmul %93, %94, %cst_50 {dimension_numbers = #tpu.dot_dimension_numbers<[1], [0], [0], [1], [0, 0, 1, 1], [], []>} : vector<64x32xbf16>, vector<32x128xbf16>, vector<64x128xf32> -> vector<64x128xf32>
    %96 = arith.addf %89, %95 : vector<64x128xf32>
    %97 = vector.broadcast %66 : vector<64x1xf32> to vector<64x128xf32>
    %98 = arith.addf %96, %97 : vector<64x128xf32>
    %cst_51 = arith.constant 0.000000e+00 : f32
    %99 = vector.broadcast %cst_51 : f32 to vector<64x128xf32>
    %100 = arith.cmpf ogt, %98, %99 : vector<64x128xf32>
    %cst_52 = arith.constant 0.000000e+00 : f32
    %101 = vector.broadcast %cst_52 : f32 to vector<64x128xf32>
    %102 = arith.mulf %101, %98 : vector<64x128xf32>
    %103 = arith.select %100, %98, %102 : vector<64x128xi1>, vector<64x128xf32>
    %104 = vector.broadcast %4 : vector<1x128xf32> to vector<64x128xf32>
    %105 = arith.mulf %103, %104 : vector<64x128xf32>
    %cst_53 = arith.constant dense<0.000000e+00> : vector<64xf32>
    %106 = vector.multi_reduction <add>, %105, %cst_53 [1] : vector<64x128xf32> to vector<64xf32>
    %107 = vector.shape_cast %106 : vector<64xf32> to vector<64x1xf32>
    %cst_54 = arith.constant 0.0833333358 : f32
    %108 = vector.broadcast %cst_54 : f32 to vector<64x1xf32>
    %109 = arith.mulf %107, %108 : vector<64x1xf32>
    %110 = vector.broadcast %109 : vector<64x1xf32> to vector<64x128xf32>
    %111 = arith.subf %103, %110 : vector<64x128xf32>
    %112 = vector.broadcast %4 : vector<1x128xf32> to vector<64x128xf32>
    %113 = arith.mulf %111, %112 : vector<64x128xf32>
    %114 = arith.mulf %113, %113 : vector<64x128xf32>
    %cst_55 = arith.constant dense<0.000000e+00> : vector<64xf32>
    %115 = vector.multi_reduction <add>, %114, %cst_55 [1] : vector<64x128xf32> to vector<64xf32>
    %116 = vector.shape_cast %115 : vector<64xf32> to vector<64x1xf32>
    %cst_56 = arith.constant 0.0833333358 : f32
    %117 = vector.broadcast %cst_56 : f32 to vector<64x1xf32>
    %118 = arith.mulf %116, %117 : vector<64x1xf32>
    %cst_57 = arith.constant 9.99999974E-6 : f32
    %119 = vector.broadcast %cst_57 : f32 to vector<64x1xf32>
    %120 = arith.addf %118, %119 : vector<64x1xf32>
    %121 = math.rsqrt %120 : vector<64x1xf32>
    %122 = vector.broadcast %121 : vector<64x1xf32> to vector<64x128xf32>
    %123 = arith.mulf %113, %122 : vector<64x128xf32>
    %124 = arith.truncf %123 : vector<64x128xf32> to vector<64x128xbf16>
    %c0_58 = arith.constant 0 : index
    %c0_59 = arith.constant 0 : index
    %125 = vector.load %arg9[%c0_58, %c0_59] : memref<32x1xf32, #tpu.memory_space<vmem>>, vector<32x1xf32>
    %cst_60 = arith.constant dense<0.000000e+00> : vector<64x512xf32>
    %126 = tpu.matmul %124, %5, %cst_60 {dimension_numbers = #tpu.dot_dimension_numbers<[1], [0], [0], [1], [0, 0, 1, 1], [], []>} : vector<64x128xbf16>, vector<128x512xbf16>, vector<64x512xf32> -> vector<64x512xf32>
    %c0_61 = arith.constant 0 : index
    %c0_62 = arith.constant 0 : index
    %c0_63 = arith.constant 0 : index
    %127 = vector.load %arg8[%c0_61, %c0_62, %c0_63] : memref<5x32x64xbf16, #tpu.memory_space<vmem>>, vector<1x32x64xbf16>
    %128 = vector.shape_cast %127 : vector<1x32x64xbf16> to vector<32x64xbf16>
    %cst_64 = arith.constant dense<0.000000e+00> : vector<32x128xf32>
    %129 = tpu.matmul %128, %124, %cst_64 {dimension_numbers = #tpu.dot_dimension_numbers<[1], [0], [0], [1], [0, 0, 1, 1], [], []>} : vector<32x64xbf16>, vector<64x128xbf16>, vector<32x128xf32> -> vector<32x128xf32>
    %130 = vector.extract_strided_slice %126 {offsets = [0, 0], sizes = [64, 128], strides = [1, 1]} : vector<64x512xf32> to vector<64x128xf32>
    %c1_65 = arith.constant 1 : index
    %c0_66 = arith.constant 0 : index
    %c0_67 = arith.constant 0 : index
    %131 = vector.load %arg8[%c1_65, %c0_66, %c0_67] : memref<5x32x64xbf16, #tpu.memory_space<vmem>>, vector<1x32x64xbf16>
    %132 = vector.shape_cast %131 : vector<1x32x64xbf16> to vector<32x64xbf16>
    %133 = arith.truncf %130 : vector<64x128xf32> to vector<64x128xbf16>
    %cst_68 = arith.constant dense<0.000000e+00> : vector<32x128xf32>
    %134 = tpu.matmul %132, %133, %cst_68 {dimension_numbers = #tpu.dot_dimension_numbers<[1], [0], [0], [1], [0, 0, 1, 1], [], []>} : vector<32x64xbf16>, vector<64x128xbf16>, vector<32x128xf32> -> vector<32x128xf32>
    %135 = arith.addf %129, %134 : vector<32x128xf32>
    %136 = vector.extract_strided_slice %126 {offsets = [0, 128], sizes = [64, 128], strides = [1, 1]} : vector<64x512xf32> to vector<64x128xf32>
    %c2_69 = arith.constant 2 : index
    %c0_70 = arith.constant 0 : index
    %c0_71 = arith.constant 0 : index
    %137 = vector.load %arg8[%c2_69, %c0_70, %c0_71] : memref<5x32x64xbf16, #tpu.memory_space<vmem>>, vector<1x32x64xbf16>
    %138 = vector.shape_cast %137 : vector<1x32x64xbf16> to vector<32x64xbf16>
    %139 = arith.truncf %136 : vector<64x128xf32> to vector<64x128xbf16>
    %cst_72 = arith.constant dense<0.000000e+00> : vector<32x128xf32>
    %140 = tpu.matmul %138, %139, %cst_72 {dimension_numbers = #tpu.dot_dimension_numbers<[1], [0], [0], [1], [0, 0, 1, 1], [], []>} : vector<32x64xbf16>, vector<64x128xbf16>, vector<32x128xf32> -> vector<32x128xf32>
    %141 = arith.addf %135, %140 : vector<32x128xf32>
    %142 = vector.extract_strided_slice %126 {offsets = [0, 256], sizes = [64, 128], strides = [1, 1]} : vector<64x512xf32> to vector<64x128xf32>
    %143 = math.absf %142 : vector<64x128xf32>
    %c3_73 = arith.constant 3 : index
    %c0_74 = arith.constant 0 : index
    %c0_75 = arith.constant 0 : index
    %144 = vector.load %arg8[%c3_73, %c0_74, %c0_75] : memref<5x32x64xbf16, #tpu.memory_space<vmem>>, vector<1x32x64xbf16>
    %145 = vector.shape_cast %144 : vector<1x32x64xbf16> to vector<32x64xbf16>
    %146 = arith.truncf %143 : vector<64x128xf32> to vector<64x128xbf16>
    %cst_76 = arith.constant dense<0.000000e+00> : vector<32x128xf32>
    %147 = tpu.matmul %145, %146, %cst_76 {dimension_numbers = #tpu.dot_dimension_numbers<[1], [0], [0], [1], [0, 0, 1, 1], [], []>} : vector<32x64xbf16>, vector<64x128xbf16>, vector<32x128xf32> -> vector<32x128xf32>
    %148 = arith.addf %141, %147 : vector<32x128xf32>
    %149 = vector.extract_strided_slice %126 {offsets = [0, 384], sizes = [64, 128], strides = [1, 1]} : vector<64x512xf32> to vector<64x128xf32>
    %150 = math.absf %149 : vector<64x128xf32>
    %c4_77 = arith.constant 4 : index
    %c0_78 = arith.constant 0 : index
    %c0_79 = arith.constant 0 : index
    %151 = vector.load %arg8[%c4_77, %c0_78, %c0_79] : memref<5x32x64xbf16, #tpu.memory_space<vmem>>, vector<1x32x64xbf16>
    %152 = vector.shape_cast %151 : vector<1x32x64xbf16> to vector<32x64xbf16>
    %153 = arith.truncf %150 : vector<64x128xf32> to vector<64x128xbf16>
    %cst_80 = arith.constant dense<0.000000e+00> : vector<32x128xf32>
    %154 = tpu.matmul %152, %153, %cst_80 {dimension_numbers = #tpu.dot_dimension_numbers<[1], [0], [0], [1], [0, 0, 1, 1], [], []>} : vector<32x64xbf16>, vector<64x128xbf16>, vector<32x128xf32> -> vector<32x128xf32>
    %155 = arith.addf %148, %154 : vector<32x128xf32>
    %156 = vector.broadcast %125 : vector<32x1xf32> to vector<32x128xf32>
    %157 = arith.addf %155, %156 : vector<32x128xf32>
    %158 = arith.truncf %157 : vector<32x128xf32> to vector<32x128xbf16>
    %c0_81 = arith.constant 0 : index
    %c0_82 = arith.constant 0 : index
    %159 = vector.load %arg11[%c0_81, %c0_82] : memref<32x1xf32, #tpu.memory_space<vmem>>, vector<32x1xf32>
    %cst_83 = arith.constant dense<0.000000e+00> : vector<32x512xf32>
    %160 = tpu.matmul %158, %5, %cst_83 {dimension_numbers = #tpu.dot_dimension_numbers<[1], [0], [0], [1], [0, 0, 1, 1], [], []>} : vector<32x128xbf16>, vector<128x512xbf16>, vector<32x512xf32> -> vector<32x512xf32>
    %c0_84 = arith.constant 0 : index
    %c0_85 = arith.constant 0 : index
    %c0_86 = arith.constant 0 : index
    %161 = vector.load %arg10[%c0_84, %c0_85, %c0_86] : memref<5x32x32xbf16, #tpu.memory_space<vmem>>, vector<1x32x32xbf16>
    %162 = vector.shape_cast %161 : vector<1x32x32xbf16> to vector<32x32xbf16>
    %cst_87 = arith.constant dense<0.000000e+00> : vector<32x128xf32>
    %163 = tpu.matmul %162, %158, %cst_87 {dimension_numbers = #tpu.dot_dimension_numbers<[1], [0], [0], [1], [0, 0, 1, 1], [], []>} : vector<32x32xbf16>, vector<32x128xbf16>, vector<32x128xf32> -> vector<32x128xf32>
    %164 = vector.extract_strided_slice %160 {offsets = [0, 0], sizes = [32, 128], strides = [1, 1]} : vector<32x512xf32> to vector<32x128xf32>
    %c1_88 = arith.constant 1 : index
    %c0_89 = arith.constant 0 : index
    %c0_90 = arith.constant 0 : index
    %165 = vector.load %arg10[%c1_88, %c0_89, %c0_90] : memref<5x32x32xbf16, #tpu.memory_space<vmem>>, vector<1x32x32xbf16>
    %166 = vector.shape_cast %165 : vector<1x32x32xbf16> to vector<32x32xbf16>
    %167 = arith.truncf %164 : vector<32x128xf32> to vector<32x128xbf16>
    %cst_91 = arith.constant dense<0.000000e+00> : vector<32x128xf32>
    %168 = tpu.matmul %166, %167, %cst_91 {dimension_numbers = #tpu.dot_dimension_numbers<[1], [0], [0], [1], [0, 0, 1, 1], [], []>} : vector<32x32xbf16>, vector<32x128xbf16>, vector<32x128xf32> -> vector<32x128xf32>
    %169 = arith.addf %163, %168 : vector<32x128xf32>
    %170 = vector.extract_strided_slice %160 {offsets = [0, 128], sizes = [32, 128], strides = [1, 1]} : vector<32x512xf32> to vector<32x128xf32>
    %c2_92 = arith.constant 2 : index
    %c0_93 = arith.constant 0 : index
    %c0_94 = arith.constant 0 : index
    %171 = vector.load %arg10[%c2_92, %c0_93, %c0_94] : memref<5x32x32xbf16, #tpu.memory_space<vmem>>, vector<1x32x32xbf16>
    %172 = vector.shape_cast %171 : vector<1x32x32xbf16> to vector<32x32xbf16>
    %173 = arith.truncf %170 : vector<32x128xf32> to vector<32x128xbf16>
    %cst_95 = arith.constant dense<0.000000e+00> : vector<32x128xf32>
    %174 = tpu.matmul %172, %173, %cst_95 {dimension_numbers = #tpu.dot_dimension_numbers<[1], [0], [0], [1], [0, 0, 1, 1], [], []>} : vector<32x32xbf16>, vector<32x128xbf16>, vector<32x128xf32> -> vector<32x128xf32>
    %175 = arith.addf %169, %174 : vector<32x128xf32>
    %176 = vector.extract_strided_slice %160 {offsets = [0, 256], sizes = [32, 128], strides = [1, 1]} : vector<32x512xf32> to vector<32x128xf32>
    %177 = math.absf %176 : vector<32x128xf32>
    %c3_96 = arith.constant 3 : index
    %c0_97 = arith.constant 0 : index
    %c0_98 = arith.constant 0 : index
    %178 = vector.load %arg10[%c3_96, %c0_97, %c0_98] : memref<5x32x32xbf16, #tpu.memory_space<vmem>>, vector<1x32x32xbf16>
    %179 = vector.shape_cast %178 : vector<1x32x32xbf16> to vector<32x32xbf16>
    %180 = arith.truncf %177 : vector<32x128xf32> to vector<32x128xbf16>
    %cst_99 = arith.constant dense<0.000000e+00> : vector<32x128xf32>
    %181 = tpu.matmul %179, %180, %cst_99 {dimension_numbers = #tpu.dot_dimension_numbers<[1], [0], [0], [1], [0, 0, 1, 1], [], []>} : vector<32x32xbf16>, vector<32x128xbf16>, vector<32x128xf32> -> vector<32x128xf32>
    %182 = arith.addf %175, %181 : vector<32x128xf32>
    %183 = vector.extract_strided_slice %160 {offsets = [0, 384], sizes = [32, 128], strides = [1, 1]} : vector<32x512xf32> to vector<32x128xf32>
    %184 = math.absf %183 : vector<32x128xf32>
    %c4_100 = arith.constant 4 : index
    %c0_101 = arith.constant 0 : index
    %c0_102 = arith.constant 0 : index
    %185 = vector.load %arg10[%c4_100, %c0_101, %c0_102] : memref<5x32x32xbf16, #tpu.memory_space<vmem>>, vector<1x32x32xbf16>
    %186 = vector.shape_cast %185 : vector<1x32x32xbf16> to vector<32x32xbf16>
    %187 = arith.truncf %184 : vector<32x128xf32> to vector<32x128xbf16>
    %cst_103 = arith.constant dense<0.000000e+00> : vector<32x128xf32>
    %188 = tpu.matmul %186, %187, %cst_103 {dimension_numbers = #tpu.dot_dimension_numbers<[1], [0], [0], [1], [0, 0, 1, 1], [], []>} : vector<32x32xbf16>, vector<32x128xbf16>, vector<32x128xf32> -> vector<32x128xf32>
    %189 = arith.addf %182, %188 : vector<32x128xf32>
    %190 = vector.broadcast %159 : vector<32x1xf32> to vector<32x128xf32>
    %191 = arith.addf %189, %190 : vector<32x128xf32>
    %cst_104 = arith.constant 0.000000e+00 : f32
    %192 = vector.broadcast %cst_104 : f32 to vector<32x128xf32>
    %193 = arith.cmpf ogt, %191, %192 : vector<32x128xf32>
    %cst_105 = arith.constant 0.000000e+00 : f32
    %194 = vector.broadcast %cst_105 : f32 to vector<32x128xf32>
    %195 = arith.mulf %194, %191 : vector<32x128xf32>
    %196 = arith.select %193, %191, %195 : vector<32x128xi1>, vector<32x128xf32>
    %197 = vector.broadcast %4 : vector<1x128xf32> to vector<32x128xf32>
    %198 = arith.mulf %196, %197 : vector<32x128xf32>
    %cst_106 = arith.constant dense<0.000000e+00> : vector<32xf32>
    %199 = vector.multi_reduction <add>, %198, %cst_106 [1] : vector<32x128xf32> to vector<32xf32>
    %200 = vector.shape_cast %199 : vector<32xf32> to vector<32x1xf32>
    %cst_107 = arith.constant 0.0833333358 : f32
    %201 = vector.broadcast %cst_107 : f32 to vector<32x1xf32>
    %202 = arith.mulf %200, %201 : vector<32x1xf32>
    %203 = vector.broadcast %202 : vector<32x1xf32> to vector<32x128xf32>
    %204 = arith.subf %196, %203 : vector<32x128xf32>
    %205 = vector.broadcast %4 : vector<1x128xf32> to vector<32x128xf32>
    %206 = arith.mulf %204, %205 : vector<32x128xf32>
    %207 = arith.mulf %206, %206 : vector<32x128xf32>
    %cst_108 = arith.constant dense<0.000000e+00> : vector<32xf32>
    %208 = vector.multi_reduction <add>, %207, %cst_108 [1] : vector<32x128xf32> to vector<32xf32>
    %209 = vector.shape_cast %208 : vector<32xf32> to vector<32x1xf32>
    %cst_109 = arith.constant 0.0833333358 : f32
    %210 = vector.broadcast %cst_109 : f32 to vector<32x1xf32>
    %211 = arith.mulf %209, %210 : vector<32x1xf32>
    %cst_110 = arith.constant 9.99999974E-6 : f32
    %212 = vector.broadcast %cst_110 : f32 to vector<32x1xf32>
    %213 = arith.addf %211, %212 : vector<32x1xf32>
    %214 = math.rsqrt %213 : vector<32x1xf32>
    %215 = vector.broadcast %214 : vector<32x1xf32> to vector<32x128xf32>
    %216 = arith.mulf %206, %215 : vector<32x128xf32>
    %217 = arith.truncf %216 : vector<32x128xf32> to vector<32x128xbf16>
    %c0_111 = arith.constant 0 : index
    %c0_112 = arith.constant 0 : index
    %218 = vector.load %arg13[%c0_111, %c0_112] : memref<8x1xf32, #tpu.memory_space<vmem>>, vector<8x1xf32>
    %cst_113 = arith.constant dense<0.000000e+00> : vector<32x512xf32>
    %219 = tpu.matmul %217, %5, %cst_113 {dimension_numbers = #tpu.dot_dimension_numbers<[1], [0], [0], [1], [0, 0, 1, 1], [], []>} : vector<32x128xbf16>, vector<128x512xbf16>, vector<32x512xf32> -> vector<32x512xf32>
    %c0_114 = arith.constant 0 : index
    %c0_115 = arith.constant 0 : index
    %c0_116 = arith.constant 0 : index
    %220 = vector.load %arg12[%c0_114, %c0_115, %c0_116] : memref<5x8x32xbf16, #tpu.memory_space<vmem>>, vector<1x8x32xbf16>
    %221 = vector.shape_cast %220 : vector<1x8x32xbf16> to vector<8x32xbf16>
    %cst_117 = arith.constant dense<0.000000e+00> : vector<8x128xf32>
    %222 = tpu.matmul %221, %217, %cst_117 {dimension_numbers = #tpu.dot_dimension_numbers<[1], [0], [0], [1], [0, 0, 1, 1], [], []>} : vector<8x32xbf16>, vector<32x128xbf16>, vector<8x128xf32> -> vector<8x128xf32>
    %223 = vector.extract_strided_slice %219 {offsets = [0, 0], sizes = [32, 128], strides = [1, 1]} : vector<32x512xf32> to vector<32x128xf32>
    %c1_118 = arith.constant 1 : index
    %c0_119 = arith.constant 0 : index
    %c0_120 = arith.constant 0 : index
    %224 = vector.load %arg12[%c1_118, %c0_119, %c0_120] : memref<5x8x32xbf16, #tpu.memory_space<vmem>>, vector<1x8x32xbf16>
    %225 = vector.shape_cast %224 : vector<1x8x32xbf16> to vector<8x32xbf16>
    %226 = arith.truncf %223 : vector<32x128xf32> to vector<32x128xbf16>
    %cst_121 = arith.constant dense<0.000000e+00> : vector<8x128xf32>
    %227 = tpu.matmul %225, %226, %cst_121 {dimension_numbers = #tpu.dot_dimension_numbers<[1], [0], [0], [1], [0, 0, 1, 1], [], []>} : vector<8x32xbf16>, vector<32x128xbf16>, vector<8x128xf32> -> vector<8x128xf32>
    %228 = arith.addf %222, %227 : vector<8x128xf32>
    %229 = vector.extract_strided_slice %219 {offsets = [0, 128], sizes = [32, 128], strides = [1, 1]} : vector<32x512xf32> to vector<32x128xf32>
    %c2_122 = arith.constant 2 : index
    %c0_123 = arith.constant 0 : index
    %c0_124 = arith.constant 0 : index
    %230 = vector.load %arg12[%c2_122, %c0_123, %c0_124] : memref<5x8x32xbf16, #tpu.memory_space<vmem>>, vector<1x8x32xbf16>
    %231 = vector.shape_cast %230 : vector<1x8x32xbf16> to vector<8x32xbf16>
    %232 = arith.truncf %229 : vector<32x128xf32> to vector<32x128xbf16>
    %cst_125 = arith.constant dense<0.000000e+00> : vector<8x128xf32>
    %233 = tpu.matmul %231, %232, %cst_125 {dimension_numbers = #tpu.dot_dimension_numbers<[1], [0], [0], [1], [0, 0, 1, 1], [], []>} : vector<8x32xbf16>, vector<32x128xbf16>, vector<8x128xf32> -> vector<8x128xf32>
    %234 = arith.addf %228, %233 : vector<8x128xf32>
    %235 = vector.extract_strided_slice %219 {offsets = [0, 256], sizes = [32, 128], strides = [1, 1]} : vector<32x512xf32> to vector<32x128xf32>
    %236 = math.absf %235 : vector<32x128xf32>
    %c3_126 = arith.constant 3 : index
    %c0_127 = arith.constant 0 : index
    %c0_128 = arith.constant 0 : index
    %237 = vector.load %arg12[%c3_126, %c0_127, %c0_128] : memref<5x8x32xbf16, #tpu.memory_space<vmem>>, vector<1x8x32xbf16>
    %238 = vector.shape_cast %237 : vector<1x8x32xbf16> to vector<8x32xbf16>
    %239 = arith.truncf %236 : vector<32x128xf32> to vector<32x128xbf16>
    %cst_129 = arith.constant dense<0.000000e+00> : vector<8x128xf32>
    %240 = tpu.matmul %238, %239, %cst_129 {dimension_numbers = #tpu.dot_dimension_numbers<[1], [0], [0], [1], [0, 0, 1, 1], [], []>} : vector<8x32xbf16>, vector<32x128xbf16>, vector<8x128xf32> -> vector<8x128xf32>
    %241 = arith.addf %234, %240 : vector<8x128xf32>
    %242 = vector.extract_strided_slice %219 {offsets = [0, 384], sizes = [32, 128], strides = [1, 1]} : vector<32x512xf32> to vector<32x128xf32>
    %243 = math.absf %242 : vector<32x128xf32>
    %c4_130 = arith.constant 4 : index
    %c0_131 = arith.constant 0 : index
    %c0_132 = arith.constant 0 : index
    %244 = vector.load %arg12[%c4_130, %c0_131, %c0_132] : memref<5x8x32xbf16, #tpu.memory_space<vmem>>, vector<1x8x32xbf16>
    %245 = vector.shape_cast %244 : vector<1x8x32xbf16> to vector<8x32xbf16>
    %246 = arith.truncf %243 : vector<32x128xf32> to vector<32x128xbf16>
    %cst_133 = arith.constant dense<0.000000e+00> : vector<8x128xf32>
    %247 = tpu.matmul %245, %246, %cst_133 {dimension_numbers = #tpu.dot_dimension_numbers<[1], [0], [0], [1], [0, 0, 1, 1], [], []>} : vector<8x32xbf16>, vector<32x128xbf16>, vector<8x128xf32> -> vector<8x128xf32>
    %248 = arith.addf %241, %247 : vector<8x128xf32>
    %249 = vector.broadcast %218 : vector<8x1xf32> to vector<8x128xf32>
    %250 = arith.addf %248, %249 : vector<8x128xf32>
    %251 = arith.truncf %250 : vector<8x128xf32> to vector<8x128xbf16>
    %c0_134 = arith.constant 0 : index
    %c0_135 = arith.constant 0 : index
    %252 = vector.load %arg15[%c0_134, %c0_135] : memref<8x1xf32, #tpu.memory_space<vmem>>, vector<8x1xf32>
    %cst_136 = arith.constant dense<0.000000e+00> : vector<8x512xf32>
    %253 = tpu.matmul %251, %5, %cst_136 {dimension_numbers = #tpu.dot_dimension_numbers<[1], [0], [0], [1], [0, 0, 1, 1], [], []>} : vector<8x128xbf16>, vector<128x512xbf16>, vector<8x512xf32> -> vector<8x512xf32>
    %c0_137 = arith.constant 0 : index
    %c0_138 = arith.constant 0 : index
    %c0_139 = arith.constant 0 : index
    %254 = vector.load %arg14[%c0_137, %c0_138, %c0_139] : memref<5x8x8xbf16, #tpu.memory_space<vmem>>, vector<1x8x8xbf16>
    %255 = vector.shape_cast %254 : vector<1x8x8xbf16> to vector<8x8xbf16>
    %cst_140 = arith.constant dense<0.000000e+00> : vector<8x128xf32>
    %256 = tpu.matmul %255, %251, %cst_140 {dimension_numbers = #tpu.dot_dimension_numbers<[1], [0], [0], [1], [0, 0, 1, 1], [], []>} : vector<8x8xbf16>, vector<8x128xbf16>, vector<8x128xf32> -> vector<8x128xf32>
    %257 = vector.extract_strided_slice %253 {offsets = [0, 0], sizes = [8, 128], strides = [1, 1]} : vector<8x512xf32> to vector<8x128xf32>
    %c1_141 = arith.constant 1 : index
    %c0_142 = arith.constant 0 : index
    %c0_143 = arith.constant 0 : index
    %258 = vector.load %arg14[%c1_141, %c0_142, %c0_143] : memref<5x8x8xbf16, #tpu.memory_space<vmem>>, vector<1x8x8xbf16>
    %259 = vector.shape_cast %258 : vector<1x8x8xbf16> to vector<8x8xbf16>
    %260 = arith.truncf %257 : vector<8x128xf32> to vector<8x128xbf16>
    %cst_144 = arith.constant dense<0.000000e+00> : vector<8x128xf32>
    %261 = tpu.matmul %259, %260, %cst_144 {dimension_numbers = #tpu.dot_dimension_numbers<[1], [0], [0], [1], [0, 0, 1, 1], [], []>} : vector<8x8xbf16>, vector<8x128xbf16>, vector<8x128xf32> -> vector<8x128xf32>
    %262 = arith.addf %256, %261 : vector<8x128xf32>
    %263 = vector.extract_strided_slice %253 {offsets = [0, 128], sizes = [8, 128], strides = [1, 1]} : vector<8x512xf32> to vector<8x128xf32>
    %c2_145 = arith.constant 2 : index
    %c0_146 = arith.constant 0 : index
    %c0_147 = arith.constant 0 : index
    %264 = vector.load %arg14[%c2_145, %c0_146, %c0_147] : memref<5x8x8xbf16, #tpu.memory_space<vmem>>, vector<1x8x8xbf16>
    %265 = vector.shape_cast %264 : vector<1x8x8xbf16> to vector<8x8xbf16>
    %266 = arith.truncf %263 : vector<8x128xf32> to vector<8x128xbf16>
    %cst_148 = arith.constant dense<0.000000e+00> : vector<8x128xf32>
    %267 = tpu.matmul %265, %266, %cst_148 {dimension_numbers = #tpu.dot_dimension_numbers<[1], [0], [0], [1], [0, 0, 1, 1], [], []>} : vector<8x8xbf16>, vector<8x128xbf16>, vector<8x128xf32> -> vector<8x128xf32>
    %268 = arith.addf %262, %267 : vector<8x128xf32>
    %269 = vector.extract_strided_slice %253 {offsets = [0, 256], sizes = [8, 128], strides = [1, 1]} : vector<8x512xf32> to vector<8x128xf32>
    %270 = math.absf %269 : vector<8x128xf32>
    %c3_149 = arith.constant 3 : index
    %c0_150 = arith.constant 0 : index
    %c0_151 = arith.constant 0 : index
    %271 = vector.load %arg14[%c3_149, %c0_150, %c0_151] : memref<5x8x8xbf16, #tpu.memory_space<vmem>>, vector<1x8x8xbf16>
    %272 = vector.shape_cast %271 : vector<1x8x8xbf16> to vector<8x8xbf16>
    %273 = arith.truncf %270 : vector<8x128xf32> to vector<8x128xbf16>
    %cst_152 = arith.constant dense<0.000000e+00> : vector<8x128xf32>
    %274 = tpu.matmul %272, %273, %cst_152 {dimension_numbers = #tpu.dot_dimension_numbers<[1], [0], [0], [1], [0, 0, 1, 1], [], []>} : vector<8x8xbf16>, vector<8x128xbf16>, vector<8x128xf32> -> vector<8x128xf32>
    %275 = arith.addf %268, %274 : vector<8x128xf32>
    %276 = vector.extract_strided_slice %253 {offsets = [0, 384], sizes = [8, 128], strides = [1, 1]} : vector<8x512xf32> to vector<8x128xf32>
    %277 = math.absf %276 : vector<8x128xf32>
    %c4_153 = arith.constant 4 : index
    %c0_154 = arith.constant 0 : index
    %c0_155 = arith.constant 0 : index
    %278 = vector.load %arg14[%c4_153, %c0_154, %c0_155] : memref<5x8x8xbf16, #tpu.memory_space<vmem>>, vector<1x8x8xbf16>
    %279 = vector.shape_cast %278 : vector<1x8x8xbf16> to vector<8x8xbf16>
    %280 = arith.truncf %277 : vector<8x128xf32> to vector<8x128xbf16>
    %cst_156 = arith.constant dense<0.000000e+00> : vector<8x128xf32>
    %281 = tpu.matmul %279, %280, %cst_156 {dimension_numbers = #tpu.dot_dimension_numbers<[1], [0], [0], [1], [0, 0, 1, 1], [], []>} : vector<8x8xbf16>, vector<8x128xbf16>, vector<8x128xf32> -> vector<8x128xf32>
    %282 = arith.addf %275, %281 : vector<8x128xf32>
    %283 = vector.broadcast %252 : vector<8x1xf32> to vector<8x128xf32>
    %284 = arith.addf %282, %283 : vector<8x128xf32>
    %cst_157 = arith.constant 0.000000e+00 : f32
    %285 = vector.broadcast %cst_157 : f32 to vector<8x128xf32>
    %286 = arith.cmpf ogt, %284, %285 : vector<8x128xf32>
    %cst_158 = arith.constant 0.000000e+00 : f32
    %287 = vector.broadcast %cst_158 : f32 to vector<8x128xf32>
    %288 = arith.mulf %287, %284 : vector<8x128xf32>
    %289 = arith.select %286, %284, %288 : vector<8x128xi1>, vector<8x128xf32>
    %290 = vector.broadcast %4 : vector<1x128xf32> to vector<8x128xf32>
    %291 = arith.mulf %289, %290 : vector<8x128xf32>
    %cst_159 = arith.constant dense<0.000000e+00> : vector<8xf32>
    %292 = vector.multi_reduction <add>, %291, %cst_159 [1] : vector<8x128xf32> to vector<8xf32>
    %293 = vector.shape_cast %292 : vector<8xf32> to vector<8x1xf32>
    %cst_160 = arith.constant 0.0833333358 : f32
    %294 = vector.broadcast %cst_160 : f32 to vector<8x1xf32>
    %295 = arith.mulf %293, %294 : vector<8x1xf32>
    %296 = vector.broadcast %295 : vector<8x1xf32> to vector<8x128xf32>
    %297 = arith.subf %289, %296 : vector<8x128xf32>
    %298 = vector.broadcast %4 : vector<1x128xf32> to vector<8x128xf32>
    %299 = arith.mulf %297, %298 : vector<8x128xf32>
    %300 = arith.mulf %299, %299 : vector<8x128xf32>
    %cst_161 = arith.constant dense<0.000000e+00> : vector<8xf32>
    %301 = vector.multi_reduction <add>, %300, %cst_161 [1] : vector<8x128xf32> to vector<8xf32>
    %302 = vector.shape_cast %301 : vector<8xf32> to vector<8x1xf32>
    %cst_162 = arith.constant 0.0833333358 : f32
    %303 = vector.broadcast %cst_162 : f32 to vector<8x1xf32>
    %304 = arith.mulf %302, %303 : vector<8x1xf32>
    %cst_163 = arith.constant 9.99999974E-6 : f32
    %305 = vector.broadcast %cst_163 : f32 to vector<8x1xf32>
    %306 = arith.addf %304, %305 : vector<8x1xf32>
    %307 = math.rsqrt %306 : vector<8x1xf32>
    %308 = vector.broadcast %307 : vector<8x1xf32> to vector<8x128xf32>
    %309 = arith.mulf %299, %308 : vector<8x128xf32>
    %310 = vector.broadcast %4 : vector<1x128xf32> to vector<8x128xf32>
    %311 = arith.mulf %309, %310 : vector<8x128xf32>
    %cst_164 = arith.constant dense<0.000000e+00> : vector<8xf32>
    %312 = vector.multi_reduction <add>, %311, %cst_164 [1] : vector<8x128xf32> to vector<8xf32>
    %313 = vector.shape_cast %312 : vector<8xf32> to vector<8x1xf32>
    %cst_165 = arith.constant 0.0833333358 : f32
    %314 = vector.broadcast %cst_165 : f32 to vector<8x1xf32>
    %315 = arith.mulf %313, %314 : vector<8x1xf32>
    %316 = vector.broadcast %315 : vector<8x1xf32> to vector<8x128xf32>
    %317 = arith.subf %309, %316 : vector<8x128xf32>
    %318 = vector.broadcast %4 : vector<1x128xf32> to vector<8x128xf32>
    %319 = arith.mulf %317, %318 : vector<8x128xf32>
    %320 = arith.mulf %319, %319 : vector<8x128xf32>
    %cst_166 = arith.constant dense<0.000000e+00> : vector<8xf32>
    %321 = vector.multi_reduction <add>, %320, %cst_166 [1] : vector<8x128xf32> to vector<8xf32>
    %322 = vector.shape_cast %321 : vector<8xf32> to vector<8x1xf32>
    %cst_167 = arith.constant 0.0833333358 : f32
    %323 = vector.broadcast %cst_167 : f32 to vector<8x1xf32>
    %324 = arith.mulf %322, %323 : vector<8x1xf32>
    %cst_168 = arith.constant 9.99999974E-6 : f32
    %325 = vector.broadcast %cst_168 : f32 to vector<8x1xf32>
    %326 = arith.addf %324, %325 : vector<8x1xf32>
    %327 = math.rsqrt %326 : vector<8x1xf32>
    %328 = vector.broadcast %327 : vector<8x1xf32> to vector<8x128xf32>
    %329 = arith.mulf %319, %328 : vector<8x128xf32>
    %330 = arith.truncf %329 : vector<8x128xf32> to vector<8x128xbf16>
    %c0_169 = arith.constant 0 : index
    %c0_170 = arith.constant 0 : index
    %331 = vector.load %arg17[%c0_169, %c0_170] : memref<8x1xf32, #tpu.memory_space<vmem>>, vector<8x1xf32>
    %cst_171 = arith.constant dense<0.000000e+00> : vector<8x512xf32>
    %332 = tpu.matmul %330, %5, %cst_171 {dimension_numbers = #tpu.dot_dimension_numbers<[1], [0], [0], [1], [0, 0, 1, 1], [], []>} : vector<8x128xbf16>, vector<128x512xbf16>, vector<8x512xf32> -> vector<8x512xf32>
    %c0_172 = arith.constant 0 : index
    %c0_173 = arith.constant 0 : index
    %c0_174 = arith.constant 0 : index
    %333 = vector.load %arg16[%c0_172, %c0_173, %c0_174] : memref<5x8x8xbf16, #tpu.memory_space<vmem>>, vector<1x8x8xbf16>
    %334 = vector.shape_cast %333 : vector<1x8x8xbf16> to vector<8x8xbf16>
    %cst_175 = arith.constant dense<0.000000e+00> : vector<8x128xf32>
    %335 = tpu.matmul %334, %330, %cst_175 {dimension_numbers = #tpu.dot_dimension_numbers<[1], [0], [0], [1], [0, 0, 1, 1], [], []>} : vector<8x8xbf16>, vector<8x128xbf16>, vector<8x128xf32> -> vector<8x128xf32>
    %336 = vector.extract_strided_slice %332 {offsets = [0, 0], sizes = [8, 128], strides = [1, 1]} : vector<8x512xf32> to vector<8x128xf32>
    %c1_176 = arith.constant 1 : index
    %c0_177 = arith.constant 0 : index
    %c0_178 = arith.constant 0 : index
    %337 = vector.load %arg16[%c1_176, %c0_177, %c0_178] : memref<5x8x8xbf16, #tpu.memory_space<vmem>>, vector<1x8x8xbf16>
    %338 = vector.shape_cast %337 : vector<1x8x8xbf16> to vector<8x8xbf16>
    %339 = arith.truncf %336 : vector<8x128xf32> to vector<8x128xbf16>
    %cst_179 = arith.constant dense<0.000000e+00> : vector<8x128xf32>
    %340 = tpu.matmul %338, %339, %cst_179 {dimension_numbers = #tpu.dot_dimension_numbers<[1], [0], [0], [1], [0, 0, 1, 1], [], []>} : vector<8x8xbf16>, vector<8x128xbf16>, vector<8x128xf32> -> vector<8x128xf32>
    %341 = arith.addf %335, %340 : vector<8x128xf32>
    %342 = vector.extract_strided_slice %332 {offsets = [0, 128], sizes = [8, 128], strides = [1, 1]} : vector<8x512xf32> to vector<8x128xf32>
    %c2_180 = arith.constant 2 : index
    %c0_181 = arith.constant 0 : index
    %c0_182 = arith.constant 0 : index
    %343 = vector.load %arg16[%c2_180, %c0_181, %c0_182] : memref<5x8x8xbf16, #tpu.memory_space<vmem>>, vector<1x8x8xbf16>
    %344 = vector.shape_cast %343 : vector<1x8x8xbf16> to vector<8x8xbf16>
    %345 = arith.truncf %342 : vector<8x128xf32> to vector<8x128xbf16>
    %cst_183 = arith.constant dense<0.000000e+00> : vector<8x128xf32>
    %346 = tpu.matmul %344, %345, %cst_183 {dimension_numbers = #tpu.dot_dimension_numbers<[1], [0], [0], [1], [0, 0, 1, 1], [], []>} : vector<8x8xbf16>, vector<8x128xbf16>, vector<8x128xf32> -> vector<8x128xf32>
    %347 = arith.addf %341, %346 : vector<8x128xf32>
    %348 = vector.extract_strided_slice %332 {offsets = [0, 256], sizes = [8, 128], strides = [1, 1]} : vector<8x512xf32> to vector<8x128xf32>
    %349 = math.absf %348 : vector<8x128xf32>
    %c3_184 = arith.constant 3 : index
    %c0_185 = arith.constant 0 : index
    %c0_186 = arith.constant 0 : index
    %350 = vector.load %arg16[%c3_184, %c0_185, %c0_186] : memref<5x8x8xbf16, #tpu.memory_space<vmem>>, vector<1x8x8xbf16>
    %351 = vector.shape_cast %350 : vector<1x8x8xbf16> to vector<8x8xbf16>
    %352 = arith.truncf %349 : vector<8x128xf32> to vector<8x128xbf16>
    %cst_187 = arith.constant dense<0.000000e+00> : vector<8x128xf32>
    %353 = tpu.matmul %351, %352, %cst_187 {dimension_numbers = #tpu.dot_dimension_numbers<[1], [0], [0], [1], [0, 0, 1, 1], [], []>} : vector<8x8xbf16>, vector<8x128xbf16>, vector<8x128xf32> -> vector<8x128xf32>
    %354 = arith.addf %347, %353 : vector<8x128xf32>
    %355 = vector.extract_strided_slice %332 {offsets = [0, 384], sizes = [8, 128], strides = [1, 1]} : vector<8x512xf32> to vector<8x128xf32>
    %356 = math.absf %355 : vector<8x128xf32>
    %c4_188 = arith.constant 4 : index
    %c0_189 = arith.constant 0 : index
    %c0_190 = arith.constant 0 : index
    %357 = vector.load %arg16[%c4_188, %c0_189, %c0_190] : memref<5x8x8xbf16, #tpu.memory_space<vmem>>, vector<1x8x8xbf16>
    %358 = vector.shape_cast %357 : vector<1x8x8xbf16> to vector<8x8xbf16>
    %359 = arith.truncf %356 : vector<8x128xf32> to vector<8x128xbf16>
    %cst_191 = arith.constant dense<0.000000e+00> : vector<8x128xf32>
    %360 = tpu.matmul %358, %359, %cst_191 {dimension_numbers = #tpu.dot_dimension_numbers<[1], [0], [0], [1], [0, 0, 1, 1], [], []>} : vector<8x8xbf16>, vector<8x128xbf16>, vector<8x128xf32> -> vector<8x128xf32>
    %361 = arith.addf %354, %360 : vector<8x128xf32>
    %362 = vector.broadcast %331 : vector<8x1xf32> to vector<8x128xf32>
    %363 = arith.addf %361, %362 : vector<8x128xf32>
    %364 = vector.extract_strided_slice %363 {offsets = [0, 0], sizes = [3, 128], strides = [1, 1]} : vector<8x128xf32> to vector<3x128xf32>
    %365 = arith.truncf %364 : vector<3x128xf32> to vector<3x128xbf16>
    %366 = vector.extract_strided_slice %363 {offsets = [3, 0], sizes = [3, 128], strides = [1, 1]} : vector<8x128xf32> to vector<3x128xf32>
    %367 = arith.truncf %366 : vector<3x128xf32> to vector<3x128xbf16>
    %c0_192 = arith.constant 0 : index
    %c0_193 = arith.constant 0 : index
    %c0_194 = arith.constant 0 : index
    %368 = vector.load %arg2[%c0_192, %c0_193, %c0_194] : memref<2x128x128xbf16, #tpu.memory_space<vmem>>, vector<1x128x128xbf16>
    %369 = vector.shape_cast %368 : vector<1x128x128xbf16> to vector<128x128xbf16>
    %cst_195 = arith.constant dense<0.000000e+00> : vector<3x128xf32>
    %370 = tpu.matmul %365, %369, %cst_195 {dimension_numbers = #tpu.dot_dimension_numbers<[1], [0], [0], [1], [0, 0, 1, 1], [], []>} : vector<3x128xbf16>, vector<128x128xbf16>, vector<3x128xf32> -> vector<3x128xf32>
    %c1_196 = arith.constant 1 : index
    %c0_197 = arith.constant 0 : index
    %c0_198 = arith.constant 0 : index
    %371 = vector.load %arg2[%c1_196, %c0_197, %c0_198] : memref<2x128x128xbf16, #tpu.memory_space<vmem>>, vector<1x128x128xbf16>
    %372 = vector.shape_cast %371 : vector<1x128x128xbf16> to vector<128x128xbf16>
    %cst_199 = arith.constant dense<0.000000e+00> : vector<3x128xf32>
    %373 = tpu.matmul %367, %372, %cst_199 {dimension_numbers = #tpu.dot_dimension_numbers<[1], [0], [0], [1], [0, 0, 1, 1], [], []>} : vector<3x128xbf16>, vector<128x128xbf16>, vector<3x128xf32> -> vector<3x128xf32>
    %374 = arith.addf %370, %373 : vector<3x128xf32>
    %c0_200 = arith.constant 0 : index
    %c0_201 = arith.constant 0 : index
    %375 = vector.load %arg3[%c0_200, %c0_201] : memref<3x128xf32, #tpu.memory_space<vmem>>, vector<3x128xf32>
    %376 = arith.addf %374, %375 : vector<3x128xf32>
    %c0_202 = arith.constant 0 : index
    %c0_203 = arith.constant 0 : index
    %377 = vector.load %arg18[%c0_202, %c0_203] : memref<3x128xf32, #tpu.memory_space<vmem>>, vector<3x128xf32>
    tpu.vector_store %arg18[%c0_202, %c0_203], %376 {strides = array<i32>} : memref<3x128xf32, #tpu.memory_space<vmem>>, vector<3x128xf32>,
    return
  }
}

</mosaic_0001>

<bundles_post_ra>
// kernel: tpu_custom_call.1
= control target key start
LH: loop header
LB: loop body
LE: loop exit
PB: predicated region body
PF: predicated region fallthrough
CT: control target
= control target key end

     0   :  { %s6702_s0 = inlined_call_operand.vmem [shape: bf16[128,512], index: 0, kind: input, shape index: {}]   ;;  %s6703_s1 = inlined_call_operand.hbm [shape: bf16[8,128], index: 1, kind: input, shape index: {}]   ;;  %s6704_s2 = inlined_call_operand.vmem [shape: bf16[2,128,128], index: 2, kind: input, shape index: {}]   ;;  %s6705_s3 = inlined_call_operand.hbm [shape: f32[3,128], index: 3, kind: input, shape index: {}]   ;;  %s6706_s4 = inlined_call_operand.vmem [shape: bf16[5,32,8], index: 4, kind: input, shape index: {}]   ;;  %s6707_s5 = inlined_call_operand.vmem [shape: f32[32,1], index: 5, kind: input, shape index: {}]   ;;  %s6708_s6 = inlined_call_operand.vmem [shape: bf16[5,64,32], index: 6, kind: input, shape index: {}]   ;;  %s6709_s7 = inlined_call_operand.vmem [shape: f32[64,1], index: 7, kind: input, shape index: {}]   ;;  %s6710_s8 = inlined_call_operand.vmem [shape: bf16[5,32,64], index: 8, kind: input, shape index: {}]   ;;  %s6711_s9 = inlined_call_operand.vmem [shape: f32[32,1], index: 9, kind: input, shape index: {}]   ;;  %s6712_s10 = inlined_call_operand.vmem [shape: bf16[5,32,32], index: 10, kind: input, shape index: {}]   ;;  %s6713_s11 = inlined_call_operand.vmem [shape: f32[32,1], index: 11, kind: input, shape index: {}]   ;;  %s6714_s12 = inlined_call_operand.vmem [shape: bf16[5,8,32], index: 12, kind: input, shape index: {}]   ;;  %s6715_s13 = inlined_call_operand.vmem [shape: f32[8,1], index: 13, kind: input, shape index: {}]   ;;  %s6716_s14 = inlined_call_operand.hbm [shape: bf16[5,8,8], index: 14, kind: input, shape index: {}]   ;;  %s6717_s15 = inlined_call_operand.vmem [shape: f32[8,1], index: 15, kind: input, shape index: {}]   ;;  %s6718_s16 = inlined_call_operand.vmem [shape: bf16[5,8,8], index: 16, kind: input, shape index: {}]   ;;  %s6719_s17 = inlined_call_operand.vmem [shape: f32[8,1], index: 17, kind: input, shape index: {}]   ;;  %s6720_s18 = inlined_call_operand.hbm [shape: f32[3,128], index: 18, kind: output, shape index: {}]  }
   0x1   :  { %6724 = sst [smem:[#allocation12_spill]] %s6702_s0 }
   0x2   :  { %6725 = sst [smem:[#allocation13_spill]] %s6703_s1 }
   0x3   :  { %6726 = sst [smem:[#allocation14_spill]] %s6704_s2 }
   0x4   :  { %23 = vsyncpa [#allocation3], 0 }
   0x5   :  { %24 = vsyncpa [#allocation6], 0 }
   0x6   :  { %25 = vsyncpa [#allocation4], 0  ;;  %s5316_s27 = smov [#allocation5]   ;;  %s5317_s29 = smov [#allocation2]  }
   0x7   :  { %s46_s28 = sshll.u32 %s5316_s27, 4  ;;  %s34_s30 = sshll.u32 %s5317_s29, 4  ;;  %s47_s28 = int_to_ptr.vmem [resolvable:$true] %s46_s28  ;;  %s35_s30 = int_to_ptr.vmem [resolvable:$true] %s34_s30 }
   0x8   :  { %s5222_s1 = scalar_lea.hbm %s6705_s3, 64 }
   0x9   :  { %p5223_p0 = scmp.ne.s32.totalorder %s6705_s3, %s5222_s1  ;;  %p5226_p1 = scmp.lt.u32.totalorder %s5222_s1, %s6705_s3 }
   0xb   :  { %p5228_p2 = pnand %p5226_p1, %p5223_p0 }
   0xd   :  { %5231 = shalt.err (!%p5228_p2)
}
   0xe   :  { %s5232_s23 = scalar_lea.vmem %s47_s28, 64  ;;  %p5237_p4 = scmp.lt.s32.totalorder %s47_s28, %s47_s28 }
   0xf   :  { %p5233_p3 = scmp.ne.s32.totalorder %s47_s28, %s5232_s23  ;;  %p5238_p5 = scmp.lt.s32.totalorder %s5232_s23, %s5232_s23 }
  0x11   :  { %p5239_p6 = por %p5238_p5, %p5237_p4 }
  0x13   :  { %p5240_p7 = pnand %p5239_p6, %p5233_p3 }
  0x15   :  { %5243 = shalt.err (!%p5240_p7)
}
  0x16   :  { %49 = dma.hbm_to_vmem [thread:$0]  %s6705_s3, 64, %s47_s28, [#allocation6]  }
  0x17   :  { %s6727_s29 = sld [smem:[#allocation13_spill]] }
  0x1d   :  { %s5244_s0 = scalar_lea.hbm %s6727_s29, 64 }
  0x1e   :  { %p5245_p8 = scmp.ne.s32.totalorder %s6727_s29, %s5244_s0  ;;  %p5248_p9 = scmp.lt.u32.totalorder %s5244_s0, %s6727_s29 }
  0x20   :  { %p5250_p10 = pnand %p5248_p9, %p5245_p8 }
  0x22   :  { %5253 = shalt.err (!%p5250_p10)
}
  0x23   :  { %s5254_s22 = scalar_lea.vmem %s35_s30, 64  ;;  %p5259_p12 = scmp.lt.s32.totalorder %s35_s30, %s35_s30 }
  0x24   :  { %p5255_p11 = scmp.ne.s32.totalorder %s35_s30, %s5254_s22  ;;  %p5260_p13 = scmp.lt.s32.totalorder %s5254_s22, %s5254_s22 }
  0x26   :  { %p5261_p0 = por %p5260_p13, %p5259_p12 }
  0x28   :  { %p5262_p1 = pnand %p5261_p0, %p5255_p11 }
  0x2a   :  { %5265 = shalt.err (!%p5262_p1)
}
  0x2b   :  { %37 = dma.hbm_to_vmem [thread:$0]  %s6727_s29, 64, %s35_s30, [#allocation3]  }
  0x2c   :  { %s5318_s2 = smov [#allocation7]   ;;  %s5266_s26 = scalar_lea.hbm %s6716_s14, 320 }
  0x2d   :  { %s75_s23 = sshll.u32 %s5318_s2, 4  ;;  %p5267_p2 = scmp.ne.s32.totalorder %s6716_s14, %s5266_s26  ;;  %s76_s23 = int_to_ptr.vmem [resolvable:$true] %s75_s23 }
  0x2e   :  { %p5270_p3 = scmp.lt.u32.totalorder %s5266_s26, %s6716_s14 }
  0x30   :  { %p5272_p4 = pnand %p5270_p3, %p5267_p2 }
  0x32   :  { %5275 = shalt.err (!%p5272_p4)
}
  0x33   :  { %s5276_s1 = scalar_lea.vmem %s76_s23, 320  ;;  %p5281_p6 = scmp.lt.s32.totalorder %s76_s23, %s76_s23 }
  0x34   :  { %p5277_p5 = scmp.ne.s32.totalorder %s76_s23, %s5276_s1  ;;  %p5282_p7 = scmp.lt.s32.totalorder %s5276_s1, %s5276_s1 }
  0x36   :  { %p5283_p8 = por %p5282_p7, %p5281_p6 }
  0x38   :  { %p5284_p9 = pnand %p5283_p8, %p5277_p5 }
  0x3a   :  { %5287 = shalt.err (!%p5284_p9)
}
  0x3b   :  { %s5319_s30 = smov 64   ;;  %s5320_s29 = smov 4  }
  0x3c   :  { %81 = dma.hbm_to_vmem [thread:$0]  %s6716_s14, 320, %s76_s23, [#allocation6], %s5319_s30, %s5319_s30, %s5320_s29  }
  0x3d   :  { %5310 = dma.done.wait [#allocation3], 64  }
  0x3e   :  { %5311 = vsyncadd [#allocation3], 4294967232 }
  0x3f   :  { %5312 = dma.done.wait [#allocation6], 384  }
  0x40   :  { %5313 = vsyncadd [#allocation6], 4294966912  ;;  %v5321_v0 = vmov 0   ;;  %s6728_s2 = sld [smem:[#allocation12_spill]]  ;;  %v135_v30 = vld [vmem:[#allocation2] sm:$0xf] }
  0x41   :  { %332 = vmatprep.mubr.bf16.mxu0 %v5321_v0  ;;  %373 = vmatprep.mubr.bf16.mxu1 %v5321_v0  ;;  %v5056_v34 = vld [vmem:[%s6706_s4 + $0x10] sm:$0xff]   ;;  %vm402_vm0 = vcmask 64512   ;;  %v136_v35 = vld [vmem:[%s6707_s5] sm:$0xff]  ;;  %v137_v37 = vld [vmem:[%s6707_s5 + $0x8] sm:$0xff]  ;;  %vm409_vm1 = vcmask 1043456   ;;  %vm1009_vm7 = vcmask 261120  }
  0x42   :  { %5006 = vset.pattern.permute.xlu0 %v5321_v0  ;;  %5007 = vset.pattern.permute.xlu1 %v5321_v0  ;;  %v138_v36 = vld [vmem:[%s6707_s5 + $0x10] sm:$0xff]  ;;  %v139_v38 = vld [vmem:[%s6707_s5 + $0x18] sm:$0xff]  ;;  %v5058_v46 = vld [vmem:[%s6706_s4] sm:$0xff]   ;;  %v479_v47 = vsel %vm409_vm1, %v135_v30, 0 }
  0x43   :  { %768 = vperm.xlu0 %5006, %v136_v35   ;;  %778 = vperm.xlu1 %5007, %v138_v36   ;;  %v5057_v45 = vld [vmem:[%s6706_s4 + $0x18] sm:$0xff]   ;;  %v5059_v54 = vld [vmem:[%s6706_s4 + $0x8] sm:$0xff]   ;;  %v5060_v55 = vld [vmem:[%s6706_s4 + $0x20] sm:$0xff]   ;;  %v98_v36 = vlaneseq }
  0x44   :  { %v5061_v59 = vld [vmem:[%s6706_s4 + $0x28] sm:$0xff]   ;;  %v5062_v60 = vld [vmem:[%s6706_s4 + $0x30] sm:$0xff]   ;;  %v5063_v63 = vld [vmem:[%s6706_s4 + $0x38] sm:$0xff]  }
  0x45   :  { %v5065_v35 = vld [vmem:[%s6706_s4 + $0x48] sm:$0xff]  }
  0x46   :  { %v5463_v1 = vld [vmem:[%s6728_s2 + $0x4] ss:$16 sps:$4 sm:$0xff]   ;;  %v5468_v2 = vld [vmem:[%s6728_s2] ss:$16 sps:$4 sm:$0xff]   ;;  %v5503_v8 = vld [vmem:[%s6728_s2 + $0xc] ss:$16 sps:$4 sm:$0xff]  }
  0x47   :  { %300 = vmatprep.subr.bf16.mxu0 %v5463_v1  ;;  %v5474_v3 = vld [vmem:[%s6728_s2 + $0x24] ss:$16 sps:$4 sm:$0xff]   ;;  %v5480_v4 = vld [vmem:[%s6728_s2 + $0x20] ss:$16 sps:$4 sm:$0xff]   ;;  %v5519_v11 = vld [vmem:[%s6728_s2 + $0x8] ss:$16 sps:$4 sm:$0xff]   ;;  %341 = vmatprep.subr.bf16.mxu1 %v5503_v8 }
  0x48   :  { %301 = vmatpush1.bf16.msra.mxu0 %v5468_v2  ;;  %v5486_v5 = vld [vmem:[%s6728_s2 + $0x44] ss:$16 sps:$4 sm:$0xff]   ;;  %v5492_v6 = vld [vmem:[%s6728_s2 + $0x40] ss:$16 sps:$4 sm:$0xff]   ;;  %v5526_v12 = vld [vmem:[%s6728_s2 + $0x2c] ss:$16 sps:$4 sm:$0xff]   ;;  %342 = vmatpush1.bf16.msra.mxu1 %v5519_v11 }
  0x49   :  { %302 = vmatprep.subr.bf16.mxu0 %v5474_v3  ;;  %v5498_v7 = vld [vmem:[%s6728_s2 + $0x64] ss:$16 sps:$4 sm:$0xff]   ;;  %v5509_v9 = vld [vmem:[%s6728_s2 + $0x60] ss:$16 sps:$4 sm:$0xff]   ;;  %v5532_v13 = vld [vmem:[%s6728_s2 + $0x28] ss:$16 sps:$4 sm:$0xff]   ;;  %343 = vmatprep.subr.bf16.mxu1 %v5526_v12 }
  0x4a   :  { %v5514_v10 = vld [vmem:[%s6728_s2 + $0x84] ss:$16 sps:$4 sm:$0xff]   ;;  %v5538_v14 = vld [vmem:[%s6728_s2 + $0x4c] ss:$16 sps:$4 sm:$0xff]   ;;  %v5544_v15 = vld [vmem:[%s6728_s2 + $0x80] ss:$16 sps:$4 sm:$0xff]   ;;  %773 = vperm.xlu0 %5006, %v137_v37   ;;  %783 = vperm.xlu1 %5007, %v139_v38  }
  0x4b   :  { %v5550_v16 = vld [vmem:[%s6728_s2 + $0xa4] ss:$16 sps:$4 sm:$0xff]   ;;  %v5556_v17 = vld [vmem:[%s6728_s2 + $0x48] ss:$16 sps:$4 sm:$0xff]   ;;  %v5562_v18 = vld [vmem:[%s6728_s2 + $0x6c] ss:$16 sps:$4 sm:$0xff]  }
  0x4c   :  { %303 = vmatpush1.bf16.msra.mxu0 %v5480_v4  ;;  %344 = vmatpush1.bf16.msra.mxu1 %v5532_v13  ;;  %v5568_v19 = vld [vmem:[%s6728_s2 + $0xa0] ss:$16 sps:$4 sm:$0xff]   ;;  %v5574_v20 = vld [vmem:[%s6728_s2 + $0xc4] ss:$16 sps:$4 sm:$0xff]   ;;  %v5585_v22 = vld [vmem:[%s6728_s2 + $0x68] ss:$16 sps:$4 sm:$0xff]  }
  0x4d   :  { %304 = vmatprep.subr.bf16.mxu0 %v5486_v5  ;;  %345 = vmatprep.subr.bf16.mxu1 %v5538_v14  ;;  %v5579_v21 = vld [vmem:[%s6728_s2 + $0xc0] ss:$16 sps:$4 sm:$0xff]   ;;  %v5590_v23 = vld [vmem:[%s6728_s2 + $0x8c] ss:$16 sps:$4 sm:$0xff]   ;;  %v5595_v24 = vld [vmem:[%s6728_s2 + $0xe4] ss:$16 sps:$4 sm:$0xff]  }
  0x4e   :  { %v5602_v25 = vld [vmem:[%s6728_s2 + $0x88] ss:$16 sps:$4 sm:$0xff]   ;;  %v5608_v26 = vld [vmem:[%s6728_s2 + $0xac] ss:$16 sps:$4 sm:$0xff]   ;;  %v5613_v27 = vld [vmem:[%s6728_s2 + $0xe0] ss:$16 sps:$4 sm:$0xff]  }
  0x4f   :  { %v5621_v28 = vld [vmem:[%s6728_s2 + $0xa8] ss:$16 sps:$4 sm:$0xff]   ;;  %v5627_v29 = vld [vmem:[%s6728_s2 + $0xcc] ss:$16 sps:$4 sm:$0xff]   ;;  %v99_v38 = vand.u32 127, %v98_v36 }
  0x50   :  { %305 = vmatpush1.bf16.msra.mxu0 %v5492_v6  ;;  %346 = vmatpush1.bf16.msra.mxu1 %v5556_v17  ;;  %v5635_v31 = vld [vmem:[%s6728_s2 + $0xc8] ss:$16 sps:$4 sm:$0xff]   ;;  %v5640_v32 = vld [vmem:[%s6728_s2 + $0xec] ss:$16 sps:$4 sm:$0xff]  }
  0x51   :  { %306 = vmatprep.subr.bf16.mxu0 %v5498_v7  ;;  %347 = vmatprep.subr.bf16.mxu1 %v5562_v18  ;;  %v5647_v33 = vld [vmem:[%s6728_s2 + $0xe8] ss:$16 sps:$4 sm:$0xff]   ;;  %vm100_vm2 = vcmp.lt.s32.totalorder %v99_v38, 12 }
  0x54   :  { %307 = vmatpush1.bf16.msra.mxu0 %v5509_v9  ;;  %348 = vmatpush1.bf16.msra.mxu1 %v5585_v22 }
  0x55   :  { %308 = vmatprep.subr.bf16.mxu0 %v5514_v10  ;;  %349 = vmatprep.subr.bf16.mxu1 %v5590_v23 }
  0x58   :  { %309 = vmatpush1.bf16.msra.mxu0 %v5544_v15  ;;  %350 = vmatpush1.bf16.msra.mxu1 %v5602_v25 }
  0x59   :  { %310 = vmatprep.subr.bf16.mxu0 %v5550_v16  ;;  %351 = vmatprep.subr.bf16.mxu1 %v5608_v26 }
  0x5c   :  { %311 = vmatpush1.bf16.msra.mxu0 %v5568_v19  ;;  %352 = vmatpush1.bf16.msra.mxu1 %v5621_v28 }
  0x5d   :  { %312 = vmatprep.subr.bf16.mxu0 %v5574_v20  ;;  %353 = vmatprep.subr.bf16.mxu1 %v5627_v29 }
  0x60   :  { %313 = vmatpush1.bf16.msra.mxu0 %v5579_v21  ;;  %354 = vmatpush1.bf16.msra.mxu1 %v5635_v31 }
  0x61   :  { %314 = vmatprep.subr.bf16.mxu0 %v5595_v24  ;;  %355 = vmatprep.subr.bf16.mxu1 %v5640_v32 }
  0x64   :  { %315 = vmatpush1.bf16.msra.mxu0 %v5613_v27  ;;  %356 = vmatpush1.bf16.msra.mxu1 %v5647_v33 }
  0x65   :  { %864 = vmatprep.subr.bf16.mxu1 %v5463_v1 }
  0x67   :  { %333 = vmatmul.mubr.bf16.vlgmr.msra.gmra.mrb[0].mxu0 %v135_v30  ;;  %374 = vmatmul.mubr.bf16.vlgmr.msra.gmra.mrb[0].mxu1 %v135_v30 }
  0x68   :  { %865 = vmatpush1.bf16.msra.mxu1 %v5468_v2  ;;  %896 = vmatprep.mubr.bf16.mxu1 %v5321_v0 }
  0x69   :  { %866 = vmatprep.subr.bf16.mxu1 %v5474_v3  ;;  %4584 = vmatprep.mubr.msk.bf16.mxu0 %vm402_vm0, %v5056_v34 }
  0x6c   :  { %867 = vmatpush1.bf16.msra.mxu1 %v5480_v4 }
  0x6d   :  { %868 = vmatprep.subr.bf16.mxu1 %v5486_v5 }
  0x70   :  { %869 = vmatpush1.bf16.msra.mxu1 %v5492_v6 }
  0x71   :  { %870 = vmatprep.subr.bf16.mxu1 %v5498_v7 }
  0x74   :  { %871 = vmatpush1.bf16.msra.mxu1 %v5509_v9 }
  0x75   :  { %872 = vmatprep.subr.bf16.mxu1 %v5514_v10 }
  0x78   :  { %873 = vmatpush1.bf16.msra.mxu1 %v5544_v15 }
  0x79   :  { %874 = vmatprep.subr.bf16.mxu1 %v5550_v16 }
  0x7c   :  { %875 = vmatpush1.bf16.msra.mxu1 %v5568_v19 }
  0x7d   :  { %876 = vmatprep.subr.bf16.mxu1 %v5574_v20 }
  0x80   :  { %877 = vmatpush1.bf16.msra.mxu1 %v5579_v21 }
  0x81   :  { %878 = vmatprep.subr.bf16.mxu1 %v5595_v24 }
  0x84   :  { %879 = vmatpush1.bf16.msra.mxu1 %v5613_v27 }
  0x85   :  { %917 = vmatprep.subr.bf16.mxu1 %v5503_v8 }
  0xc2   :  { %v779_v37 = vpop.permute.xlu1 %778 }
 0x13a   :  { %v334_v39 = vpop.f32.mrb[0].mxu0  ;;  %v375_v49 = vpop.f32.mrb[0].mxu1 }
 0x13b   :  { %v391_v40 = vpack.c.bf16 %v334_v39, %v334_v39  ;;  %v336_v41 = vpop.f32.mrb[1].mxu0  ;;  %v377_v50 = vpop.f32.mrb[1].mxu1  ;;  %v608_v52 = vand.u32 2147483647, %v375_v49  ;;  %v5322_v49 = vmov 0.0  }
 0x13c   :  { %v338_v42 = vpop.f32.mrb[2].mxu0  ;;  %v535_v48 = vpack.c.bf16 %v336_v41, %v336_v41  ;;  %v379_v51 = vpop.f32.mrb[2].mxu1  ;;  %v687_v58 = vand.u32 2147483647, %v377_v50  ;;  %v5733_v50 = vsel %vm100_vm2, 1.0, %v5322_v49  ;;  %vm1893_vm2 = vcmask 523264  }
 0x13d   :  { %v411_v43 = vsel %vm409_vm1, %v391_v40, 0  ;;  %v339_v44 = vpop.f32.mrb[3].mxu0  ;;  %4992 = vmatprep.subr.msk.bf16.mxu0 %vm409_vm1, %v391_v40  ;;  %v380_v53 = vpop.f32.mrb[3].mxu1  ;;  %v614_v56 = vpack.c.bf16 %v608_v52, %v608_v52 }
 0x13e   :  { %4583 = vmatpush3.bf16.msra.mxu0 %v411_v43  ;;  %v553_v57 = vsel %vm409_vm1, %v535_v48, 0  ;;  %v693_v62 = vpack.c.bf16 %v687_v58, %v687_v58  ;;  %v769_v39 = vpop.permute.xlu0 %768  ;;  %v784_v43 = vpop.permute.xlu1 %783 }
 0x13f   :  { %4993 = vmatprep.subr.msk.bf16.mxu0 %vm409_vm1, %v135_v30  ;;  %v632_v61 = vsel %vm409_vm1, %v614_v56, 0  ;;  %v5064_v30 = vld [vmem:[%s6706_s4 + $0x40] sm:$0xff]  }
 0x140   :  { %v711_v34 = vsel %vm409_vm1, %v693_v62, 0 }
 0x141   :  { %4585 = vmatmul.mubr.msk.bf16.vlgmr.msra.gmra.mrb[4].mxu0 %vm402_vm0, %v5057_v45 }
 0x142   :  { %4589 = vmatpush3.bf16.msra.mxu0 %v479_v47  ;;  %4590 = vmatprep.mubr.msk.bf16.mxu0 %vm402_vm0, %v5058_v46  ;;  %v774_v46 = vpop.permute.xlu0 %773 }
 0x143   :  { %4994 = vmatprep.subr.msk.bf16.mxu0 %vm409_vm1, %v535_v48 }
 0x14d   :  { %4591 = vmatmul.mubr.msk.bf16.vlgmr.msra.gmra.mrb[4].mxu0 %vm402_vm0, %v5059_v54 }
 0x14e   :  { %4595 = vmatpush3.bf16.msra.mxu0 %v553_v57  ;;  %4596 = vmatprep.mubr.msk.bf16.mxu0 %vm402_vm0, %v5060_v55 }
 0x14f   :  { %4995 = vmatprep.subr.msk.bf16.mxu0 %vm409_vm1, %v614_v56 }
 0x159   :  { %4597 = vmatmul.mubr.msk.bf16.vlgmr.msra.gmra.mrb[4].mxu0 %vm402_vm0, %v5061_v59 }
 0x15a   :  { %4601 = vmatpush3.bf16.msra.mxu0 %v632_v61  ;;  %4602 = vmatprep.mubr.msk.bf16.mxu0 %vm402_vm0, %v5062_v60 }
 0x15b   :  { %4996 = vmatprep.subr.msk.bf16.mxu0 %vm409_vm1, %v693_v62 }
 0x165   :  { %4603 = vmatmul.mubr.msk.bf16.vlgmr.msra.gmra.mrb[4].mxu0 %vm402_vm0, %v5063_v63 }
 0x166   :  { %4607 = vmatpush3.bf16.msra.mxu0 %v711_v34  ;;  %4608 = vmatprep.mubr.msk.bf16.mxu0 %vm402_vm0, %v5064_v30 }
 0x171   :  { %4609 = vmatmul.mubr.msk.bf16.vlgmr.msra.gmra.mrb[4].mxu0 %vm402_vm0, %v5065_v35 }
 0x244   :  { %v4610_v40 = vpop.f32.mrb[4].mxu0 }
 0x245   :  { %v788_v41 = vadd.f32 %v4610_v40, %v779_v37  ;;  %v747_v42 = vpop.f32.mrb[5].mxu0 }
 0x246   :  { %v786_v44 = vadd.f32 %v769_v39, %v747_v42  ;;  %v4611_v45 = vpop.f32.mrb[6].mxu0 }
 0x247   :  { %v796_v47 = vmul.f32 0.0, %v788_v41  ;;  %v750_v48 = vpop.f32.mrb[7].mxu0  ;;  %v789_v52 = vadd.f32 %v4611_v45, %v784_v43  ;;  %vm792_vm4 = vcmp.gt.f32.partialorder %v788_v41, 0.0 }
 0x248   :  { %v794_v51 = vmul.f32 0.0, %v786_v44  ;;  %v787_v53 = vadd.f32 %v774_v46, %v750_v48  ;;  %vm790_vm3 = vcmp.gt.f32.partialorder %v786_v44, 0.0 }
 0x249   :  { %v797_v57 = vmul.f32 0.0, %v789_v52  ;;  %v800_v59 = vsel %vm792_vm4, %v788_v41, %v796_v47  ;;  %vm793_vm6 = vcmp.gt.f32.partialorder %v789_v52, 0.0 }
 0x24a   :  { %v795_v54 = vmul.f32 0.0, %v787_v53  ;;  %v798_v55 = vsel %vm790_vm3, %v786_v44, %v794_v51  ;;  %vm791_vm5 = vcmp.gt.f32.partialorder %v787_v53, 0.0  ;;  %v804_v61 = vmul.f32 %v5733_v50, %v800_v59 }
 0x24b   :  { %v802_v56 = vmul.f32 %v5733_v50, %v798_v55  ;;  %v801_v62 = vsel %vm793_vm6, %v789_v52, %v797_v57  ;;  %v859_v57 = vld [vmem:[%s6709_s7 + $0x18] sm:$0xff] }
 0x24c   :  { %v799_v58 = vsel %vm791_vm5, %v787_v53, %v795_v54  ;;  %v805_v63 = vmul.f32 %v5733_v50, %v801_v62 }
 0x24d   :  { %806 = vadd.xlane.f32.xlu0 %v802_v56  ;;  %v803_v60 = vmul.f32 %v5733_v50, %v799_v58  ;;  %v858_v56 = vld [vmem:[%s6709_s7 + $0x10] sm:$0xff] }
 0x24f   :  { %808 = vadd.xlane.f32.xlu1 %v803_v60  ;;  %v860_v60 = vld [vmem:[%s6709_s7 + $0x20] sm:$0xff] }
 0x251   :  { %810 = vadd.xlane.f32.xlu0 %v804_v61  ;;  %v863_v61 = vld [vmem:[%s6709_s7 + $0x38] sm:$0xff] }
 0x255   :  { %812 = vadd.xlane.f32.xlu0 %v805_v63 }
 0x2da   :  { %v807_v30 = vpop.xlane.xlu0 %806 }
 0x2db   :  { %v814_v34 = vmul.f32 0.083333336, %v807_v30 }
 0x2dc   :  { %v809_v35 = vpop.xlane.xlu1 %808 }
 0x2dd   :  { %v818_v36 = vsub.f32 %v798_v55, %v814_v34  ;;  %v815_v37 = vmul.f32 0.083333336, %v809_v35  ;;  %v856_v55 = vld [vmem:[%s6709_s7] sm:$0xff] }
 0x2de   :  { %v811_v38 = vpop.xlane.xlu0 %810 }
 0x2df   :  { %v819_v39 = vsub.f32 %v799_v58, %v815_v37  ;;  %v816_v40 = vmul.f32 0.083333336, %v811_v38  ;;  %v822_v41 = vmul.f32 %v5733_v50, %v818_v36  ;;  %v857_v58 = vld [vmem:[%s6709_s7 + $0x8] sm:$0xff] }
 0x2e1   :  { %v820_v42 = vsub.f32 %v800_v59, %v816_v40  ;;  %v826_v43 = vmul.f32 %v822_v41, %v822_v41  ;;  %v823_v44 = vmul.f32 %v5733_v50, %v819_v39  ;;  %v861_v59 = vld [vmem:[%s6709_s7 + $0x28] sm:$0xff] }
 0x2e2   :  { %v813_v45 = vpop.xlane.xlu0 %812 }
 0x2e3   :  { %v817_v46 = vmul.f32 0.083333336, %v813_v45  ;;  %830 = vadd.xlane.f32.xlu1 %v826_v43  ;;  %v827_v47 = vmul.f32 %v823_v44, %v823_v44  ;;  %v824_v48 = vmul.f32 %v5733_v50, %v820_v42 }
 0x2e5   :  { %v821_v51 = vsub.f32 %v801_v62, %v817_v46  ;;  %832 = vadd.xlane.f32.xlu0 %v827_v47  ;;  %v828_v52 = vmul.f32 %v824_v48, %v824_v48  ;;  %v862_v62 = vld [vmem:[%s6709_s7 + $0x30] sm:$0xff] }
 0x2e7   :  { %834 = vadd.xlane.f32.xlu1 %v828_v52  ;;  %v825_v53 = vmul.f32 %v5733_v50, %v821_v51 }
 0x2e9   :  { %v829_v54 = vmul.f32 %v825_v53, %v825_v53 }
 0x2eb   :  { %836 = vadd.xlane.f32.xlu0 %v829_v54 }
 0x2f8   :  { %1542 = vperm.xlu1 %5007, %v856_v55  }
 0x2fc   :  { %1552 = vperm.xlu1 %5007, %v858_v56  }
 0x300   :  { %1557 = vperm.xlu1 %5007, %v859_v57  }
 0x301   :  { %1547 = vperm.xlu0 %5006, %v857_v58  }
 0x304   :  { %1567 = vperm.xlu1 %5007, %v861_v59  }
 0x305   :  { %1562 = vperm.xlu0 %5006, %v860_v60  }
 0x308   :  { %1577 = vperm.xlu1 %5007, %v863_v61  }
 0x309   :  { %1572 = vperm.xlu0 %5006, %v862_v62  }
 0x370   :  { %v831_v63 = vpop.xlane.xlu1 %830 }
 0x371   :  { %v838_v30 = vmul.f32 0.083333336, %v831_v63 }
 0x372   :  { %v833_v34 = vpop.xlane.xlu0 %832 }
 0x373   :  { %v842_v35 = vadd.f32 1e-05, %v838_v30  ;;  %v839_v36 = vmul.f32 0.083333336, %v833_v34  ;;  %v5075_v30 = vld [vmem:[%s6708_s6 + $0x48] sm:$0xff]  }
 0x374   :  { %v835_v37 = vpop.xlane.xlu1 %834 }
 0x375   :  { %5122 = vrsqrt.f32 %v842_v35  ;;  %v843_v38 = vadd.f32 1e-05, %v839_v36  ;;  %v840_v39 = vmul.f32 0.083333336, %v835_v37  ;;  %v5076_v35 = vld [vmem:[%s6708_s6 + $0x50] sm:$0xff]   ;;  %v5077_v36 = vld [vmem:[%s6708_s6 + $0x58] sm:$0xff]  }
 0x376   :  { %v5078_v37 = vld [vmem:[%s6708_s6 + $0x60] sm:$0xff]  }
 0x377   :  { %5124 = vrsqrt.f32 %v843_v38  ;;  %v844_v40 = vadd.f32 1e-05, %v840_v39  ;;  %v5079_v38 = vld [vmem:[%s6708_s6 + $0x68] sm:$0xff]   ;;  %v5080_v39 = vld [vmem:[%s6708_s6 + $0x70] sm:$0xff]  }
 0x378   :  { %v837_v42 = vpop.xlane.xlu0 %836 }
 0x379   :  { %v841_v43 = vmul.f32 0.083333336, %v837_v42  ;;  %5126 = vrsqrt.f32 %v844_v40  ;;  %v5081_v40 = vld [vmem:[%s6708_s6 + $0x78] sm:$0xff]   ;;  %v5082_v42 = vld [vmem:[%s6708_s6 + $0x80] sm:$0xff]  }
 0x37b   :  { %v845_v45 = vadd.f32 1e-05, %v841_v43  ;;  %v5083_v43 = vld [vmem:[%s6708_s6 + $0x88] sm:$0xff]  }
 0x37d   :  { %5128 = vrsqrt.f32 %v845_v45  ;;  %v5084_v45 = vld [vmem:[%s6708_s6 + $0x90] sm:$0xff]  }
 0x37f   :  { %v5123_v46 = vpop.eup %5122 }
 0x380   :  { %v850_v51 = vmul.f32 %v5123_v46, %v822_v41  ;;  %v5085_v46 = vld [vmem:[%s6708_s6 + $0x98] sm:$0xff]  }
 0x381   :  { %v5125_v47 = vpop.eup %5124 }
 0x382   :  { %v851_v52 = vmul.f32 %v5125_v47, %v823_v44  ;;  %v1543_v47 = vpop.permute.xlu1 %1542 }
 0x383   :  { %v5127_v55 = vpop.eup %5126 }
 0x384   :  { %v5767_v54 = vpack.c.bf16 %v851_v52, %v850_v51  ;;  %v852_v58 = vmul.f32 %v5127_v55, %v824_v48  ;;  %v1548_v52 = vpop.permute.xlu0 %1547 }
 0x386   :  { %897 = vmatmul.mubr.bf16.vlgmr.msra.gmra.mrb[4].mxu1 %v5767_v54  ;;  %v1553_v51 = vpop.permute.xlu1 %1552 }
 0x387   :  { %v5129_v56 = vpop.eup %5128  ;;  %918 = vmatpush1.bf16.msra.mxu1 %v5519_v11  ;;  %906 = vmatprep.mubr.bf16.mxu1 %v5321_v0 }
 0x388   :  { %919 = vmatprep.subr.bf16.mxu1 %v5526_v12  ;;  %v853_v57 = vmul.f32 %v5129_v56, %v825_v53 }
 0x38a   :  { %v855_v41 = vpack.c.bf16 %v853_v57, %v852_v58  ;;  %v1563_v58 = vpop.permute.xlu0 %1562 }
 0x38b   :  { %920 = vmatpush1.bf16.msra.mxu1 %v5532_v13 }
 0x38c   :  { %921 = vmatprep.subr.bf16.mxu1 %v5538_v14  ;;  %v5067_v14 = vld [vmem:[%s6708_s6 + $0x28] sm:$0xff]  }
 0x38e   :  { %907 = vmatmul.mubr.bf16.gmra.mrb[8].mxu1 %v855_v41 }
 0x38f   :  { %922 = vmatpush1.bf16.msra.mxu1 %v5556_v17  ;;  %949 = vmatprep.mubr.bf16.mxu1 %v5321_v0  ;;  %v5070_v17 = vld [vmem:[%s6708_s6] sm:$0xff]  }
 0x390   :  { %923 = vmatprep.subr.bf16.mxu1 %v5562_v18  ;;  %v5071_v18 = vld [vmem:[%s6708_s6 + $0x8] sm:$0xff]  }
 0x393   :  { %924 = vmatpush1.bf16.msra.mxu1 %v5585_v22 }
 0x394   :  { %925 = vmatprep.subr.bf16.mxu1 %v5590_v23 }
 0x397   :  { %926 = vmatpush1.bf16.msra.mxu1 %v5602_v25 }
 0x398   :  { %927 = vmatprep.subr.bf16.mxu1 %v5608_v26 }
 0x39b   :  { %928 = vmatpush1.bf16.msra.mxu1 %v5621_v28 }
 0x39c   :  { %929 = vmatprep.subr.bf16.mxu1 %v5627_v29  ;;  %v5073_v29 = vld [vmem:[%s6708_s6 + $0x18] sm:$0xff]  }
 0x39f   :  { %930 = vmatpush1.bf16.msra.mxu1 %v5635_v31 }
 0x3a0   :  { %931 = vmatprep.subr.bf16.mxu1 %v5640_v32  ;;  %v5074_v32 = vld [vmem:[%s6708_s6 + $0x40] sm:$0xff]  }
 0x3a3   :  { %932 = vmatpush1.bf16.msra.mxu1 %v5647_v33 }
 0x3a4   :  { %1724 = vmatprep.subr.bf16.mxu1 %v5463_v1  ;;  %v5066_v1 = vld [vmem:[%s6708_s6 + $0x20] sm:$0xff]  }
 0x3a5   :  { %4616 = vmatprep.mubr.msk.bf16.mxu0 %vm1009_vm7, %v5066_v1 }
 0x3a6   :  { %950 = vmatmul.mubr.bf16.vlgmr.msra.gmra.mrb[12].mxu1 %v5767_v54 }
 0x3a7   :  { %959 = vmatprep.mubr.bf16.mxu1 %v5321_v0  ;;  %1725 = vmatpush1.bf16.msra.mxu1 %v5468_v2 }
 0x3a8   :  { %1726 = vmatprep.subr.bf16.mxu1 %v5474_v3 }
 0x3ab   :  { %1727 = vmatpush1.bf16.msra.mxu1 %v5480_v4 }
 0x3ac   :  { %1728 = vmatprep.subr.bf16.mxu1 %v5486_v5 }
 0x3ae   :  { %960 = vmatmul.mubr.bf16.gmra.mrb[16].mxu1 %v855_v41 }
 0x3af   :  { %1729 = vmatpush1.bf16.msra.mxu1 %v5492_v6  ;;  %1756 = vmatprep.mubr.bf16.mxu1 %v5321_v0 }
 0x3b0   :  { %1730 = vmatprep.subr.bf16.mxu1 %v5498_v7 }
 0x3b3   :  { %1731 = vmatpush1.bf16.msra.mxu1 %v5509_v9 }
 0x3b4   :  { %1732 = vmatprep.subr.bf16.mxu1 %v5514_v10 }
 0x3b7   :  { %1733 = vmatpush1.bf16.msra.mxu1 %v5544_v15  ;;  %v5068_v15 = vld [vmem:[%s6708_s6 + $0x30] sm:$0xff]  }
 0x3b8   :  { %1734 = vmatprep.subr.bf16.mxu1 %v5550_v16  ;;  %v5069_v16 = vld [vmem:[%s6708_s6 + $0x38] sm:$0xff]  }
 0x3bb   :  { %1735 = vmatpush1.bf16.msra.mxu1 %v5568_v19  ;;  %v5072_v19 = vld [vmem:[%s6708_s6 + $0x10] sm:$0xff]  }
 0x3bc   :  { %1736 = vmatprep.subr.bf16.mxu1 %v5574_v20 }
 0x3bf   :  { %1737 = vmatpush1.bf16.msra.mxu1 %v5579_v21 }
 0x3c0   :  { %1738 = vmatprep.subr.bf16.mxu1 %v5595_v24 }
 0x3c3   :  { %1739 = vmatpush1.bf16.msra.mxu1 %v5613_v27 }
 0x3c4   :  { %1797 = vmatprep.subr.bf16.mxu1 %v5503_v8 }
 0x459   :  { %v898_v2 = vpop.f32.mrb[4].mxu1 }
 0x45a   :  { %v900_v3 = vpop.f32.mrb[5].mxu1 }
 0x45b   :  { %v902_v4 = vpop.f32.mrb[6].mxu1 }
 0x45c   :  { %v987_v5 = vpack.c.bf16 %v902_v4, %v898_v2  ;;  %v904_v6 = vpop.f32.mrb[7].mxu1 }
 0x45d   :  { %v1193_v7 = vpack.c.bf16 %v904_v6, %v900_v3 }
 0x45e   :  { %4612 = vmatprep.subr.bf16.mxu0 %v987_v5 }
 0x45f   :  { %4613 = vmatpush3.bf16.msra.mxu0 %v987_v5 }
 0x461   :  { %v908_v9 = vpop.f32.mrb[8].mxu1 }
 0x462   :  { %v910_v10 = vpop.f32.mrb[9].mxu1 }
 0x463   :  { %v912_v11 = vpop.f32.mrb[10].mxu1 }
 0x464   :  { %v988_v12 = vpack.c.bf16 %v912_v11, %v908_v9  ;;  %v914_v8 = vpop.f32.mrb[11].mxu1 }
 0x465   :  { %v1194_v13 = vpack.c.bf16 %v914_v8, %v910_v10  ;;  %v1573_v8 = vpop.permute.xlu0 %1572 }
 0x466   :  { %4614 = vmatprep.subr.bf16.mxu0 %v988_v12 }
 0x467   :  { %4615 = vmatpush3.bf16.msra.mxu0 %v988_v12 }
 0x468   :  { %4624 = vmatprep.subr.bf16.mxu0 %v5767_v54 }
 0x46a   :  { %4617 = vmatmul.mubr.msk.bf16.vlgmr.msra.gmra.mrb[8].mxu0 %vm1009_vm7, %v5067_v14 }
 0x46b   :  { %4625 = vmatpush3.bf16.msra.mxu0 %v5767_v54  ;;  %4620 = vmatprep.mubr.msk.bf16.mxu0 %vm1009_vm7, %v5068_v15  ;;  %v1558_v54 = vpop.permute.xlu1 %1557 }
 0x46c   :  { %4626 = vmatprep.subr.bf16.mxu0 %v855_v41 }
 0x46f   :  { %4627 = vmatpush3.bf16.msra.mxu0 %v855_v41 }
 0x470   :  { %4636 = vmatprep.subr.bf16.mxu0 %v1193_v7 }
 0x472   :  { %4621 = vmatmul.mubr.msk.bf16.gmra.mrb[12].mxu0 %vm1009_vm7, %v5069_v16 }
 0x473   :  { %4628 = vmatprep.mubr.msk.bf16.mxu0 %vm1009_vm7, %v5070_v17 }
 0x479   :  { %v951_v20 = vpop.f32.mrb[12].mxu1 }
 0x47a   :  { %v953_v21 = vpop.f32.mrb[13].mxu1  ;;  %4629 = vmatmul.mubr.msk.bf16.vlgmr.msra.gmra.mrb[8].mxu0 %vm1009_vm7, %v5071_v18  ;;  %v1300_v23 = vand.u32 2147483647, %v951_v20 }
 0x47b   :  { %v955_v22 = vpop.f32.mrb[14].mxu1  ;;  %4637 = vmatpush3.bf16.msra.mxu0 %v1193_v7  ;;  %4632 = vmatprep.mubr.msk.bf16.mxu0 %vm1009_vm7, %v5072_v19  ;;  %v1420_v26 = vand.u32 2147483647, %v953_v21  ;;  %v1568_v7 = vpop.permute.xlu1 %1567 }
 0x47c   :  { %v1301_v24 = vand.u32 2147483647, %v955_v22  ;;  %v957_v25 = vpop.f32.mrb[15].mxu1  ;;  %4638 = vmatprep.subr.bf16.mxu0 %v1194_v13 }
 0x47d   :  { %v1421_v27 = vand.u32 2147483647, %v957_v25 }
 0x47e   :  { %v1313_v28 = vpack.c.bf16 %v1301_v24, %v1300_v23 }
 0x47f   :  { %v1433_v31 = vpack.c.bf16 %v1421_v27, %v1420_v26  ;;  %4639 = vmatpush3.bf16.msra.mxu0 %v1194_v13  ;;  %v1578_v21 = vpop.permute.xlu1 %1577 }
 0x480   :  { %4648 = vmatprep.subr.bf16.mxu0 %v1313_v28 }
 0x481   :  { %v961_v33 = vpop.f32.mrb[16].mxu1 }
 0x482   :  { %v963_v44 = vpop.f32.mrb[17].mxu1  ;;  %4633 = vmatmul.mubr.msk.bf16.gmra.mrb[12].mxu0 %vm1009_vm7, %v5073_v29  ;;  %v1302_v53 = vand.u32 2147483647, %v961_v33 }
 0x483   :  { %v965_v48 = vpop.f32.mrb[18].mxu1  ;;  %4640 = vmatprep.mubr.msk.bf16.mxu0 %vm1009_vm7, %v5074_v32  ;;  %v1422_v61 = vand.u32 2147483647, %v963_v44 }
 0x484   :  { %v1303_v59 = vand.u32 2147483647, %v965_v48  ;;  %v967_v60 = vpop.f32.mrb[19].mxu1 }
 0x485   :  { %v1423_v62 = vand.u32 2147483647, %v967_v60 }
 0x486   :  { %v1314_v63 = vpack.c.bf16 %v1303_v59, %v1302_v53 }
 0x487   :  { %v1434_v34 = vpack.c.bf16 %v1423_v62, %v1422_v61 }
 0x48a   :  { %4641 = vmatmul.mubr.msk.bf16.vlgmr.msra.gmra.mrb[8].mxu0 %vm1009_vm7, %v5075_v30 }
 0x48b   :  { %4649 = vmatpush3.bf16.msra.mxu0 %v1313_v28  ;;  %4644 = vmatprep.mubr.msk.bf16.mxu0 %vm1009_vm7, %v5076_v35 }
 0x48c   :  { %4650 = vmatprep.subr.bf16.mxu0 %v1314_v63 }
 0x48f   :  { %4651 = vmatpush3.bf16.msra.mxu0 %v1314_v63 }
 0x490   :  { %4660 = vmatprep.subr.bf16.mxu0 %v1433_v31 }
 0x492   :  { %4645 = vmatmul.mubr.msk.bf16.gmra.mrb[12].mxu0 %vm1009_vm7, %v5077_v36 }
 0x493   :  { %4652 = vmatprep.mubr.msk.bf16.mxu0 %vm1009_vm7, %v5078_v37 }
 0x49a   :  { %4653 = vmatmul.mubr.msk.bf16.vlgmr.msra.gmra.mrb[8].mxu0 %vm1009_vm7, %v5079_v38 }
 0x49b   :  { %4661 = vmatpush3.bf16.msra.mxu0 %v1433_v31  ;;  %4656 = vmatprep.mubr.msk.bf16.mxu0 %vm1009_vm7, %v5080_v39 }
 0x49c   :  { %4662 = vmatprep.subr.bf16.mxu0 %v1434_v34 }
 0x49f   :  { %4663 = vmatpush3.bf16.msra.mxu0 %v1434_v34 }
 0x4a2   :  { %4657 = vmatmul.mubr.msk.bf16.gmra.mrb[12].mxu0 %vm1009_vm7, %v5081_v40 }
 0x4a3   :  { %4664 = vmatprep.mubr.msk.bf16.mxu0 %vm1009_vm7, %v5082_v42 }
 0x4aa   :  { %4665 = vmatmul.mubr.msk.bf16.vlgmr.msra.gmra.mrb[8].mxu0 %vm1009_vm7, %v5083_v43 }
 0x4ab   :  { %4668 = vmatprep.mubr.msk.bf16.mxu0 %vm1009_vm7, %v5084_v45 }
 0x4b2   :  { %4669 = vmatmul.mubr.msk.bf16.gmra.mrb[12].mxu0 %vm1009_vm7, %v5085_v46 }
 0x57d   :  { %v4666_v55 = vpop.f32.mrb[8].mxu0 }
 0x57e   :  { %v1582_v56 = vadd.f32 %v4666_v55, %v1553_v51  ;;  %v1501_v57 = vpop.f32.mrb[9].mxu0 }
 0x57f   :  { %v1580_v41 = vadd.f32 %v1543_v47, %v1501_v57  ;;  %v4667_v1 = vpop.f32.mrb[10].mxu0 }
 0x580   :  { %v1583_v2 = vadd.f32 %v4667_v1, %v1558_v54  ;;  %v1504_v3 = vpop.f32.mrb[11].mxu0  ;;  %v1598_v4 = vmul.f32 0.0, %v1582_v56  ;;  %vm1590_vm9 = vcmp.gt.f32.partialorder %v1582_v56, 0.0 }
 0x581   :  { %v1596_v5 = vmul.f32 0.0, %v1580_v41  ;;  %v1581_v6 = vadd.f32 %v1548_v52, %v1504_v3  ;;  %vm1588_vm8 = vcmp.gt.f32.partialorder %v1580_v41, 0.0 }
 0x582   :  { %v1599_v11 = vmul.f32 0.0, %v1583_v2  ;;  %v1606_v15 = vsel %vm1590_vm9, %v1582_v56, %v1598_v4  ;;  %vm1591_vm11 = vcmp.gt.f32.partialorder %v1583_v2, 0.0 }
 0x583   :  { %v1597_v9 = vmul.f32 0.0, %v1581_v6  ;;  %v1604_v10 = vsel %vm1588_vm8, %v1580_v41, %v1596_v5  ;;  %vm1589_vm10 = vcmp.gt.f32.partialorder %v1581_v6, 0.0  ;;  %v1614_v24 = vmul.f32 %v5733_v50, %v1606_v15 }
 0x584   :  { %v1612_v12 = vmul.f32 %v5733_v50, %v1604_v10  ;;  %v1607_v25 = vsel %vm1591_vm11, %v1583_v2, %v1599_v11  ;;  %vm5323_vm8 = vmmov 0  }
 0x585   :  { %v4670_v13 = vpop.f32.mrb[12].mxu0  ;;  %v1605_v14 = vsel %vm1589_vm10, %v1581_v6, %v1597_v9  ;;  %v1615_v33 = vmul.f32 %v5733_v50, %v1607_v25 }
 0x586   :  { %v1586_v16 = vadd.f32 %v4670_v13, %v1573_v8  ;;  %v1517_v17 = vpop.f32.mrb[13].mxu0  ;;  %1620 = vadd.xlane.f32.xlu0 %v1612_v12  ;;  %v1613_v18 = vmul.f32 %v5733_v50, %v1605_v14 }
 0x587   :  { %v1584_v19 = vadd.f32 %v1563_v58, %v1517_v17  ;;  %v4671_v20 = vpop.f32.mrb[14].mxu0 }
 0x588   :  { %v1602_v22 = vmul.f32 0.0, %v1586_v16  ;;  %1622 = vadd.xlane.f32.xlu1 %v1613_v18  ;;  %v1520_v23 = vpop.f32.mrb[15].mxu0  ;;  %v1587_v27 = vadd.f32 %v4671_v20, %v1578_v21  ;;  %vm1594_vm13 = vcmp.gt.f32.partialorder %v1586_v16, 0.0  ;;  %v1722_v20 = vld [vmem:[%s6711_s9 + $0x10] sm:$0xff]  ;;  %v1723_v21 = vld [vmem:[%s6711_s9 + $0x18] sm:$0xff] }
 0x589   :  { %v1600_v26 = vmul.f32 0.0, %v1584_v19  ;;  %v1585_v28 = vadd.f32 %v1568_v7, %v1520_v23  ;;  %vm1592_vm12 = vcmp.gt.f32.partialorder %v1584_v19, 0.0  ;;  %v2291_v23 = vld [vmem:[%s6713_s11 + $0x8] sm:$0xff] }
 0x58a   :  { %1624 = vadd.xlane.f32.xlu0 %v1614_v24  ;;  %v1603_v44 = vmul.f32 0.0, %v1587_v27  ;;  %v1610_v48 = vsel %vm1594_vm13, %v1586_v16, %v1602_v22  ;;  %vm1595_vm15 = vcmp.gt.f32.partialorder %v1587_v27, 0.0  ;;  %v1721_v22 = vld [vmem:[%s6711_s9 + $0x8] sm:$0xff]  ;;  %v2290_v24 = vld [vmem:[%s6713_s11] sm:$0xff] }
 0x58b   :  { %v1601_v29 = vmul.f32 0.0, %v1585_v28  ;;  %v1608_v31 = vsel %vm1592_vm12, %v1584_v19, %v1600_v26  ;;  %vm1593_vm14 = vcmp.gt.f32.partialorder %v1585_v28, 0.0  ;;  %v1618_v59 = vmul.f32 %v5733_v50, %v1610_v48  ;;  %v1720_v19 = vld [vmem:[%s6711_s9] sm:$0xff]  ;;  %v2292_v26 = vld [vmem:[%s6713_s11 + $0x10] sm:$0xff] }
 0x58c   :  { %v1616_v32 = vmul.f32 %v5733_v50, %v1608_v31  ;;  %v1611_v61 = vsel %vm1595_vm15, %v1587_v27, %v1603_v44 }
 0x58d   :  { %v1609_v53 = vsel %vm1593_vm14, %v1585_v28, %v1601_v29  ;;  %v1619_v62 = vmul.f32 %v5733_v50, %v1611_v61 }
 0x58e   :  { %1628 = vadd.xlane.f32.xlu1 %v1616_v32  ;;  %1626 = vadd.xlane.f32.xlu0 %v1615_v33  ;;  %v1617_v60 = vmul.f32 %v5733_v50, %v1609_v53 }
 0x592   :  { %1632 = vadd.xlane.f32.xlu1 %v1618_v59  ;;  %1630 = vadd.xlane.f32.xlu0 %v1617_v60 }
 0x596   :  { %1634 = vadd.xlane.f32.xlu0 %v1619_v62 }
 0x613   :  { %v1621_v63 = vpop.xlane.xlu0 %1620 }
 0x614   :  { %v1636_v30 = vmul.f32 0.083333336, %v1621_v63 }
 0x615   :  { %v1623_v34 = vpop.xlane.xlu1 %1622 }
 0x616   :  { %v1644_v35 = vsub.f32 %v1604_v10, %v1636_v30  ;;  %v1637_v36 = vmul.f32 0.083333336, %v1623_v34 }
 0x617   :  { %v1625_v37 = vpop.xlane.xlu0 %1624 }
 0x618   :  { %v1645_v38 = vsub.f32 %v1605_v14, %v1637_v36  ;;  %v1638_v39 = vmul.f32 0.083333336, %v1625_v37  ;;  %v5898_v40 = vmul.f32 %v5733_v50, %v1644_v35 }
 0x61a   :  { %v1646_v42 = vsub.f32 %v1606_v15, %v1638_v39  ;;  %v1660_v43 = vmul.f32 %v5898_v40, %v5898_v40  ;;  %v5903_v45 = vmul.f32 %v5733_v50, %v1645_v38 }
 0x61b   :  { %v1627_v46 = vpop.xlane.xlu0 %1626  ;;  %v1629_v47 = vpop.xlane.xlu1 %1628 }
 0x61c   :  { %v1639_v51 = vmul.f32 0.083333336, %v1627_v46  ;;  %v1640_v52 = vmul.f32 0.083333336, %v1629_v47  ;;  %1668 = vadd.xlane.f32.xlu1 %v1660_v43  ;;  %v1661_v54 = vmul.f32 %v5903_v45, %v5903_v45  ;;  %v5908_v55 = vmul.f32 %v5733_v50, %v1646_v42 }
 0x61e   :  { %v1647_v56 = vsub.f32 %v1607_v25, %v1639_v51  ;;  %v1648_v57 = vsub.f32 %v1608_v31, %v1640_v52  ;;  %1670 = vadd.xlane.f32.xlu0 %v1661_v54  ;;  %v1662_v58 = vmul.f32 %v5908_v55, %v5908_v55  ;;  %v2293_v25 = vld [vmem:[%s6713_s11 + $0x18] sm:$0xff] }
 0x61f   :  { %v1631_v41 = vpop.xlane.xlu0 %1630  ;;  %v1633_v1 = vpop.xlane.xlu1 %1632 }
 0x620   :  { %v1641_v2 = vmul.f32 0.083333336, %v1631_v41  ;;  %v1642_v3 = vmul.f32 0.083333336, %v1633_v1  ;;  %1672 = vadd.xlane.f32.xlu1 %v1662_v58  ;;  %v5913_v4 = vmul.f32 %v5733_v50, %v1647_v56  ;;  %v5916_v5 = vmul.f32 %v5733_v50, %v1648_v57  ;;  %v5969_v58 = vld [vmem:[%s6728_s2 + $0x8] ss:$16 sps:$4 sm:$0xff]  }
 0x622   :  { %v1649_v6 = vsub.f32 %v1609_v53, %v1641_v2  ;;  %v1650_v7 = vsub.f32 %v1610_v48, %v1642_v3  ;;  %v1663_v9 = vmul.f32 %v5913_v4, %v5913_v4  ;;  %v1664_v10 = vmul.f32 %v5916_v5, %v5916_v5  ;;  %v5984_v2 = vld [vmem:[%s6728_s2 + $0x28] ss:$16 sps:$4 sm:$0xff]  }
 0x623   :  { %v1635_v11 = vpop.xlane.xlu0 %1634 }
 0x624   :  { %v1643_v12 = vmul.f32 0.083333336, %v1635_v11  ;;  %1674 = vadd.xlane.f32.xlu0 %v1663_v9  ;;  %1676 = vadd.xlane.f32.xlu1 %v1664_v10  ;;  %v5923_v8 = vmul.f32 %v5733_v50, %v1649_v6  ;;  %v5926_v13 = vmul.f32 %v5733_v50, %v1650_v7  ;;  %v5992_v6 = vld [vmem:[%s6728_s2 + $0x4c] ss:$16 sps:$4 sm:$0xff]   ;;  %v5999_v7 = vld [vmem:[%s6728_s2 + $0x48] ss:$16 sps:$4 sm:$0xff]  }
 0x625   :  { %v6006_v9 = vld [vmem:[%s6728_s2 + $0x6c] ss:$16 sps:$4 sm:$0xff]  }
 0x626   :  { %v1651_v14 = vsub.f32 %v1611_v61, %v1643_v12  ;;  %v1665_v15 = vmul.f32 %v5923_v8, %v5923_v8  ;;  %v1666_v16 = vmul.f32 %v5926_v13, %v5926_v13  ;;  %v6014_v12 = vld [vmem:[%s6728_s2 + $0x68] ss:$16 sps:$4 sm:$0xff]  }
 0x628   :  { %1678 = vadd.xlane.f32.xlu0 %v1665_v15  ;;  %1680 = vadd.xlane.f32.xlu1 %v1666_v16  ;;  %v5933_v17 = vmul.f32 %v5733_v50, %v1651_v14  ;;  %v6022_v15 = vld [vmem:[%s6728_s2 + $0x8c] ss:$16 sps:$4 sm:$0xff]  }
 0x62a   :  { %v1667_v18 = vmul.f32 %v5933_v17, %v5933_v17 }
 0x62c   :  { %1682 = vadd.xlane.f32.xlu0 %v1667_v18  ;;  %v6036_v18 = vld [vmem:[%s6728_s2 + $0xac] ss:$16 sps:$4 sm:$0xff]  }
 0x639   :  { %2266 = vperm.xlu1 %5007, %v1720_v19  }
 0x63d   :  { %2276 = vperm.xlu1 %5007, %v1722_v20  }
 0x641   :  { %2281 = vperm.xlu1 %5007, %v1723_v21   ;;  %v6044_v21 = vld [vmem:[%s6728_s2 + $0xa8] ss:$16 sps:$4 sm:$0xff]  }
 0x642   :  { %2271 = vperm.xlu0 %5006, %v1721_v22  }
 0x645   :  { %2784 = vperm.xlu1 %5007, %v2291_v23   ;;  %v6052_v23 = vld [vmem:[%s6728_s2 + $0xcc] ss:$16 sps:$4 sm:$0xff]  }
 0x646   :  { %2779 = vperm.xlu0 %5006, %v2290_v24   ;;  %v6072_v24 = vld [vmem:[%s6728_s2 + $0xe8] ss:$16 sps:$4 sm:$0xff]  }
 0x649   :  { %2794 = vperm.xlu1 %5007, %v2293_v25   ;;  %v6078_v25 = vld [vmem:[%s6728_s2 + $0x4] ss:$16 sps:$4 sm:$0xff]  }
 0x64a   :  { %2789 = vperm.xlu0 %5006, %v2292_v26   ;;  %v6086_v26 = vld [vmem:[%s6728_s2] ss:$16 sps:$4 sm:$0xff]  }
 0x6a9   :  { %v1669_v27 = vpop.xlane.xlu1 %1668 }
 0x6aa   :  { %v1684_v28 = vmul.f32 0.083333336, %v1669_v27  ;;  %v6092_v27 = vld [vmem:[%s6728_s2 + $0x24] ss:$16 sps:$4 sm:$0xff]  }
 0x6ab   :  { %v1671_v29 = vpop.xlane.xlu0 %1670 }
 0x6ac   :  { %v1692_v31 = vadd.f32 1e-05, %v1684_v28  ;;  %v1685_v32 = vmul.f32 0.083333336, %v1671_v29  ;;  %v6098_v28 = vld [vmem:[%s6728_s2 + $0x20] ss:$16 sps:$4 sm:$0xff]  }
 0x6ad   :  { %v1673_v33 = vpop.xlane.xlu1 %1672  ;;  %v6104_v29 = vld [vmem:[%s6728_s2 + $0x44] ss:$16 sps:$4 sm:$0xff]  }
 0x6ae   :  { %5130 = vrsqrt.f32 %v1692_v31  ;;  %v1693_v44 = vadd.f32 1e-05, %v1685_v32  ;;  %v1686_v48 = vmul.f32 0.083333336, %v1673_v33  ;;  %v6112_v31 = vld [vmem:[%s6728_s2 + $0x40] ss:$16 sps:$4 sm:$0xff]  }
 0x6af   :  { %v6118_v32 = vld [vmem:[%s6728_s2 + $0x64] ss:$16 sps:$4 sm:$0xff]   ;;  %v6124_v33 = vld [vmem:[%s6728_s2 + $0x60] ss:$16 sps:$4 sm:$0xff]  }
 0x6b0   :  { %5132 = vrsqrt.f32 %v1693_v44  ;;  %v1694_v53 = vadd.f32 1e-05, %v1686_v48  ;;  %v6130_v44 = vld [vmem:[%s6728_s2 + $0x84] ss:$16 sps:$4 sm:$0xff]   ;;  %v6138_v48 = vld [vmem:[%s6728_s2 + $0x80] ss:$16 sps:$4 sm:$0xff]  }
 0x6b1   :  { %v1675_v59 = vpop.xlane.xlu0 %1674  ;;  %v1677_v61 = vpop.xlane.xlu1 %1676 }
 0x6b2   :  { %v1687_v60 = vmul.f32 0.083333336, %v1675_v59  ;;  %5134 = vrsqrt.f32 %v1694_v53  ;;  %v1688_v30 = vmul.f32 0.083333336, %v1677_v61  ;;  %v6144_v53 = vld [vmem:[%s6728_s2 + $0xa4] ss:$16 sps:$4 sm:$0xff]  }
 0x6b3   :  { %v6150_v59 = vld [vmem:[%s6728_s2 + $0xa0] ss:$16 sps:$4 sm:$0xff]  }
 0x6b4   :  { %v1695_v62 = vadd.f32 1e-05, %v1687_v60  ;;  %v1696_v39 = vadd.f32 1e-05, %v1688_v30  ;;  %v6156_v60 = vld [vmem:[%s6728_s2 + $0xc4] ss:$16 sps:$4 sm:$0xff]  }
 0x6b5   :  { %v1679_v63 = vpop.xlane.xlu0 %1678  ;;  %v1681_v46 = vpop.xlane.xlu1 %1680  ;;  %v6163_v61 = vld [vmem:[%s6728_s2 + $0xc0] ss:$16 sps:$4 sm:$0xff]   ;;  %v6182_v30 = vld [vmem:[%s6728_s2 + $0xc] ss:$16 sps:$4 sm:$0xff]  }
 0x6b6   :  { %5136 = vrsqrt.f32 %v1695_v62  ;;  %v1689_v34 = vmul.f32 0.083333336, %v1679_v63  ;;  %v1690_v52 = vmul.f32 0.083333336, %v1681_v46  ;;  %v6170_v62 = vld [vmem:[%s6728_s2 + $0xe4] ss:$16 sps:$4 sm:$0xff]  }
 0x6b7   :  { %v6176_v63 = vld [vmem:[%s6728_s2 + $0xe0] ss:$16 sps:$4 sm:$0xff]  }
 0x6b8   :  { %v5131_v35 = vpop.eup %5130  ;;  %v1697_v36 = vadd.f32 1e-05, %v1689_v34  ;;  %v1698_v41 = vadd.f32 1e-05, %v1690_v52  ;;  %v5086_v34 = vld [vmem:[%s6710_s8 + $0x10] sm:$0xff]  }
 0x6b9   :  { %v1683_v37 = vpop.xlane.xlu0 %1682  ;;  %v1708_v42 = vmul.f32 %v5131_v35, %v5898_v40  ;;  %v5976_v40 = vld [vmem:[%s6728_s2 + $0x2c] ss:$16 sps:$4 sm:$0xff]   ;;  %4680 = vmatprep.mubr.msk.bf16.mxu0 %vm1893_vm2, %v5086_v34 }
 0x6ba   :  { %v5133_v38 = vpop.eup %5132  ;;  %5138 = vrsqrt.f32 %v1697_v36  ;;  %v1691_v47 = vmul.f32 0.083333336, %v1683_v37  ;;  %v5087_v34 = vld [vmem:[%s6710_s8 + $0x18] sm:$0xff]  }
 0x6bb   :  { %v1709_v43 = vmul.f32 %v5133_v38, %v5903_v45  ;;  %5140 = vrsqrt.f32 %v1696_v39 }
 0x6bc   :  { %v5135_v54 = vpop.eup %5134  ;;  %v1699_v57 = vadd.f32 1e-05, %v1691_v47 }
 0x6bd   :  { %v5963_v51 = vpack.c.bf16 %v1709_v43, %v1708_v42  ;;  %v1710_v1 = vmul.f32 %v5135_v54, %v5908_v55 }
 0x6be   :  { %5142 = vrsqrt.f32 %v1699_v57 }
 0x6bf   :  { %1757 = vmatmul.mubr.bf16.vlgmr.msra.gmra.mrb[20].mxu1 %v5963_v51  ;;  %5144 = vrsqrt.f32 %v1698_v41 }
 0x6c0   :  { %v5137_v56 = vpop.eup %5136  ;;  %1798 = vmatpush1.bf16.msra.mxu1 %v5969_v58  ;;  %1766 = vmatprep.mubr.bf16.mxu1 %v5321_v0 }
 0x6c1   :  { %1799 = vmatprep.subr.bf16.mxu1 %v5976_v40  ;;  %v1711_v45 = vmul.f32 %v5137_v56, %v5913_v4 }
 0x6c3   :  { %v5987_v3 = vpack.c.bf16 %v1711_v45, %v1710_v1 }
 0x6c4   :  { %1800 = vmatpush1.bf16.msra.mxu1 %v5984_v2  ;;  %v5139_v4 = vpop.eup %5138 }
 0x6c5   :  { %1801 = vmatprep.subr.bf16.mxu1 %v5992_v6  ;;  %v5141_v55 = vpop.eup %5140  ;;  %v1713_v10 = vmul.f32 %v5139_v4, %v5923_v8  ;;  %v6029_v8 = vld [vmem:[%s6728_s2 + $0x88] ss:$16 sps:$4 sm:$0xff]  }
 0x6c6   :  { %v1712_v11 = vmul.f32 %v5141_v55, %v5916_v5 }
 0x6c7   :  { %1767 = vmatmul.mubr.bf16.gmra.mrb[24].mxu1 %v5987_v3 }
 0x6c8   :  { %1802 = vmatpush1.bf16.msra.mxu1 %v5999_v7  ;;  %1776 = vmatprep.mubr.bf16.mxu1 %v5321_v0  ;;  %v6017_v14 = vpack.c.bf16 %v1713_v10, %v1712_v11  ;;  %v5143_v16 = vpop.eup %5142 }
 0x6c9   :  { %1803 = vmatprep.subr.bf16.mxu1 %v6006_v9  ;;  %v5145_v5 = vpop.eup %5144  ;;  %v1715_v19 = vmul.f32 %v5143_v16, %v5933_v17  ;;  %v6066_v17 = vld [vmem:[%s6728_s2 + $0xec] ss:$16 sps:$4 sm:$0xff]  }
 0x6ca   :  { %v1714_v20 = vmul.f32 %v5145_v5, %v5926_v13  ;;  %v6059_v13 = vld [vmem:[%s6728_s2 + $0xc8] ss:$16 sps:$4 sm:$0xff]  }
 0x6cc   :  { %1804 = vmatpush1.bf16.msra.mxu1 %v6014_v12  ;;  %v6047_v22 = vpack.c.bf16 %v1715_v19, %v1714_v20 }
 0x6cd   :  { %1805 = vmatprep.subr.bf16.mxu1 %v6022_v15 }
 0x6cf   :  { %1777 = vmatmul.mubr.bf16.gmra.mrb[28].mxu1 %v6017_v14 }
 0x6d0   :  { %1806 = vmatpush1.bf16.msra.mxu1 %v6029_v8  ;;  %1786 = vmatprep.mubr.bf16.mxu1 %v5321_v0 }
 0x6d1   :  { %1807 = vmatprep.subr.bf16.mxu1 %v6036_v18 }
 0x6d4   :  { %1808 = vmatpush1.bf16.msra.mxu1 %v6044_v21 }
 0x6d5   :  { %1809 = vmatprep.subr.bf16.mxu1 %v6052_v23 }
 0x6d7   :  { %1787 = vmatmul.mubr.bf16.gmra.mrb[32].mxu1 %v6047_v22 }
 0x6d8   :  { %1810 = vmatpush1.bf16.msra.mxu1 %v6059_v13  ;;  %1829 = vmatprep.mubr.bf16.mxu1 %v5321_v0 }
 0x6d9   :  { %1811 = vmatprep.subr.bf16.mxu1 %v6066_v17 }
 0x6dc   :  { %1812 = vmatpush1.bf16.msra.mxu1 %v6072_v24 }
 0x6dd   :  { %2294 = vmatprep.subr.bf16.mxu1 %v6078_v25 }
 0x6df   :  { %1830 = vmatmul.mubr.bf16.vlgmr.msra.gmra.mrb[36].mxu1 %v5963_v51 }
 0x6e0   :  { %1839 = vmatprep.mubr.bf16.mxu1 %v5321_v0  ;;  %2295 = vmatpush1.bf16.msra.mxu1 %v6086_v26 }
 0x6e1   :  { %2296 = vmatprep.subr.bf16.mxu1 %v6092_v27 }
 0x6e4   :  { %2297 = vmatpush1.bf16.msra.mxu1 %v6098_v28 }
 0x6e5   :  { %2298 = vmatprep.subr.bf16.mxu1 %v6104_v29 }
 0x6e7   :  { %1840 = vmatmul.mubr.bf16.gmra.mrb[40].mxu1 %v5987_v3 }
 0x6e8   :  { %1849 = vmatprep.mubr.bf16.mxu1 %v5321_v0  ;;  %2299 = vmatpush1.bf16.msra.mxu1 %v6112_v31 }
 0x6e9   :  { %2300 = vmatprep.subr.bf16.mxu1 %v6118_v32 }
 0x6ec   :  { %2301 = vmatpush1.bf16.msra.mxu1 %v6124_v33 }
 0x6ed   :  { %2302 = vmatprep.subr.bf16.mxu1 %v6130_v44 }
 0x6ef   :  { %1850 = vmatmul.mubr.bf16.gmra.mrb[44].mxu1 %v6017_v14 }
 0x6f0   :  { %1859 = vmatprep.mubr.bf16.mxu1 %v5321_v0  ;;  %2303 = vmatpush1.bf16.msra.mxu1 %v6138_v48 }
 0x6f1   :  { %2304 = vmatprep.subr.bf16.mxu1 %v6144_v53 }
 0x6f4   :  { %2305 = vmatpush1.bf16.msra.mxu1 %v6150_v59 }
 0x6f5   :  { %2306 = vmatprep.subr.bf16.mxu1 %v6156_v60 }
 0x6f7   :  { %1860 = vmatmul.mubr.bf16.gmra.mrb[48].mxu1 %v6047_v22 }
 0x6f8   :  { %2307 = vmatpush1.bf16.msra.mxu1 %v6163_v61  ;;  %2326 = vmatprep.mubr.bf16.mxu1 %v5321_v0 }
 0x6f9   :  { %2308 = vmatprep.subr.bf16.mxu1 %v6170_v62 }
 0x6fc   :  { %2309 = vmatpush1.bf16.msra.mxu1 %v6176_v63 }
 0x6fd   :  { %2347 = vmatprep.subr.bf16.mxu1 %v6182_v30 }
 0x792   :  { %v1758_v35 = vpop.f32.mrb[20].mxu1 }
 0x793   :  { %v1760_v36 = vpop.f32.mrb[21].mxu1 }
 0x794   :  { %v1762_v37 = vpop.f32.mrb[22].mxu1 }
 0x795   :  { %v1879_v38 = vpack.c.bf16 %v1762_v37, %v1758_v35  ;;  %v1764_v39 = vpop.f32.mrb[23].mxu1  ;;  %v5088_v35 = vld [vmem:[%s6710_s8] sm:$0xff]  }
 0x796   :  { %v6189_v42 = vpack.c.bf16 %v1764_v39, %v1760_v36 }
 0x797   :  { %4672 = vmatprep.subr.bf16.mxu0 %v1879_v38 }
 0x798   :  { %4673 = vmatpush3.bf16.msra.mxu0 %v1879_v38 }
 0x79a   :  { %v1768_v43 = vpop.f32.mrb[24].mxu1 }
 0x79b   :  { %v1770_v46 = vpop.f32.mrb[25].mxu1 }
 0x79c   :  { %v1772_v47 = vpop.f32.mrb[26].mxu1 }
 0x79d   :  { %v1880_v52 = vpack.c.bf16 %v1772_v47, %v1768_v43  ;;  %v1774_v54 = vpop.f32.mrb[27].mxu1 }
 0x79e   :  { %v6191_v56 = vpack.c.bf16 %v1774_v54, %v1770_v46 }
 0x79f   :  { %4674 = vmatprep.subr.bf16.mxu0 %v1880_v52 }
 0x7a0   :  { %4675 = vmatpush3.bf16.msra.mxu0 %v1880_v52 }
 0x7a2   :  { %v1778_v57 = vpop.f32.mrb[28].mxu1 }
 0x7a3   :  { %v1780_v45 = vpop.f32.mrb[29].mxu1 }
 0x7a4   :  { %v1782_v41 = vpop.f32.mrb[30].mxu1 }
 0x7a5   :  { %v1881_v1 = vpack.c.bf16 %v1782_v41, %v1778_v57  ;;  %v1784_v4 = vpop.f32.mrb[31].mxu1 }
 0x7a6   :  { %v6193_v55 = vpack.c.bf16 %v1784_v4, %v1780_v45 }
 0x7a7   :  { %4676 = vmatprep.subr.bf16.mxu0 %v1881_v1 }
 0x7a8   :  { %4677 = vmatpush3.bf16.msra.mxu0 %v1881_v1 }
 0x7aa   :  { %v1788_v10 = vpop.f32.mrb[32].mxu1 }
 0x7ab   :  { %v1790_v11 = vpop.f32.mrb[33].mxu1 }
 0x7ac   :  { %v1792_v16 = vpop.f32.mrb[34].mxu1 }
 0x7ad   :  { %v1882_v5 = vpack.c.bf16 %v1792_v16, %v1788_v10  ;;  %v1794_v19 = vpop.f32.mrb[35].mxu1 }
 0x7ae   :  { %v6195_v20 = vpack.c.bf16 %v1794_v19, %v1790_v11  ;;  %v5089_v19 = vld [vmem:[%s6710_s8 + $0x8] sm:$0xff]  }
 0x7af   :  { %4678 = vmatprep.subr.bf16.mxu0 %v1882_v5 }
 0x7b0   :  { %4679 = vmatpush3.bf16.msra.mxu0 %v1882_v5 }
 0x7b1   :  { %4684 = vmatprep.subr.bf16.mxu0 %v5963_v51 }
 0x7b2   :  { %v1831_v36 = vpop.f32.mrb[36].mxu1 }
 0x7b3   :  { %v1833_v37 = vpop.f32.mrb[37].mxu1  ;;  %4681 = vmatmul.mubr.msk.bf16.vlgmr.msra.gmra.mrb[16].mxu0 %vm1893_vm2, %v5087_v34  ;;  %v2092_v39 = vand.u32 2147483647, %v1831_v36  ;;  %v5090_v34 = vld [vmem:[%s6710_s8 + $0x20] sm:$0xff]  }
 0x7b4   :  { %v1835_v38 = vpop.f32.mrb[38].mxu1  ;;  %4685 = vmatpush3.bf16.msra.mxu0 %v5963_v51  ;;  %4692 = vmatprep.mubr.msk.bf16.mxu0 %vm1893_vm2, %v5088_v35  ;;  %v2178_v47 = vand.u32 2147483647, %v1833_v37 }
 0x7b5   :  { %v2093_v43 = vand.u32 2147483647, %v1835_v38  ;;  %v1837_v46 = vpop.f32.mrb[39].mxu1  ;;  %4686 = vmatprep.subr.bf16.mxu0 %v5987_v3 }
 0x7b6   :  { %v2179_v52 = vand.u32 2147483647, %v1837_v46 }
 0x7b7   :  { %v2105_v54 = vpack.c.bf16 %v2093_v43, %v2092_v39 }
 0x7b8   :  { %v6208_v57 = vpack.c.bf16 %v2179_v52, %v2178_v47  ;;  %4687 = vmatpush3.bf16.msra.mxu0 %v5987_v3 }
 0x7b9   :  { %4688 = vmatprep.subr.bf16.mxu0 %v6017_v14 }
 0x7ba   :  { %v1841_v45 = vpop.f32.mrb[40].mxu1 }
 0x7bb   :  { %v1843_v41 = vpop.f32.mrb[41].mxu1  ;;  %v2094_v51 = vand.u32 2147483647, %v1841_v45 }
 0x7bc   :  { %v1845_v1 = vpop.f32.mrb[42].mxu1  ;;  %4689 = vmatpush3.bf16.msra.mxu0 %v6017_v14  ;;  %v2180_v11 = vand.u32 2147483647, %v1843_v41 }
 0x7bd   :  { %v2095_v4 = vand.u32 2147483647, %v1845_v1  ;;  %v1847_v10 = vpop.f32.mrb[43].mxu1  ;;  %4690 = vmatprep.subr.bf16.mxu0 %v6047_v22 }
 0x7be   :  { %v2181_v16 = vand.u32 2147483647, %v1847_v10 }
 0x7bf   :  { %v2106_v5 = vpack.c.bf16 %v2095_v4, %v2094_v51 }
 0x7c0   :  { %v2192_v3 = vpack.c.bf16 %v2181_v16, %v2180_v11  ;;  %4691 = vmatpush3.bf16.msra.mxu0 %v6047_v22  ;;  %v5091_v16 = vld [vmem:[%s6710_s8 + $0x28] sm:$0xff]  }
 0x7c1   :  { %4696 = vmatprep.subr.bf16.mxu0 %v6189_v42 }
 0x7c2   :  { %v1851_v14 = vpop.f32.mrb[44].mxu1 }
 0x7c3   :  { %v1853_v35 = vpop.f32.mrb[45].mxu1  ;;  %4693 = vmatmul.mubr.msk.bf16.vlgmr.msra.gmra.mrb[16].mxu0 %vm1893_vm2, %v5089_v19  ;;  %v2096_v37 = vand.u32 2147483647, %v1851_v14  ;;  %v5092_v19 = vld [vmem:[%s6710_s8 + $0x30] sm:$0xff]  }
 0x7c4   :  { %v1855_v36 = vpop.f32.mrb[46].mxu1  ;;  %4697 = vmatpush3.bf16.msra.mxu0 %v6189_v42  ;;  %4704 = vmatprep.mubr.msk.bf16.mxu0 %vm1893_vm2, %v5090_v34  ;;  %v2182_v22 = vand.u32 2147483647, %v1853_v35 }
 0x7c5   :  { %v2097_v38 = vand.u32 2147483647, %v1855_v36  ;;  %v1857_v39 = vpop.f32.mrb[47].mxu1  ;;  %4698 = vmatprep.subr.bf16.mxu0 %v6191_v56 }
 0x7c6   :  { %v2183_v43 = vand.u32 2147483647, %v1857_v39 }
 0x7c7   :  { %v2107_v46 = vpack.c.bf16 %v2097_v38, %v2096_v37  ;;  %v2272_v37 = vpop.permute.xlu0 %2271 }
 0x7c8   :  { %v2193_v47 = vpack.c.bf16 %v2183_v43, %v2182_v22  ;;  %4699 = vmatpush3.bf16.msra.mxu0 %v6191_v56 }
 0x7c9   :  { %4700 = vmatprep.subr.bf16.mxu0 %v6193_v55 }
 0x7ca   :  { %v1861_v52 = vpop.f32.mrb[48].mxu1 }
 0x7cb   :  { %v1863_v45 = vpop.f32.mrb[49].mxu1  ;;  %v2098_v42 = vand.u32 2147483647, %v1861_v52  ;;  %v5096_v52 = vld [vmem:[%s6712_s10 + $0x10] sm:$0xff]  }
 0x7cc   :  { %v1865_v41 = vpop.f32.mrb[50].mxu1  ;;  %4701 = vmatpush3.bf16.msra.mxu0 %v6193_v55  ;;  %v2184_v4 = vand.u32 2147483647, %v1863_v45  ;;  %v5093_v55 = vld [vmem:[%s6710_s8 + $0x38] sm:$0xff]  }
 0x7cd   :  { %v2099_v1 = vand.u32 2147483647, %v1865_v41  ;;  %v1867_v51 = vpop.f32.mrb[51].mxu1  ;;  %4702 = vmatprep.subr.bf16.mxu0 %v6195_v20 }
 0x7ce   :  { %v2185_v10 = vand.u32 2147483647, %v1867_v51 }
 0x7cf   :  { %v2108_v11 = vpack.c.bf16 %v2099_v1, %v2098_v42 }
 0x7d0   :  { %v2194_v56 = vpack.c.bf16 %v2185_v10, %v2184_v4  ;;  %4703 = vmatpush3.bf16.msra.mxu0 %v6195_v20  ;;  %v5094_v20 = vld [vmem:[%s6710_s8 + $0x40] sm:$0xff]  }
 0x7d1   :  { %4708 = vmatprep.subr.bf16.mxu0 %v2105_v54 }
 0x7d3   :  { %4705 = vmatmul.mubr.msk.bf16.vlgmr.msra.gmra.mrb[16].mxu0 %vm1893_vm2, %v5091_v16 }
 0x7d4   :  { %4709 = vmatpush3.bf16.msra.mxu0 %v2105_v54  ;;  %4716 = vmatprep.mubr.msk.bf16.mxu0 %vm1893_vm2, %v5092_v19  ;;  %v5095_v54 = vld [vmem:[%s6710_s8 + $0x48] sm:$0xff]  }
 0x7d5   :  { %4710 = vmatprep.subr.bf16.mxu0 %v2106_v5 }
 0x7d8   :  { %4711 = vmatpush3.bf16.msra.mxu0 %v2106_v5  ;;  %v2267_v5 = vpop.permute.xlu1 %2266 }
 0x7d9   :  { %4712 = vmatprep.subr.bf16.mxu0 %v2107_v46 }
 0x7dc   :  { %4713 = vmatpush3.bf16.msra.mxu0 %v2107_v46  ;;  %v2277_v34 = vpop.permute.xlu1 %2276 }
 0x7dd   :  { %4714 = vmatprep.subr.bf16.mxu0 %v2108_v11 }
 0x7e0   :  { %4715 = vmatpush3.bf16.msra.mxu0 %v2108_v11  ;;  %v2282_v36 = vpop.permute.xlu1 %2281 }
 0x7e1   :  { %4720 = vmatprep.subr.bf16.mxu0 %v6208_v57 }
 0x7e3   :  { %4717 = vmatmul.mubr.msk.bf16.vlgmr.msra.gmra.mrb[16].mxu0 %vm1893_vm2, %v5093_v55 }
 0x7e4   :  { %4721 = vmatpush3.bf16.msra.mxu0 %v6208_v57  ;;  %4728 = vmatprep.mubr.msk.bf16.mxu0 %vm1893_vm2, %v5094_v20  ;;  %v5097_v20 = vld [vmem:[%s6712_s10 + $0x18] sm:$0xff]  }
 0x7e5   :  { %4722 = vmatprep.subr.bf16.mxu0 %v2192_v3 }
 0x7e8   :  { %4723 = vmatpush3.bf16.msra.mxu0 %v2192_v3 }
 0x7e9   :  { %4724 = vmatprep.subr.bf16.mxu0 %v2193_v47 }
 0x7ec   :  { %4725 = vmatpush3.bf16.msra.mxu0 %v2193_v47 }
 0x7ed   :  { %4726 = vmatprep.subr.bf16.mxu0 %v2194_v56 }
 0x7f0   :  { %4727 = vmatpush3.bf16.msra.mxu0 %v2194_v56 }
 0x7f3   :  { %4729 = vmatmul.mubr.msk.bf16.vlgmr.msra.gmra.mrb[16].mxu0 %vm1893_vm2, %v5095_v54  ;;  %v5098_v54 = vld [vmem:[%s6712_s10] sm:$0xff]  }
 0x7f4   :  { %4736 = vmatprep.mubr.msk.bf16.mxu0 %vm1009_vm7, %v5096_v52 }
 0x8c6   :  { %v4730_v14 = vpop.f32.mrb[16].mxu0 }
 0x8c7   :  { %v2245_v35 = vpop.f32.mrb[17].mxu0  ;;  %v2286_v38 = vadd.f32 %v4730_v14, %v2277_v34  ;;  %v5100_v34 = vld [vmem:[%s6712_s10 + $0x20] sm:$0xff]  }
 0x8c8   :  { %v4731_v57 = vpop.f32.mrb[18].mxu0  ;;  %v2284_v22 = vadd.f32 %v2267_v5, %v2245_v35  ;;  %v5099_v5 = vld [vmem:[%s6712_s10 + $0x8] sm:$0xff]  }
 0x8c9   :  { %v2287_v39 = vadd.f32 %v4731_v57, %v2282_v36  ;;  %v2248_v3 = vpop.f32.mrb[19].mxu0 }
 0x8ca   :  { %v2285_v43 = vadd.f32 %v2272_v37, %v2248_v3 }
 0x8cb   :  { %v6253_v46 = vpack.c.bf16 %v2287_v39, %v2286_v38 }
 0x8cc   :  { %v6255_v47 = vpack.c.bf16 %v2285_v43, %v2284_v22  ;;  %v5101_v43 = vld [vmem:[%s6712_s10 + $0x28] sm:$0xff]  }
 0x8ce   :  { %2327 = vmatmul.mubr.bf16.vlgmr.msra.gmra.mrb[52].mxu1 %v6255_v47 }
 0x8cf   :  { %2348 = vmatpush1.bf16.msra.mxu1 %v5969_v58  ;;  %2336 = vmatprep.mubr.bf16.mxu1 %v5321_v0 }
 0x8d0   :  { %2349 = vmatprep.subr.bf16.mxu1 %v5976_v40 }
 0x8d3   :  { %2350 = vmatpush1.bf16.msra.mxu1 %v5984_v2 }
 0x8d4   :  { %2351 = vmatprep.subr.bf16.mxu1 %v5992_v6 }
 0x8d6   :  { %2337 = vmatmul.mubr.bf16.gmra.mrb[56].mxu1 %v6253_v46 }
 0x8d7   :  { %2352 = vmatpush1.bf16.msra.mxu1 %v5999_v7  ;;  %2379 = vmatprep.mubr.bf16.mxu1 %v5321_v0 }
 0x8d8   :  { %2353 = vmatprep.subr.bf16.mxu1 %v6006_v9 }
 0x8db   :  { %2354 = vmatpush1.bf16.msra.mxu1 %v6014_v12 }
 0x8dc   :  { %2355 = vmatprep.subr.bf16.mxu1 %v6022_v15 }
 0x8df   :  { %2356 = vmatpush1.bf16.msra.mxu1 %v6029_v8 }
 0x8e0   :  { %2357 = vmatprep.subr.bf16.mxu1 %v6036_v18 }
 0x8e3   :  { %2358 = vmatpush1.bf16.msra.mxu1 %v6044_v21 }
 0x8e4   :  { %2359 = vmatprep.subr.bf16.mxu1 %v6052_v23 }
 0x8e7   :  { %2360 = vmatpush1.bf16.msra.mxu1 %v6059_v13 }
 0x8e8   :  { %2361 = vmatprep.subr.bf16.mxu1 %v6066_v17 }
 0x8eb   :  { %2362 = vmatpush1.bf16.msra.mxu1 %v6072_v24 }
 0x8ec   :  { %2868 = vmatprep.subr.bf16.mxu1 %v6078_v25 }
 0x8ee   :  { %2380 = vmatmul.mubr.bf16.vlgmr.msra.gmra.mrb[60].mxu1 %v6255_v47 }
 0x8ef   :  { %2389 = vmatprep.mubr.bf16.mxu1 %v5321_v0  ;;  %2869 = vmatpush1.bf16.msra.mxu1 %v6086_v26 }
 0x8f0   :  { %2870 = vmatprep.subr.bf16.mxu1 %v6092_v27 }
 0x8f3   :  { %2871 = vmatpush1.bf16.msra.mxu1 %v6098_v28 }
 0x8f4   :  { %2872 = vmatprep.subr.bf16.mxu1 %v6104_v29 }
 0x8f6   :  { %2390 = vmatmul.mubr.bf16.gmra.mrb[64].mxu1 %v6253_v46 }
 0x8f7   :  { %2873 = vmatpush1.bf16.msra.mxu1 %v6112_v31  ;;  %2900 = vmatprep.mubr.bf16.mxu1 %v5321_v0 }
 0x8f8   :  { %2874 = vmatprep.subr.bf16.mxu1 %v6118_v32 }
 0x8fb   :  { %2875 = vmatpush1.bf16.msra.mxu1 %v6124_v33 }
 0x8fc   :  { %2876 = vmatprep.subr.bf16.mxu1 %v6130_v44 }
 0x8ff   :  { %2877 = vmatpush1.bf16.msra.mxu1 %v6138_v48 }
 0x900   :  { %2878 = vmatprep.subr.bf16.mxu1 %v6144_v53 }
 0x903   :  { %2879 = vmatpush1.bf16.msra.mxu1 %v6150_v59 }
 0x904   :  { %2880 = vmatprep.subr.bf16.mxu1 %v6156_v60 }
 0x907   :  { %2881 = vmatpush1.bf16.msra.mxu1 %v6163_v61 }
 0x908   :  { %2882 = vmatprep.subr.bf16.mxu1 %v6170_v62 }
 0x90b   :  { %2883 = vmatpush1.bf16.msra.mxu1 %v6176_v63 }
 0x90c   :  { %2921 = vmatprep.subr.bf16.mxu1 %v6182_v30 }
 0x9a1   :  { %v2328_v45 = vpop.f32.mrb[52].mxu1 }
 0x9a2   :  { %v2330_v41 = vpop.f32.mrb[53].mxu1 }
 0x9a3   :  { %v2332_v42 = vpop.f32.mrb[54].mxu1 }
 0x9a4   :  { %v2409_v1 = vpack.c.bf16 %v2332_v42, %v2328_v45  ;;  %v2334_v51 = vpop.f32.mrb[55].mxu1 }
 0x9a5   :  { %v2546_v4 = vpack.c.bf16 %v2334_v51, %v2330_v41 }
 0x9a6   :  { %4732 = vmatprep.subr.bf16.mxu0 %v2409_v1 }
 0x9a7   :  { %4733 = vmatpush3.bf16.msra.mxu0 %v2409_v1 }
 0x9a9   :  { %v2338_v10 = vpop.f32.mrb[56].mxu1 }
 0x9aa   :  { %v2340_v11 = vpop.f32.mrb[57].mxu1 }
 0x9ab   :  { %v2342_v16 = vpop.f32.mrb[58].mxu1 }
 0x9ac   :  { %v2410_v56 = vpack.c.bf16 %v2342_v16, %v2338_v10  ;;  %v2344_v19 = vpop.f32.mrb[59].mxu1 }
 0x9ad   :  { %v2547_v55 = vpack.c.bf16 %v2344_v19, %v2340_v11  ;;  %v5104_v19 = vld [vmem:[%s6712_s10 + $0x40] sm:$0xff]  }
 0x9ae   :  { %4734 = vmatprep.subr.bf16.mxu0 %v2410_v56 }
 0x9af   :  { %4735 = vmatpush3.bf16.msra.mxu0 %v2410_v56  ;;  %v5103_v56 = vld [vmem:[%s6712_s10 + $0x38] sm:$0xff]  }
 0x9b0   :  { %4740 = vmatprep.subr.bf16.mxu0 %v6255_v47 }
 0x9b2   :  { %4737 = vmatmul.mubr.msk.bf16.vlgmr.msra.gmra.mrb[20].mxu0 %vm1009_vm7, %v5097_v20  ;;  %v2780_v20 = vpop.permute.xlu0 %2779 }
 0x9b3   :  { %4741 = vmatpush3.bf16.msra.mxu0 %v6255_v47  ;;  %4744 = vmatprep.mubr.msk.bf16.mxu0 %vm1009_vm7, %v5098_v54  ;;  %v5102_v47 = vld [vmem:[%s6712_s10 + $0x30] sm:$0xff]   ;;  %v2785_v54 = vpop.permute.xlu1 %2784 }
 0x9b4   :  { %4742 = vmatprep.subr.bf16.mxu0 %v6253_v46 }
 0x9b7   :  { %4743 = vmatpush3.bf16.msra.mxu0 %v6253_v46 }
 0x9b8   :  { %4748 = vmatprep.subr.bf16.mxu0 %v2546_v4 }
 0x9be   :  { %4745 = vmatmul.mubr.msk.bf16.vlgmr.msra.gmra.mrb[20].mxu0 %vm1009_vm7, %v5099_v5  ;;  %v2790_v5 = vpop.permute.xlu0 %2789 }
 0x9bf   :  { %4749 = vmatpush3.bf16.msra.mxu0 %v2546_v4  ;;  %4752 = vmatprep.mubr.msk.bf16.mxu0 %vm1009_vm7, %v5100_v34 }
 0x9c0   :  { %4750 = vmatprep.subr.bf16.mxu0 %v2547_v55 }
 0x9c1   :  { %v2381_v14 = vpop.f32.mrb[60].mxu1 }
 0x9c2   :  { %v2383_v35 = vpop.f32.mrb[61].mxu1  ;;  %v2617_v57 = vand.u32 2147483647, %v2381_v14 }
 0x9c3   :  { %v2385_v36 = vpop.f32.mrb[62].mxu1  ;;  %4751 = vmatpush3.bf16.msra.mxu0 %v2547_v55  ;;  %v2697_v39 = vand.u32 2147483647, %v2383_v35  ;;  %v5105_v55 = vld [vmem:[%s6712_s10 + $0x48] sm:$0xff]  }
 0x9c4   :  { %v2618_v37 = vand.u32 2147483647, %v2385_v36  ;;  %v2387_v38 = vpop.f32.mrb[63].mxu1 }
 0x9c5   :  { %v2698_v3 = vand.u32 2147483647, %v2387_v38 }
 0x9c6   :  { %v2626_v22 = vpack.c.bf16 %v2618_v37, %v2617_v57  ;;  %v2795_v37 = vpop.permute.xlu1 %2794 }
 0x9c7   :  { %v2706_v46 = vpack.c.bf16 %v2698_v3, %v2697_v39 }
 0x9c8   :  { %4756 = vmatprep.subr.bf16.mxu0 %v2626_v22 }
 0x9c9   :  { %v2391_v52 = vpop.f32.mrb[64].mxu1 }
 0x9ca   :  { %v2393_v45 = vpop.f32.mrb[65].mxu1  ;;  %4753 = vmatmul.mubr.msk.bf16.vlgmr.msra.gmra.mrb[20].mxu0 %vm1009_vm7, %v5101_v43  ;;  %v2619_v42 = vand.u32 2147483647, %v2391_v52 }
 0x9cb   :  { %v2395_v41 = vpop.f32.mrb[66].mxu1  ;;  %4757 = vmatpush3.bf16.msra.mxu0 %v2626_v22  ;;  %4760 = vmatprep.mubr.msk.bf16.mxu0 %vm1009_vm7, %v5102_v47  ;;  %v2699_v4 = vand.u32 2147483647, %v2393_v45 }
 0x9cc   :  { %v2620_v1 = vand.u32 2147483647, %v2395_v41  ;;  %v2397_v51 = vpop.f32.mrb[67].mxu1 }
 0x9cd   :  { %v2700_v10 = vand.u32 2147483647, %v2397_v51 }
 0x9ce   :  { %v2627_v11 = vpack.c.bf16 %v2620_v1, %v2619_v42 }
 0x9cf   :  { %v2707_v16 = vpack.c.bf16 %v2700_v10, %v2699_v4 }
 0x9d0   :  { %4758 = vmatprep.subr.bf16.mxu0 %v2627_v11 }
 0x9d1   :  { %4759 = vmatpush3.bf16.msra.mxu0 %v2627_v11 }
 0x9d2   :  { %4764 = vmatprep.subr.bf16.mxu0 %v2706_v46 }
 0x9d6   :  { %4761 = vmatmul.mubr.msk.bf16.vlgmr.msra.gmra.mrb[20].mxu0 %vm1009_vm7, %v5103_v56 }
 0x9d7   :  { %4765 = vmatpush3.bf16.msra.mxu0 %v2706_v46  ;;  %4768 = vmatprep.mubr.msk.bf16.mxu0 %vm1009_vm7, %v5104_v19 }
 0x9d8   :  { %4766 = vmatprep.subr.bf16.mxu0 %v2707_v16 }
 0x9db   :  { %4767 = vmatpush3.bf16.msra.mxu0 %v2707_v16 }
 0x9dc   :  { %4772 = vmatprep.subr.bf16.mxu0 %v5322_v49 }
 0x9e2   :  { %4769 = vmatmul.mubr.msk.bf16.vlgmr.msra.gmra.mrb[20].mxu0 %vm1009_vm7, %v5105_v55 }
 0x9e3   :  { %4776 = vmatprep.mubr.msk.bf16.mxu0 %vm5323_vm8, %v5322_v49 }
 0xab5   :  { %v4770_v34 = vpop.f32.mrb[20].mxu0 }
 0xab6   :  { %v2799_v14 = vadd.f32 %v4770_v34, %v2790_v5  ;;  %v2758_v35 = vpop.f32.mrb[21].mxu0 }
 0xab7   :  { %v2797_v36 = vadd.f32 %v2780_v20, %v2758_v35  ;;  %v4771_v57 = vpop.f32.mrb[22].mxu0 }
 0xab8   :  { %v2807_v38 = vmul.f32 0.0, %v2799_v14  ;;  %v2761_v39 = vpop.f32.mrb[23].mxu0  ;;  %v2800_v22 = vadd.f32 %v4771_v57, %v2795_v37  ;;  %vm2803_vm4 = vcmp.gt.f32.partialorder %v2799_v14, 0.0 }
 0xab9   :  { %v2805_v3 = vmul.f32 0.0, %v2797_v36  ;;  %v2798_v43 = vadd.f32 %v2785_v54, %v2761_v39  ;;  %vm2801_vm3 = vcmp.gt.f32.partialorder %v2797_v36, 0.0 }
 0xaba   :  { %v2808_v45 = vmul.f32 0.0, %v2800_v22  ;;  %v2811_v42 = vsel %vm2803_vm4, %v2799_v14, %v2807_v38  ;;  %vm2804_vm6 = vcmp.gt.f32.partialorder %v2800_v22, 0.0 }
 0xabb   :  { %v2806_v46 = vmul.f32 0.0, %v2798_v43  ;;  %v2809_v47 = vsel %vm2801_vm3, %v2797_v36, %v2805_v3  ;;  %vm2802_vm5 = vcmp.gt.f32.partialorder %v2798_v43, 0.0  ;;  %v2815_v51 = vmul.f32 %v5733_v50, %v2811_v42 }
 0xabc   :  { %v2813_v52 = vmul.f32 %v5733_v50, %v2809_v47  ;;  %v2812_v4 = vsel %vm2804_vm6, %v2800_v22, %v2808_v45 }
 0xabd   :  { %v2810_v41 = vsel %vm2802_vm5, %v2798_v43, %v2806_v46  ;;  %v2816_v10 = vmul.f32 %v5733_v50, %v2812_v4 }
 0xabe   :  { %2817 = vadd.xlane.f32.xlu0 %v2813_v52  ;;  %v2814_v1 = vmul.f32 %v5733_v50, %v2810_v41  ;;  %v3224_v52 = vld [vmem:[%s6717_s15] sm:$0xff]  ;;  %s6729_s15 = sld [smem:[#allocation14_spill]] }
 0xac0   :  { %2819 = vadd.xlane.f32.xlu1 %v2814_v1 }
 0xac2   :  { %2821 = vadd.xlane.f32.xlu0 %v2815_v51 }
 0xac6   :  { %2823 = vadd.xlane.f32.xlu0 %v2816_v10 }
 0xb4b   :  { %v2818_v11 = vpop.xlane.xlu0 %2817 }
 0xb4c   :  { %v2825_v16 = vmul.f32 0.083333336, %v2818_v11 }
 0xb4d   :  { %v2820_v56 = vpop.xlane.xlu1 %2819 }
 0xb4e   :  { %v2829_v19 = vsub.f32 %v2809_v47, %v2825_v16  ;;  %v2826_v55 = vmul.f32 0.083333336, %v2820_v56  ;;  %v2867_v47 = vld [vmem:[%s6715_s13] sm:$0xff] }
 0xb4f   :  { %v2822_v20 = vpop.xlane.xlu0 %2821 }
 0xb50   :  { %v2830_v54 = vsub.f32 %v2810_v41, %v2826_v55  ;;  %v2827_v5 = vmul.f32 0.083333336, %v2822_v20  ;;  %v2833_v34 = vmul.f32 %v5733_v50, %v2829_v19 }
 0xb52   :  { %v2831_v14 = vsub.f32 %v2811_v42, %v2827_v5  ;;  %v2837_v35 = vmul.f32 %v2833_v34, %v2833_v34  ;;  %v2834_v36 = vmul.f32 %v5733_v50, %v2830_v54 }
 0xb53   :  { %v2824_v57 = vpop.xlane.xlu0 %2823 }
 0xb54   :  { %v2828_v37 = vmul.f32 0.083333336, %v2824_v57  ;;  %2841 = vadd.xlane.f32.xlu1 %v2837_v35  ;;  %v2838_v38 = vmul.f32 %v2834_v36, %v2834_v36  ;;  %v2835_v39 = vmul.f32 %v5733_v50, %v2831_v14 }
 0xb56   :  { %v2832_v3 = vsub.f32 %v2812_v4, %v2828_v37  ;;  %2843 = vadd.xlane.f32.xlu0 %v2838_v38  ;;  %v2839_v22 = vmul.f32 %v2835_v39, %v2835_v39 }
 0xb58   :  { %2845 = vadd.xlane.f32.xlu1 %v2839_v22  ;;  %v2836_v43 = vmul.f32 %v5733_v50, %v2832_v3 }
 0xb5a   :  { %v2840_v46 = vmul.f32 %v2836_v43, %v2836_v43 }
 0xb5c   :  { %2847 = vadd.xlane.f32.xlu0 %v2840_v46 }
 0xb69   :  { %3219 = vperm.xlu1 %5007, %v2867_v47  }
 0xb72   :  { %3557 = vperm.xlu0 %5006, %v3224_v52  }
 0xbe1   :  { %v2842_v45 = vpop.xlane.xlu1 %2841 }
 0xbe2   :  { %v2849_v41 = vmul.f32 0.083333336, %v2842_v45 }
 0xbe3   :  { %v2844_v42 = vpop.xlane.xlu0 %2843 }
 0xbe4   :  { %v2853_v1 = vadd.f32 1e-05, %v2849_v41  ;;  %v2850_v51 = vmul.f32 0.083333336, %v2844_v42 }
 0xbe5   :  { %v2846_v4 = vpop.xlane.xlu1 %2845 }
 0xbe6   :  { %5146 = vrsqrt.f32 %v2853_v1  ;;  %v2854_v10 = vadd.f32 1e-05, %v2850_v51  ;;  %v2851_v11 = vmul.f32 0.083333336, %v2846_v4 }
 0xbe8   :  { %5148 = vrsqrt.f32 %v2854_v10  ;;  %v2855_v16 = vadd.f32 1e-05, %v2851_v11 }
 0xbe9   :  { %v2848_v56 = vpop.xlane.xlu0 %2847 }
 0xbea   :  { %v2852_v19 = vmul.f32 0.083333336, %v2848_v56  ;;  %5150 = vrsqrt.f32 %v2855_v16 }
 0xbec   :  { %v2856_v55 = vadd.f32 1e-05, %v2852_v19 }
 0xbee   :  { %5152 = vrsqrt.f32 %v2856_v55 }
 0xbf0   :  { %v5147_v20 = vpop.eup %5146 }
 0xbf1   :  { %v2861_v5 = vmul.f32 %v5147_v20, %v2833_v34  ;;  %v4384_v20 = vld [vmem:[%s6714_s12 + $0xc] sm:$0xf] }
 0xbf2   :  { %v5149_v54 = vpop.eup %5148 }
 0xbf3   :  { %v2862_v14 = vmul.f32 %v5149_v54, %v2834_v36  ;;  %v4386_v54 = vld [vmem:[%s6714_s12 + $0x10] sm:$0xf] }
 0xbf4   :  { %v5151_v57 = vpop.eup %5150 }
 0xbf5   :  { %v6356_v35 = vpack.c.bf16 %v2862_v14, %v2861_v5  ;;  %v2863_v3 = vmul.f32 %v5151_v57, %v2835_v39 }
 0xbf7   :  { %2901 = vmatmul.mubr.bf16.vlgmr.msra.gmra.mrb[68].mxu1 %v6356_v35 }
 0xbf8   :  { %v5153_v37 = vpop.eup %5152  ;;  %2922 = vmatpush1.bf16.msra.mxu1 %v5969_v58  ;;  %2910 = vmatprep.mubr.bf16.mxu1 %v5321_v0 }
 0xbf9   :  { %2923 = vmatprep.subr.bf16.mxu1 %v5976_v40  ;;  %v2864_v38 = vmul.f32 %v5153_v37, %v2836_v43 }
 0xbfb   :  { %v2866_v34 = vpack.c.bf16 %v2864_v38, %v2863_v3  ;;  %v3220_v3 = vpop.permute.xlu1 %3219 }
 0xbfc   :  { %2924 = vmatpush1.bf16.msra.mxu1 %v5984_v2 }
 0xbfd   :  { %2925 = vmatprep.subr.bf16.mxu1 %v5992_v6 }
 0xbff   :  { %2911 = vmatmul.mubr.bf16.gmra.mrb[72].mxu1 %v2866_v34 }
 0xc00   :  { %2926 = vmatpush1.bf16.msra.mxu1 %v5999_v7  ;;  %2953 = vmatprep.mubr.bf16.mxu1 %v5321_v0 }
 0xc01   :  { %2927 = vmatprep.subr.bf16.mxu1 %v6006_v9 }
 0xc04   :  { %2928 = vmatpush1.bf16.msra.mxu1 %v6014_v12 }
 0xc05   :  { %2929 = vmatprep.subr.bf16.mxu1 %v6022_v15 }
 0xc08   :  { %2930 = vmatpush1.bf16.msra.mxu1 %v6029_v8 }
 0xc09   :  { %2931 = vmatprep.subr.bf16.mxu1 %v6036_v18 }
 0xc0c   :  { %2932 = vmatpush1.bf16.msra.mxu1 %v6044_v21 }
 0xc0d   :  { %2933 = vmatprep.subr.bf16.mxu1 %v6052_v23 }
 0xc10   :  { %2934 = vmatpush1.bf16.msra.mxu1 %v6059_v13 }
 0xc11   :  { %2935 = vmatprep.subr.bf16.mxu1 %v6066_v17 }
 0xc14   :  { %2936 = vmatpush1.bf16.msra.mxu1 %v6072_v24 }
 0xc15   :  { %3225 = vmatprep.subr.bf16.mxu1 %v6078_v25 }
 0xc17   :  { %2954 = vmatmul.mubr.bf16.vlgmr.msra.gmra.mrb[76].mxu1 %v6356_v35 }
 0xc18   :  { %2963 = vmatprep.mubr.bf16.mxu1 %v5321_v0  ;;  %3226 = vmatpush1.bf16.msra.mxu1 %v6086_v26 }
 0xc19   :  { %3227 = vmatprep.subr.bf16.mxu1 %v6092_v27 }
 0xc1c   :  { %3228 = vmatpush1.bf16.msra.mxu1 %v6098_v28 }
 0xc1d   :  { %3229 = vmatprep.subr.bf16.mxu1 %v6104_v29 }
 0xc1f   :  { %2964 = vmatmul.mubr.bf16.gmra.mrb[80].mxu1 %v2866_v34 }
 0xc20   :  { %3230 = vmatpush1.bf16.msra.mxu1 %v6112_v31  ;;  %3257 = vmatprep.mubr.bf16.mxu1 %v5321_v0 }
 0xc21   :  { %3231 = vmatprep.subr.bf16.mxu1 %v6118_v32 }
 0xc24   :  { %3232 = vmatpush1.bf16.msra.mxu1 %v6124_v33 }
 0xc25   :  { %3233 = vmatprep.subr.bf16.mxu1 %v6130_v44 }
 0xc28   :  { %3234 = vmatpush1.bf16.msra.mxu1 %v6138_v48 }
 0xc29   :  { %3235 = vmatprep.subr.bf16.mxu1 %v6144_v53 }
 0xc2c   :  { %3236 = vmatpush1.bf16.msra.mxu1 %v6150_v59 }
 0xc2d   :  { %3237 = vmatprep.subr.bf16.mxu1 %v6156_v60  ;;  %v4379_v60 = vld [vmem:[%s6714_s12 + $0x4] sm:$0xf] }
 0xc30   :  { %3238 = vmatpush1.bf16.msra.mxu1 %v6163_v61  ;;  %v2974_v61 = vld [vmem:[%s6714_s12] sm:$0xf] }
 0xc31   :  { %3239 = vmatprep.subr.bf16.mxu1 %v6170_v62  ;;  %v4382_v62 = vld [vmem:[%s6714_s12 + $0x8] sm:$0xf] }
 0xc34   :  { %3240 = vmatpush1.bf16.msra.mxu1 %v6176_v63 }
 0xc35   :  { %4812 = vmatprep.subr.bf16.mxu1 %v5322_v49 }
 0xcca   :  { %v2902_v25 = vpop.f32.mrb[68].mxu1 }
 0xccb   :  { %v2904_v26 = vpop.f32.mrb[69].mxu1 }
 0xccc   :  { %v2906_v27 = vpop.f32.mrb[70].mxu1 }
 0xccd   :  { %v2977_v28 = vpack.c.bf16 %v2906_v27, %v2902_v25  ;;  %v2908_v29 = vpop.f32.mrb[71].mxu1 }
 0xcce   :  { %v3067_v31 = vpack.c.bf16 %v2908_v29, %v2904_v26 }
 0xccf   :  { %4773 = vmatpush3.bf16.msra.mxu0 %v2977_v28 }
 0xcd0   :  { %4774 = vmatprep.subr.bf16.mxu0 %v5322_v49 }
 0xcd2   :  { %v2912_v32 = vpop.f32.mrb[72].mxu1 }
 0xcd3   :  { %v2914_v33 = vpop.f32.mrb[73].mxu1 }
 0xcd4   :  { %v2916_v44 = vpop.f32.mrb[74].mxu1 }
 0xcd5   :  { %v2978_v48 = vpack.c.bf16 %v2916_v44, %v2912_v32  ;;  %v2918_v53 = vpop.f32.mrb[75].mxu1 }
 0xcd6   :  { %v3068_v59 = vpack.c.bf16 %v2918_v53, %v2914_v33 }
 0xcd7   :  { %4775 = vmatpush3.bf16.msra.mxu0 %v2978_v48 }
 0xcd8   :  { %4780 = vmatprep.subr.bf16.mxu0 %v5322_v49 }
 0xcda   :  { %4777 = vmatmul.mubr.msk.bf16.vlgmr.msra.gmra.mrb[24].mxu0 %vm1009_vm7, %v4379_v60 }
 0xcdb   :  { %4781 = vmatpush3.bf16.msra.mxu0 %v6356_v35  ;;  %4784 = vmatprep.mubr.msk.bf16.mxu0 %vm5323_vm8, %v5322_v49 }
 0xcdc   :  { %4782 = vmatprep.subr.bf16.mxu0 %v5322_v49 }
 0xcdf   :  { %4783 = vmatpush3.bf16.msra.mxu0 %v2866_v34 }
 0xce0   :  { %4788 = vmatprep.subr.bf16.mxu0 %v5322_v49 }
 0xce2   :  { %4785 = vmatmul.mubr.msk.bf16.vlgmr.msra.gmra.mrb[28].mxu0 %vm1009_vm7, %v2974_v61 }
 0xce3   :  { %4789 = vmatpush3.bf16.msra.mxu0 %v3067_v31  ;;  %4792 = vmatprep.mubr.msk.bf16.mxu0 %vm5323_vm8, %v5322_v49 }
 0xce4   :  { %4790 = vmatprep.subr.bf16.mxu0 %v5322_v49 }
 0xce7   :  { %4791 = vmatpush3.bf16.msra.mxu0 %v3068_v59 }
 0xce8   :  { %4796 = vmatprep.subr.bf16.mxu0 %v5322_v49 }
 0xcea   :  { %v2955_v63 = vpop.f32.mrb[76].mxu1  ;;  %4793 = vmatmul.mubr.msk.bf16.vlgmr.msra.gmra.mrb[32].mxu0 %vm1009_vm7, %v4382_v62 }
 0xceb   :  { %v2957_v36 = vpop.f32.mrb[77].mxu1  ;;  %4800 = vmatprep.mubr.msk.bf16.mxu0 %vm5323_vm8, %v5322_v49  ;;  %v3113_v22 = vand.u32 2147483647, %v2955_v63 }
 0xcec   :  { %v2959_v39 = vpop.f32.mrb[78].mxu1  ;;  %v3165_v47 = vand.u32 2147483647, %v2957_v36 }
 0xced   :  { %v3114_v43 = vand.u32 2147483647, %v2959_v39  ;;  %v2961_v46 = vpop.f32.mrb[79].mxu1  ;;  %v3309_v39 = vld [vmem:[#allocation7 + $0x4] sm:$0xf] }
 0xcee   :  { %v3166_v52 = vand.u32 2147483647, %v2961_v46 }
 0xcef   :  { %v3119_v45 = vpack.c.bf16 %v3114_v43, %v3113_v22  ;;  %v3404_v22 = vld [vmem:[#allocation7 + $0x8] sm:$0xf] }
 0xcf0   :  { %v3171_v41 = vpack.c.bf16 %v3166_v52, %v3165_v47 }
 0xcf1   :  { %4797 = vmatpush3.bf16.msra.mxu0 %v3119_v45  ;;  %v5190_v45 = vld [vmem:[%s6728_s2 + $0xc] ss:$16 sps:$4 sm:$0xff]  }
 0xcf2   :  { %v2965_v42 = vpop.f32.mrb[80].mxu1  ;;  %4798 = vmatprep.subr.bf16.mxu0 %v5322_v49 }
 0xcf3   :  { %v2967_v1 = vpop.f32.mrb[81].mxu1  ;;  %v3115_v4 = vand.u32 2147483647, %v2965_v42  ;;  %v3506_v42 = vld [vmem:[#allocation7 + $0x10] sm:$0xf] }
 0xcf4   :  { %v2969_v51 = vpop.f32.mrb[82].mxu1  ;;  %v3167_v16 = vand.u32 2147483647, %v2967_v1 }
 0xcf5   :  { %v3116_v10 = vand.u32 2147483647, %v2969_v51  ;;  %v2971_v11 = vpop.f32.mrb[83].mxu1  ;;  %v5191_v51 = vld [vmem:[%s6728_s2 + $0x4] ss:$16 sps:$4 sm:$0xff]  }
 0xcf6   :  { %v3168_v56 = vand.u32 2147483647, %v2971_v11  ;;  %v3455_v11 = vld [vmem:[#allocation7 + $0xc] sm:$0xf] }
 0xcf7   :  { %v3120_v19 = vpack.c.bf16 %v3116_v10, %v3115_v4  ;;  %v5192_v4 = vld [vmem:[%s6728_s2 + $0x8] ss:$16 sps:$4 sm:$0xff]   ;;  %v5193_v10 = vld [vmem:[%s6728_s2 + $0x2c] ss:$16 sps:$4 sm:$0xff]  }
 0xcf8   :  { %v3172_v55 = vpack.c.bf16 %v3168_v56, %v3167_v16  ;;  %v5194_v16 = vld [vmem:[%s6728_s2 + $0x28] ss:$16 sps:$4 sm:$0xff]   ;;  %v5195_v56 = vld [vmem:[%s6728_s2 + $0x4c] ss:$16 sps:$4 sm:$0xff]  }
 0xcf9   :  { %4799 = vmatpush3.bf16.msra.mxu0 %v3120_v19  ;;  %v5196_v19 = vld [vmem:[%s6728_s2] ss:$16 sps:$4 sm:$0xff]  }
 0xcfa   :  { %4804 = vmatprep.subr.bf16.mxu0 %v5322_v49 }
 0xcfc   :  { %4801 = vmatmul.mubr.msk.bf16.vlgmr.msra.gmra.mrb[36].mxu0 %vm1009_vm7, %v4384_v20  ;;  %v5198_v20 = vld [vmem:[%s6728_s2 + $0x48] ss:$16 sps:$4 sm:$0xff]  }
 0xcfd   :  { %4805 = vmatpush3.bf16.msra.mxu0 %v3171_v41  ;;  %4808 = vmatprep.mubr.msk.bf16.mxu0 %vm5323_vm8, %v5322_v49  ;;  %v3307_v41 = vld [vmem:[#allocation7] sm:$0xf] }
 0xcfe   :  { %4806 = vmatprep.subr.bf16.mxu0 %v5322_v49 }
 0xd01   :  { %4807 = vmatpush3.bf16.msra.mxu0 %v3172_v55  ;;  %v5197_v55 = vld [vmem:[%s6728_s2 + $0x24] ss:$16 sps:$4 sm:$0xff]  }
 0xd02   :  { %3266 = vmatprep.subr.bf16.mxu0 %v6182_v30 }
 0xd04   :  { %4809 = vmatmul.mubr.msk.bf16.vlgmr.msra.gmra.mrb[40].mxu0 %vm1009_vm7, %v4386_v54  ;;  %v5199_v54 = vld [vmem:[%s6728_s2 + $0x6c] ss:$16 sps:$4 sm:$0xff]  }
 0xd05   :  { %3267 = vmatpush1.bf16.msra.mxu0 %v5969_v58  ;;  %3298 = vmatprep.mubr.bf16.mxu0 %v5321_v0 }
 0xd06   :  { %3268 = vmatprep.subr.bf16.mxu0 %v5976_v40 }
 0xd09   :  { %3269 = vmatpush1.bf16.msra.mxu0 %v5984_v2 }
 0xd0a   :  { %3270 = vmatprep.subr.bf16.mxu0 %v5992_v6 }
 0xd0d   :  { %3271 = vmatpush1.bf16.msra.mxu0 %v5999_v7 }
 0xd0e   :  { %3272 = vmatprep.subr.bf16.mxu0 %v6006_v9 }
 0xd11   :  { %3273 = vmatpush1.bf16.msra.mxu0 %v6014_v12 }
 0xd12   :  { %3274 = vmatprep.subr.bf16.mxu0 %v6022_v15 }
 0xd15   :  { %3275 = vmatpush1.bf16.msra.mxu0 %v6029_v8 }
 0xd16   :  { %3276 = vmatprep.subr.bf16.mxu0 %v6036_v18 }
 0xd19   :  { %3277 = vmatpush1.bf16.msra.mxu0 %v6044_v21 }
 0xd1a   :  { %3278 = vmatprep.subr.bf16.mxu0 %v6052_v23 }
 0xd1d   :  { %3279 = vmatpush1.bf16.msra.mxu0 %v6059_v13 }
 0xd1e   :  { %3280 = vmatprep.subr.bf16.mxu0 %v6066_v17 }
 0xd21   :  { %3281 = vmatpush1.bf16.msra.mxu0 %v6072_v24 }
 0xd22   :  { %4824 = vmatprep.subr.bf16.mxu0 %v5322_v49 }
 0xdad   :  { %v3016_v58 = vpop.f32.mrb[24].mxu0 }
 0xdae   :  { %v4778_v40 = vpop.f32.mrb[25].mxu0 }
 0xdaf   :  { %v3019_v2 = vpop.f32.mrb[26].mxu0  ;;  %v5202_v40 = vld [vmem:[%s6728_s2 + $0x68] ss:$16 sps:$4 sm:$0xff]  }
 0xdb0   :  { %v4779_v6 = vpop.f32.mrb[27].mxu0  ;;  %v5203_v2 = vld [vmem:[%s6728_s2 + $0x8c] ss:$16 sps:$4 sm:$0xff]  }
 0xdb1   :  { %v5204_v6 = vld [vmem:[%s6728_s2 + $0x40] ss:$16 sps:$4 sm:$0xff]  }
 0xdb5   :  { %v3059_v7 = vpop.f32.mrb[28].mxu0 }
 0xdb6   :  { %v3060_v9 = vadd.f32 %v3059_v7, %v3016_v58  ;;  %v4786_v12 = vpop.f32.mrb[29].mxu0  ;;  %v5200_v58 = vld [vmem:[%s6728_s2 + $0x20] ss:$16 sps:$4 sm:$0xff]   ;;  %v5205_v7 = vld [vmem:[%s6728_s2 + $0x64] ss:$16 sps:$4 sm:$0xff]  }
 0xdb7   :  { %v3062_v15 = vpop.f32.mrb[30].mxu0  ;;  %v5207_v12 = vld [vmem:[%s6728_s2 + $0xac] ss:$16 sps:$4 sm:$0xff]  }
 0xdb8   :  { %v4787_v8 = vpop.f32.mrb[31].mxu0  ;;  %v5208_v15 = vld [vmem:[%s6728_s2 + $0x60] ss:$16 sps:$4 sm:$0xff]  }
 0xdb9   :  { %v5209_v8 = vld [vmem:[%s6728_s2 + $0x84] ss:$16 sps:$4 sm:$0xff]  }
 0xdbd   :  { %v3106_v18 = vpop.f32.mrb[32].mxu0 }
 0xdbe   :  { %v3112_v21 = vadd.f32 %v3106_v18, %v3060_v9  ;;  %v4794_v23 = vpop.f32.mrb[33].mxu0  ;;  %v5206_v9 = vld [vmem:[%s6728_s2 + $0x88] ss:$16 sps:$4 sm:$0xff]  }
 0xdbf   :  { %v3109_v30 = vpop.f32.mrb[34].mxu0  ;;  %v5210_v18 = vld [vmem:[%s6728_s2 + $0xa8] ss:$16 sps:$4 sm:$0xff]   ;;  %v5212_v23 = vld [vmem:[%s6728_s2 + $0x80] ss:$16 sps:$4 sm:$0xff]  }
 0xdc0   :  { %v4795_v13 = vpop.f32.mrb[35].mxu0  ;;  %v5213_v30 = vld [vmem:[%s6728_s2 + $0xa4] ss:$16 sps:$4 sm:$0xff]  }
 0xdc1   :  { %v5214_v13 = vld [vmem:[%s6728_s2 + $0xc8] ss:$16 sps:$4 sm:$0xff]  }
 0xdcf   :  { %v3158_v5 = vpop.f32.mrb[36].mxu0 }
 0xdd0   :  { %v3164_v17 = vadd.f32 %v3158_v5, %v3112_v21  ;;  %v4802_v14 = vpop.f32.mrb[37].mxu0  ;;  %v5211_v21 = vld [vmem:[%s6728_s2 + $0xcc] ss:$16 sps:$4 sm:$0xff]  }
 0xdd1   :  { %v3161_v24 = vpop.f32.mrb[38].mxu0  ;;  %v5215_v5 = vld [vmem:[%s6728_s2 + $0xec] ss:$16 sps:$4 sm:$0xff]   ;;  %v5217_v14 = vld [vmem:[%s6728_s2 + $0xc4] ss:$16 sps:$4 sm:$0xff]  }
 0xdd2   :  { %v4803_v35 = vpop.f32.mrb[39].mxu0  ;;  %v5218_v24 = vld [vmem:[%s6728_s2 + $0xe8] ss:$16 sps:$4 sm:$0xff]  }
 0xdd3   :  { %v5219_v35 = vld [vmem:[%s6728_s2 + $0xc0] ss:$16 sps:$4 sm:$0xff]  }
 0xdd7   :  { %v3210_v57 = vpop.f32.mrb[40].mxu0 }
 0xdd8   :  { %v3216_v37 = vadd.f32 %v3210_v57, %v3164_v17  ;;  %v4810_v38 = vpop.f32.mrb[41].mxu0  ;;  %v5216_v17 = vld [vmem:[%s6728_s2 + $0xa0] ss:$16 sps:$4 sm:$0xff]   ;;  %v5220_v57 = vld [vmem:[%s6728_s2 + $0xe4] ss:$16 sps:$4 sm:$0xff]  }
 0xdd9   :  { %v3213_v34 = vpop.f32.mrb[42].mxu0 }
 0xdda   :  { %v3222_v25 = vadd.f32 %v3220_v3, %v3216_v37  ;;  %v4811_v26 = vpop.f32.mrb[43].mxu0  ;;  %v5221_v37 = vld [vmem:[%s6728_s2 + $0xe0] ss:$16 sps:$4 sm:$0xff]  }
 0xddc   :  { %v3223_v27 = vpack.c.bf16 %v3222_v25, %v3222_v25 }
 0xdde   :  { %3258 = vmatmul.mubr.bf16.vlgmr.msra.gmra.mrb[84].mxu1 %v3223_v27  ;;  %3299 = vmatmul.mubr.bf16.vlgmr.msra.gmra.mrb[44].mxu0 %v3223_v27  ;;  %v3361_v46 = vsel %vm409_vm1, %v3223_v27, 0 }
 0xddf   :  { %4814 = vmatprep.mubr.msk.bf16.mxu1 %vm5323_vm8, %v5322_v49  ;;  %4826 = vmatprep.mubr.msk.bf16.mxu0 %vm5323_vm8, %v5322_v49 }
 0xeb1   :  { %v3259_v28 = vpop.f32.mrb[84].mxu1  ;;  %v3300_v29 = vpop.f32.mrb[44].mxu0 }
 0xeb2   :  { %v3310_v31 = vpack.c.bf16 %v3259_v28, %v3259_v28  ;;  %v3261_v32 = vpop.f32.mrb[85].mxu1  ;;  %v3302_v33 = vpop.f32.mrb[45].mxu0  ;;  %v3453_v43 = vand.u32 2147483647, %v3300_v29 }
 0xeb3   :  { %v3405_v44 = vpack.c.bf16 %v3261_v32, %v3261_v32  ;;  %v3504_v48 = vand.u32 2147483647, %v3302_v33  ;;  %v3263_v53 = vpop.f32.mrb[86].mxu1  ;;  %v3304_v59 = vpop.f32.mrb[46].mxu0 }
 0xeb4   :  { %v3315_v60 = vsel %vm409_vm1, %v3310_v31, 0  ;;  %v3264_v61 = vpop.f32.mrb[87].mxu1  ;;  %v3305_v62 = vpop.f32.mrb[47].mxu0  ;;  %v3456_v52 = vpack.c.bf16 %v3453_v43, %v3453_v43 }
 0xeb5   :  { %v3410_v63 = vsel %vm409_vm1, %v3405_v44, 0  ;;  %v3507_v36 = vpack.c.bf16 %v3504_v48, %v3504_v48  ;;  %4813 = vmatpush3.bf16.msra.mxu1 %v3315_v60 }
 0xeb6   :  { %4825 = vmatpush3.bf16.msra.mxu0 %v3410_v63  ;;  %4818 = vmatprep.subr.bf16.mxu1 %v5322_v49  ;;  %v3461_v1 = vsel %vm409_vm1, %v3456_v52, 0 }
 0xeb7   :  { %4836 = vmatprep.subr.bf16.mxu0 %v5322_v49  ;;  %v3512_v47 = vsel %vm409_vm1, %v3507_v36, 0 }
 0xeb8   :  { %4815 = vmatmul.mubr.msk.bf16.vlgmr.msra.gmra.mrb[88].mxu1 %vm402_vm0, %v3309_v39 }
 0xeb9   :  { %4819 = vmatpush3.bf16.msra.mxu1 %v3361_v46  ;;  %4827 = vmatmul.mubr.msk.bf16.vlgmr.msra.gmra.mrb[48].mxu0 %vm402_vm0, %v3404_v22 }
 0xeba   :  { %4837 = vmatpush3.bf16.msra.mxu0 %v3512_v47  ;;  %4820 = vmatprep.mubr.msk.bf16.mxu1 %vm5323_vm8, %v5322_v49  ;;  %v3558_v47 = vpop.permute.xlu0 %3557 }
 0xebb   :  { %4830 = vmatprep.subr.bf16.mxu1 %v5322_v49  ;;  %4838 = vmatprep.mubr.msk.bf16.mxu0 %vm5323_vm8, %v5322_v49 }
 0xebc   :  { %3633 = vmatprep.subr.bf16.mxu0 %v5190_v45 }
 0xec0   :  { %4821 = vmatmul.mubr.msk.bf16.vlgmr.msra.gmra.mrb[92].mxu1 %vm402_vm0, %v3307_v41 }
 0xec1   :  { %4831 = vmatpush3.bf16.msra.mxu1 %v3461_v1  ;;  %4832 = vmatprep.mubr.msk.bf16.mxu1 %vm5323_vm8, %v5322_v49 }
 0xec2   :  { %4839 = vmatmul.mubr.msk.bf16.vlgmr.msra.gmra.mrb[52].mxu0 %vm402_vm0, %v3506_v42  ;;  %3592 = vmatprep.subr.bf16.mxu1 %v5191_v51 }
 0xec3   :  { %3634 = vmatpush1.bf16.msra.mxu0 %v5192_v4  ;;  %3665 = vmatprep.mubr.bf16.mxu0 %v5321_v0 }
 0xec4   :  { %3635 = vmatprep.subr.bf16.mxu0 %v5193_v10 }
 0xec7   :  { %3636 = vmatpush1.bf16.msra.mxu0 %v5194_v16 }
 0xec8   :  { %4833 = vmatmul.mubr.msk.bf16.vlgmr.msra.gmra.mrb[96].mxu1 %vm402_vm0, %v3455_v11  ;;  %3637 = vmatprep.subr.bf16.mxu0 %v5195_v56 }
 0xec9   :  { %3593 = vmatpush1.bf16.msra.mxu1 %v5196_v19  ;;  %3624 = vmatprep.mubr.bf16.mxu1 %v5321_v0  ;;  %v5201_v0 = vld [vmem:[%s6728_s2 + $0x44] ss:$16 sps:$4 sm:$0xff]  }
 0xeca   :  { %3594 = vmatprep.subr.bf16.mxu1 %v5197_v55 }
 0xecb   :  { %3638 = vmatpush1.bf16.msra.mxu0 %v5198_v20 }
 0xecc   :  { %3639 = vmatprep.subr.bf16.mxu0 %v5199_v54 }
 0xecd   :  { %3595 = vmatpush1.bf16.msra.mxu1 %v5200_v58  ;;  %v3591_v58 = vld [vmem:[%s6719_s17] sm:$0xff] }
 0xece   :  { %3596 = vmatprep.subr.bf16.mxu1 %v5201_v0 }
 0xecf   :  { %3640 = vmatpush1.bf16.msra.mxu0 %v5202_v40 }
 0xed0   :  { %3641 = vmatprep.subr.bf16.mxu0 %v5203_v2 }
 0xed1   :  { %3597 = vmatpush1.bf16.msra.mxu1 %v5204_v6 }
 0xed2   :  { %3598 = vmatprep.subr.bf16.mxu1 %v5205_v7 }
 0xed3   :  { %3642 = vmatpush1.bf16.msra.mxu0 %v5206_v9 }
 0xed4   :  { %3643 = vmatprep.subr.bf16.mxu0 %v5207_v12 }
 0xed5   :  { %3599 = vmatpush1.bf16.msra.mxu1 %v5208_v15 }
 0xed6   :  { %3600 = vmatprep.subr.bf16.mxu1 %v5209_v8 }
 0xed7   :  { %3644 = vmatpush1.bf16.msra.mxu0 %v5210_v18 }
 0xed8   :  { %3645 = vmatprep.subr.bf16.mxu0 %v5211_v21 }
 0xed9   :  { %3601 = vmatpush1.bf16.msra.mxu1 %v5212_v23 }
 0xeda   :  { %3602 = vmatprep.subr.bf16.mxu1 %v5213_v30 }
 0xedb   :  { %3646 = vmatpush1.bf16.msra.mxu0 %v5214_v13 }
 0xedc   :  { %3647 = vmatprep.subr.bf16.mxu0 %v5215_v5 }
 0xedd   :  { %3603 = vmatpush1.bf16.msra.mxu1 %v5216_v17 }
 0xede   :  { %3604 = vmatprep.subr.bf16.mxu1 %v5217_v14 }
 0xedf   :  { %3648 = vmatpush1.bf16.msra.mxu0 %v5218_v24 }
 0xee0   :  { %4848 = vmatprep.subr.bf16.mxu0 %v5322_v49 }
 0xee1   :  { %3605 = vmatpush1.bf16.msra.mxu1 %v5219_v35 }
 0xee2   :  { %3606 = vmatprep.subr.bf16.mxu1 %v5220_v57 }
 0xee5   :  { %3607 = vmatpush1.bf16.msra.mxu1 %v5221_v37 }
 0xee6   :  { %4842 = vmatprep.subr.bf16.mxu1 %v5322_v49 }
 0xf8b   :  { %v3351_v38 = vpop.f32.mrb[88].mxu1 }
 0xf8c   :  { %v4816_v3 = vpop.f32.mrb[89].mxu1  ;;  %v3446_v34 = vpop.f32.mrb[48].mxu0 }
 0xf8d   :  { %v3354_v25 = vpop.f32.mrb[90].mxu1  ;;  %v4828_v26 = vpop.f32.mrb[49].mxu0 }
 0xf8e   :  { %v4817_v27 = vpop.f32.mrb[91].mxu1  ;;  %v3449_v28 = vpop.f32.mrb[50].mxu0  ;;  %v4393_v26 = vld [vmem:[%s6718_s16 + $0x4] sm:$0xf] }
 0xf8f   :  { %v4829_v29 = vpop.f32.mrb[51].mxu0  ;;  %v4398_v28 = vld [vmem:[%s6718_s16 + $0xc] sm:$0xf] }
 0xf90   :  { %v5108_v29 = vld [vmem:[%s6729_s15 + $0x40] sm:$0xff]  }
 0xf93   :  { %v3397_v31 = vpop.f32.mrb[92].mxu1 }
 0xf94   :  { %v3398_v32 = vadd.f32 %v3397_v31, %v3351_v38  ;;  %v4822_v33 = vpop.f32.mrb[93].mxu1 }
 0xf95   :  { %v3400_v44 = vpop.f32.mrb[94].mxu1  ;;  %v3548_v48 = vpop.f32.mrb[52].mxu0 }
 0xf96   :  { %v4823_v53 = vpop.f32.mrb[95].mxu1  ;;  %v3452_v59 = vadd.f32 %v3446_v34, %v3398_v32  ;;  %v4840_v60 = vpop.f32.mrb[53].mxu0  ;;  %v4396_v44 = vld [vmem:[%s6718_s16 + $0x8] sm:$0xf] }
 0xf97   :  { %v3551_v61 = vpop.f32.mrb[54].mxu0  ;;  %v4400_v53 = vld [vmem:[%s6718_s16 + $0x10] sm:$0xf]  ;;  %v5107_v60 = vld [vmem:[%s6729_s15 + $0x8] sm:$0xff]  }
 0xf98   :  { %v4841_v62 = vpop.f32.mrb[55].mxu0  ;;  %v5109_v61 = vld [vmem:[%s6729_s15 + $0x10] sm:$0xff]  }
 0xf99   :  { %v5110_v62 = vld [vmem:[%s6729_s15 + $0x48] sm:$0xff]  }
 0xf9b   :  { %v3497_v63 = vpop.f32.mrb[96].mxu1 }
 0xf9c   :  { %v3503_v36 = vadd.f32 %v3497_v63, %v3452_v59  ;;  %v4834_v39 = vpop.f32.mrb[97].mxu1  ;;  %v5106_v59 = vld [vmem:[%s6729_s15] sm:$0xff]  }
 0xf9d   :  { %v3500_v22 = vpop.f32.mrb[98].mxu1 }
 0xf9e   :  { %v3554_v43 = vadd.f32 %v3548_v48, %v3503_v36  ;;  %v4835_v46 = vpop.f32.mrb[99].mxu1  ;;  %v5111_v36 = vld [vmem:[%s6729_s15 + $0x18] sm:$0xff]   ;;  %v5112_v22 = vld [vmem:[%s6729_s15 + $0x50] sm:$0xff]  }
 0xfa0   :  { %v3560_v52 = vadd.f32 %v3558_v47, %v3554_v43  ;;  %v5113_v47 = vld [vmem:[%s6729_s15 + $0x20] sm:$0xff]  }
 0xfa2   :  { %vm3561_vm7 = vcmp.gt.f32.partialorder %v3560_v52, 0.0  ;;  %v3562_v45 = vmul.f32 0.0, %v3560_v52 }
 0xfa4   :  { %v3563_v41 = vsel %vm3561_vm7, %v3560_v52, %v3562_v45  ;;  %v5114_v52 = vld [vmem:[%s6729_s15 + $0x58] sm:$0xff]   ;;  %v5115_v45 = vld [vmem:[%s6729_s15 + $0x28] sm:$0xff]  }
 0xfa5   :  { %v3564_v42 = vmul.f32 %v5733_v50, %v3563_v41 }
 0xfa7   :  { %3565 = vadd.xlane.f32.xlu1 %v3564_v42  ;;  %v5117_v42 = vld [vmem:[%s6729_s15 + $0x30] sm:$0xff]  }
0x1034   :  { %v3566_v1 = vpop.xlane.xlu1 %3565 }
0x1035   :  { %v3567_v51 = vmul.f32 0.083333336, %v3566_v1  ;;  %v5118_v1 = vld [vmem:[%s6729_s15 + $0x68] sm:$0xff]  }
0x1037   :  { %v3568_v4 = vsub.f32 %v3563_v41, %v3567_v51  ;;  %v5116_v41 = vld [vmem:[%s6729_s15 + $0x60] sm:$0xff]   ;;  %v5119_v51 = vld [vmem:[%s6729_s15 + $0x38] sm:$0xff]  }
0x1039   :  { %v3569_v10 = vmul.f32 %v5733_v50, %v3568_v4  ;;  %v5120_v4 = vld [vmem:[%s6729_s15 + $0x70] sm:$0xff]  }
0x103b   :  { %v3570_v11 = vmul.f32 %v3569_v10, %v3569_v10 }
0x103d   :  { %3571 = vadd.xlane.f32.xlu0 %v3570_v11 }
0x10ca   :  { %v3572_v16 = vpop.xlane.xlu0 %3571 }
0x10cb   :  { %v3573_v56 = vmul.f32 0.083333336, %v3572_v16 }
0x10cd   :  { %v3574_v19 = vadd.f32 1e-05, %v3573_v56 }
0x10cf   :  { %5154 = vrsqrt.f32 %v3574_v19 }
0x10d9   :  { %v5155_v55 = vpop.eup %5154 }
0x10da   :  { %v3576_v20 = vmul.f32 %v5155_v55, %v3569_v10  ;;  %v5121_v10 = vld [vmem:[%s6729_s15 + $0x78] sm:$0xff]   ;;  %s5324_s15 = smov [#allocation8]  }
0x10db   :  { %s4156_s9 = sshll.u32 %s5324_s15, 4  ;;  %s4157_s9 = int_to_ptr.vmem [resolvable:$true] %s4156_s9 }
0x10dc   :  { %v3577_v54 = vmul.f32 %v5733_v50, %v3576_v20  ;;  %s5288_s11 = scalar_lea.vmem %s4157_s9, 64  ;;  %p5293_p11 = scmp.lt.s32.totalorder %s4157_s9, %s4157_s9 }
0x10dd   :  { %p5289_p10 = scmp.ne.s32.totalorder %s4157_s9, %s5288_s11  ;;  %p5294_p12 = scmp.lt.s32.totalorder %s5288_s11, %s5288_s11 }
0x10de   :  { %3578 = vadd.xlane.f32.xlu1 %v3577_v54 }
0x10df   :  { %p5295_p13 = por %p5294_p12, %p5293_p11 }
0x10e1   :  { %p5296_p0 = pnand %p5295_p13, %p5289_p10 }
0x10ef   :  { %3924 = vperm.xlu1 %5007, %v3591_v58  }
0x116b   :  { %v3579_v0 = vpop.xlane.xlu1 %3578 }
0x116c   :  { %v3580_v40 = vmul.f32 0.083333336, %v3579_v0 }
0x116e   :  { %v3581_v2 = vsub.f32 %v3576_v20, %v3580_v40 }
0x1170   :  { %v3582_v6 = vmul.f32 %v5733_v50, %v3581_v2  ;;  %v3674_v50 = vld [vmem:[%s6718_s16] sm:$0xf] }
0x1172   :  { %v3583_v7 = vmul.f32 %v3582_v6, %v3582_v6 }
0x1174   :  { %3584 = vadd.xlane.f32.xlu0 %v3583_v7 }
0x1201   :  { %v3585_v9 = vpop.xlane.xlu0 %3584 }
0x1202   :  { %v3586_v12 = vmul.f32 0.083333336, %v3585_v9 }
0x1204   :  { %v3587_v15 = vadd.f32 1e-05, %v3586_v12 }
0x1206   :  { %5156 = vrsqrt.f32 %v3587_v15 }
0x1210   :  { %v5157_v8 = vpop.eup %5156 }
0x1211   :  { %v3589_v18 = vmul.f32 %v5157_v8, %v3582_v6 }
0x1213   :  { %v3590_v21 = vpack.c.bf16 %v3589_v18, %v3589_v18  ;;  %v3925_v18 = vpop.permute.xlu1 %3924 }
0x1215   :  { %3625 = vmatmul.mubr.bf16.vlgmr.msra.gmra.mrb[100].mxu1 %v3590_v21  ;;  %3666 = vmatmul.mubr.bf16.vlgmr.msra.gmra.mrb[56].mxu0 %v3590_v21  ;;  %v3728_v23 = vsel %vm409_vm1, %v3590_v21, 0 }
0x1216   :  { %4849 = vmatpush3.bf16.msra.mxu0 %v3728_v23  ;;  %4850 = vmatprep.mubr.msk.bf16.mxu0 %vm5323_vm8, %v5322_v49 }
0x1217   :  { %4860 = vmatprep.subr.bf16.mxu0 %v5322_v49  ;;  %4844 = vmatprep.mubr.msk.bf16.mxu1 %vm5323_vm8, %v5322_v49 }
0x121d   :  { %4851 = vmatmul.mubr.msk.bf16.vlgmr.msra.gmra.mrb[60].mxu0 %vm402_vm0, %v3674_v50 }
0x121e   :  { %4862 = vmatprep.mubr.msk.bf16.mxu0 %vm5323_vm8, %v5322_v49 }
0x12e8   :  { %v3626_v30 = vpop.f32.mrb[100].mxu1  ;;  %v3667_v13 = vpop.f32.mrb[56].mxu0 }
0x12e9   :  { %v3677_v5 = vpack.c.bf16 %v3626_v30, %v3626_v30  ;;  %v3820_v17 = vand.u32 2147483647, %v3667_v13  ;;  %v3628_v14 = vpop.f32.mrb[101].mxu1  ;;  %v3669_v24 = vpop.f32.mrb[57].mxu0 }
0x12ea   :  { %v3630_v35 = vpop.f32.mrb[102].mxu1  ;;  %v3671_v57 = vpop.f32.mrb[58].mxu0  ;;  %v3772_v3 = vpack.c.bf16 %v3628_v14, %v3628_v14  ;;  %v3871_v32 = vand.u32 2147483647, %v3669_v24 }
0x12eb   :  { %v3682_v37 = vsel %vm409_vm1, %v3677_v5, 0  ;;  %v3823_v38 = vpack.c.bf16 %v3820_v17, %v3820_v17  ;;  %v3631_v34 = vpop.f32.mrb[103].mxu1  ;;  %v3672_v25 = vpop.f32.mrb[59].mxu0 }
0x12ec   :  { %4843 = vmatpush3.bf16.msra.mxu1 %v3682_v37  ;;  %v3777_v31 = vsel %vm409_vm1, %v3772_v3, 0  ;;  %v3874_v33 = vpack.c.bf16 %v3871_v32, %v3871_v32  ;;  %v4147_v34 = vld [vmem:[#allocation5] sm:$0x7] }
0x12ed   :  { %v3828_v27 = vsel %vm409_vm1, %v3823_v38, 0  ;;  %4854 = vmatprep.subr.bf16.mxu1 %v5322_v49 }
0x12ee   :  { %4861 = vmatpush3.bf16.msra.mxu0 %v3828_v27  ;;  %v3879_v48 = vsel %vm409_vm1, %v3874_v33, 0 }
0x12ef   :  { %4845 = vmatmul.mubr.msk.bf16.vlgmr.msra.gmra.mrb[104].mxu1 %vm402_vm0, %v4393_v26  ;;  %4872 = vmatprep.subr.bf16.mxu0 %v5322_v49 }
0x12f0   :  { %4855 = vmatpush3.bf16.msra.mxu1 %v3777_v31  ;;  %4856 = vmatprep.mubr.msk.bf16.mxu1 %vm5323_vm8, %v5322_v49  ;;  %v3764_v63 = vpop.f32.mrb[60].mxu0 }
0x12f1   :  { %4866 = vmatprep.subr.bf16.mxu1 %v5322_v49  ;;  %4863 = vmatmul.mubr.msk.bf16.vlgmr.msra.gmra.mrb[64].mxu0 %vm402_vm0, %v4398_v28  ;;  %v4852_v39 = vpop.f32.mrb[61].mxu0 }
0x12f2   :  { %4873 = vmatpush3.bf16.msra.mxu0 %v5108_v29  ;;  %4888 = vmatprep.mubr.msk.bf16.mxu0 %vm5323_vm8, %v5322_v49  ;;  %v3767_v43 = vpop.f32.mrb[62].mxu0 }
0x12f3   :  { %4874 = vmatprep.subr.bf16.mxu0 %v5322_v49  ;;  %v4853_v46 = vpop.f32.mrb[63].mxu0 }
0x12f6   :  { %4875 = vmatpush3.bf16.msra.mxu0 %v5110_v62 }
0x12f7   :  { %4857 = vmatmul.mubr.msk.bf16.vlgmr.msra.gmra.mrb[108].mxu1 %vm402_vm0, %v4396_v44  ;;  %4876 = vmatprep.subr.bf16.mxu0 %v5322_v49 }
0x12f8   :  { %4867 = vmatpush3.bf16.msra.mxu1 %v3879_v48  ;;  %4868 = vmatprep.mubr.msk.bf16.mxu1 %vm5323_vm8, %v5322_v49 }
0x12f9   :  { %4892 = vmatprep.subr.bf16.mxu1 %v5322_v49 }
0x12fa   :  { %4877 = vmatpush3.bf16.msra.mxu0 %v5112_v22 }
0x12fb   :  { %4878 = vmatprep.subr.bf16.mxu0 %v5322_v49 }
0x12fe   :  { %4879 = vmatpush3.bf16.msra.mxu0 %v5114_v52 }
0x12ff   :  { %4869 = vmatmul.mubr.msk.bf16.vlgmr.msra.gmra.mrb[112].mxu1 %vm402_vm0, %v4400_v53  ;;  %4880 = vmatprep.subr.bf16.mxu0 %v5322_v49 }
0x1300   :  { %4893 = vmatpush3.bf16.msra.mxu1 %v5106_v59  ;;  %4908 = vmatprep.mubr.msk.bf16.mxu1 %vm5323_vm8, %v5322_v49 }
0x1301   :  { %4894 = vmatprep.subr.bf16.mxu1 %v5322_v49 }
0x1302   :  { %4881 = vmatpush3.bf16.msra.mxu0 %v5116_v41 }
0x1303   :  { %4882 = vmatprep.subr.bf16.mxu0 %v5322_v49 }
0x1304   :  { %4895 = vmatpush3.bf16.msra.mxu1 %v5107_v60 }
0x1305   :  { %4896 = vmatprep.subr.bf16.mxu1 %v5322_v49 }
0x1306   :  { %4883 = vmatpush3.bf16.msra.mxu0 %v5118_v1 }
0x1307   :  { %4884 = vmatprep.subr.bf16.mxu0 %v5322_v49 }
0x1308   :  { %4897 = vmatpush3.bf16.msra.mxu1 %v5109_v61 }
0x1309   :  { %4898 = vmatprep.subr.bf16.mxu1 %v5322_v49 }
0x130a   :  { %4885 = vmatpush3.bf16.msra.mxu0 %v5120_v4 }
0x130b   :  { %4886 = vmatprep.subr.bf16.mxu0 %v5322_v49 }
0x130c   :  { %4899 = vmatpush3.bf16.msra.mxu1 %v5111_v36 }
0x130d   :  { %4900 = vmatprep.subr.bf16.mxu1 %v5322_v49 }
0x130e   :  { %4887 = vmatpush3.bf16.msra.mxu0 %v5121_v10 }
0x1310   :  { %4901 = vmatpush3.bf16.msra.mxu1 %v5113_v47 }
0x1311   :  { %4902 = vmatprep.subr.bf16.mxu1 %v5322_v49 }
0x1314   :  { %4903 = vmatpush3.bf16.msra.mxu1 %v5115_v45 }
0x1315   :  { %4904 = vmatprep.subr.bf16.mxu1 %v5322_v49 }
0x1318   :  { %4905 = vmatpush3.bf16.msra.mxu1 %v5117_v42 }
0x1319   :  { %4906 = vmatprep.subr.bf16.mxu1 %v5322_v49 }
0x131c   :  { %4907 = vmatpush3.bf16.msra.mxu1 %v5119_v51 }
0x13c2   :  { %v3718_v11 = vpop.f32.mrb[104].mxu1 }
0x13c3   :  { %v4846_v16 = vpop.f32.mrb[105].mxu1  ;;  %v3765_v56 = vadd.f32 %v3764_v63, %v3718_v11 }
0x13c4   :  { %v3721_v19 = vpop.f32.mrb[106].mxu1  ;;  %v3864_v55 = vpop.f32.mrb[64].mxu0 }
0x13c5   :  { %v4847_v20 = vpop.f32.mrb[107].mxu1  ;;  %v4864_v54 = vpop.f32.mrb[65].mxu0 }
0x13c6   :  { %v3867_v58 = vpop.f32.mrb[66].mxu0 }
0x13c7   :  { %v4865_v0 = vpop.f32.mrb[67].mxu0 }
0x13ca   :  { %v3813_v40 = vpop.f32.mrb[108].mxu1 }
0x13cb   :  { %v3819_v2 = vadd.f32 %v3813_v40, %v3765_v56  ;;  %v4858_v6 = vpop.f32.mrb[109].mxu1 }
0x13cc   :  { %v3816_v7 = vpop.f32.mrb[110].mxu1 }
0x13cd   :  { %v3870_v9 = vadd.f32 %v3864_v55, %v3819_v2  ;;  %v4859_v49 = vpop.f32.mrb[111].mxu1 }
0x13d2   :  { %v3915_v12 = vpop.f32.mrb[112].mxu1 }
0x13d3   :  { %v3921_v15 = vadd.f32 %v3915_v12, %v3870_v9  ;;  %v4870_v8 = vpop.f32.mrb[113].mxu1 }
0x13d4   :  { %v3918_v21 = vpop.f32.mrb[114].mxu1 }
0x13d5   :  { %v3927_v23 = vadd.f32 %v3925_v18, %v3921_v15  ;;  %v4871_v50 = vpop.f32.mrb[115].mxu1 }
0x13d7   :  { %v3928_v30 = vpack.c.bf16 %v3927_v23, %v3927_v23 }
0x13d9   :  { %v3963_v13 = vshrl.u32 %v3928_v30, 16  ;;  %v3966_v5 = vshll.u32 %v3928_v30, 16  ;;  %4909 = vmatmul.mubr.bf16.vlgmr.msra.gmra.mrb[116].mxu1 %v3928_v30 }
0x13db   :  { %v3965_v17 = vrot.slane %v3963_v13, 1  ;;  %v3968_v14 = vrot.slane %v3966_v5, 2 }
0x13dd   :  { %v3969_v24 = vor.u32 %v3968_v14, %v3965_v17 }
0x13df   :  { %4889 = vmatmul.mubr.bf16.vlgmr.msra.gmra.mrb[68].mxu0 %v3969_v24 }
0x14ac   :  { %v4141_v35 = vpop.f32.mrb[116].mxu1 }
0x14ad   :  { %v4910_v57 = vpop.f32.mrb[117].mxu1 }
0x14ae   :  { %v4144_v37 = vpop.f32.mrb[118].mxu1 }
0x14af   :  { %v4911_v38 = vpop.f32.mrb[119].mxu1 }
0x14b2   :  { %v4053_v3 = vpop.f32.mrb[68].mxu0 }
0x14b3   :  { %v4142_v25 = vadd.f32 %v4141_v35, %v4053_v3  ;;  %v4890_v26 = vpop.f32.mrb[69].mxu0 }
0x14b4   :  { %v4056_v27 = vpop.f32.mrb[70].mxu0 }
0x14b5   :  { %v4148_v28 = vadd.f32 %v4147_v34, %v4142_v25  ;;  %v4891_v29 = vpop.f32.mrb[71].mxu0 }
0x14b7   :  { %4149 = vst [vmem:[#allocation8] sm:$0x7] %v4148_v28 }
0x14b8   :  { %5299 = shalt.err (!%p5296_p0)
}
0x14b9   :  { %s5300_s0 = scalar_lea.hbm %s6720_s18, 64 }
0x14ba   :  { %p5301_p1 = scmp.ne.s32.totalorder %s6720_s18, %s5300_s0  ;;  %p5304_p2 = scmp.lt.u32.totalorder %s5300_s0, %s6720_s18 }
0x14bc   :  { %p5306_p3 = pnand %p5304_p2, %p5301_p1 }
0x14be   :  { %5309 = shalt.err (!%p5306_p3)
}
0x14bf   :  { %4159 = dma.vmem_to_hbm [thread:$0]  %s4157_s9, 64, %s6720_s18, [#allocation4]  }
0x14c0   :  { %5314 = dma.done.wait [#allocation4], 64  }
0x14c1   :  { %5315 = vsyncadd [#allocation4], 4294967232 }
0x14c2   :  { %4163 = vsyncpa [#allocation3], 1 }
0x14c3   :  { %4164 = vsyncpa [#allocation6], 1 }
0x14c4   :  { %4165 = vsyncpa [#allocation4], 1 }

</bundles_post_ra>
